<compile_context>
chip_gen: v6e
topology: v6e:2x2x1
jax: 0.10.0
libtpu: 0.0.40
codegen_flags: <defaults>
</compile_context>

<pallas_src>
import jax
import jax.numpy as jnp
from jax.experimental import pallas as pl
from jax.experimental.pallas import tpu as pltpu


def _pick_tile_h(N, H, W, Cout, *, max_block_bytes=4 << 20, min_steps=4):
    """Largest legal row-tile whose f32 output block fits comfortably in VMEM,
    preferring a choice that leaves >= min_steps grid steps (v7x has 2 TCs)."""
    cap = max(1, max_block_bytes // (Cout * 4 * W * 4))  # rows per block
    cands = [t for t in range(8, H + 1, 8) if H % t == 0 and t <= cap]
    if not cands:
        return H  # full-H block is always layout-legal
    for t in sorted(cands, reverse=True):
        if N * (H // t) >= min_steps:
            return t
    return min(cands)


def _make_kernel(Cin, Cout, kH, kW, tile_h, W, out_dtype):
    f32 = jnp.float32

    def kernel(x_ref, w_ref, b_ref, o_ref):
        # x_ref: (1, Cin, tile_h, W)          VMEM (native NCHW tile)
        # w_ref: (Cin*Cout*kH*kW,)            SMEM (flattened ConvTranspose2d weight)
        # b_ref: (Cout,)                      SMEM
        # o_ref: (1, Cout, kH*tile_h, kW*W)   VMEM (final NCHW tile)

        # Constant 0/1 scatter matrices, built on-chip:
        #   U[kw] (W, kW*W):         U[kw][w, 2w+kw] = 1   (lane / width interleave)
        #   V[kh] (kH*tile_h, tile_h): V[kh][2h+kh, h] = 1  (sublane / row interleave)
        cw = jax.lax.broadcasted_iota(jnp.int32, (W, kW * W), 1)
        rw = jax.lax.broadcasted_iota(jnp.int32, (W, kW * W), 0)
        U = [(cw == kW * rw + kw).astype(f32) for kw in range(kW)]
        rh = jax.lax.broadcasted_iota(jnp.int32, (kH * tile_h, tile_h), 0)
        ch = jax.lax.broadcasted_iota(jnp.int32, (kH * tile_h, tile_h), 1)
        V = [(rh == kH * ch + kh).astype(f32) for kh in range(kH)]

        # Load the Cin input planes once, in their native (tile_h, W) layout.
        x_planes = [x_ref[0, ci, :, :].astype(f32) for ci in range(Cin)]

        for co in range(Cout):
            b_co = b_ref[co]
            rows = []
            for kh in range(kH):
                seg = None
                for kw in range(kW):
                    # Channel contraction on the VPU (Cin is tiny -> MXU idle).
                    acc = None
                    for ci in range(Cin):
                        wv = w_ref[((ci * Cout + co) * kH + kh) * kW + kw]
                        term = x_planes[ci] * wv
                        acc = term if acc is None else acc + term
                    q = jnp.maximum(acc + b_co, 0.0)           # bias + ReLU (f32)
                    s = jnp.dot(q, U[kw], preferred_element_type=f32)
                    seg = s if seg is None else seg + s        # (tile_h, kW*W)
                rows.append(seg)
            out_co = None
            for kh in range(kH):
                t = jnp.dot(V[kh], rows[kh], preferred_element_type=f32)
                out_co = t if out_co is None else out_co + t   # (kH*tile_h, kW*W)
            o_ref[0, co, :, :] = out_co.astype(out_dtype)

    return kernel


def deconv2d_bn_forward(x, weight, bias, *, kernel_size=2, stride=2, tile_h=None):
    """x: (N, Cin, H, W) NCHW.  weight: (Cin, Cout, kH, kW).  bias: (Cout,).
    Returns ReLU(ConvTranspose2d(x)) of shape (N, Cout, 2H, 2W) NCHW."""
    assert kernel_size == 2 and stride == 2, "kernel specializes k=2, s=2 (no overlap)"
    N, Cin, H, W = x.shape
    Cin_w, Cout, kH, kW = weight.shape
    assert Cin == Cin_w and kH == 2 and kW == 2

    out_dtype = x.dtype
    if tile_h is None:
        tile_h = _pick_tile_h(N, H, W, Cout)
    assert H % tile_h == 0 and (tile_h % 8 == 0 or tile_h == H), "illegal tile_h"
    grid = (N, H // tile_h)

    w_flat = weight.astype(jnp.float32).reshape(-1)   # (Cin*Cout*kH*kW,), tiny -> SMEM
    b_vec = bias.astype(jnp.float32)                  # (Cout,), tiny -> SMEM

    Ho, Wo = kH * H, kW * W
    flops = 2 * N * H * W * Cin * Cout * kH * kW
    bytes_accessed = (x.size * x.dtype.itemsize
                      + w_flat.size * 4 + b_vec.size * 4
                      + N * Cout * Ho * Wo * jnp.dtype(out_dtype).itemsize)

    kernel = _make_kernel(Cin, Cout, kH, kW, tile_h, W, out_dtype)

    out = pl.pallas_call(
        kernel,
        out_shape=jax.ShapeDtypeStruct((N, Cout, Ho, Wo), out_dtype),
        grid_spec=pltpu.PrefetchScalarGridSpec(
            num_scalar_prefetch=0,
            grid=grid,
            in_specs=[
                pl.BlockSpec((1, Cin, tile_h, W), lambda n, hb: (n, 0, hb, 0)),
                pl.BlockSpec(memory_space=pltpu.MemorySpace.SMEM),
                pl.BlockSpec(memory_space=pltpu.MemorySpace.SMEM),
            ],
            out_specs=pl.BlockSpec((1, Cout, kH * tile_h, kW * W),
                                   lambda n, hb: (n, 0, hb, 0)),
        ),
        compiler_params=pltpu.CompilerParams(
            dimension_semantics=("parallel", "parallel"),
            vmem_limit_bytes=32 * 1024 * 1024,
        ),
        cost_estimate=pl.CostEstimate(flops=flops, transcendentals=0,
                                      bytes_accessed=bytes_accessed),
    )(x, w_flat, b_vec)
    return out


if __name__ == "__main__":
    # Small, deterministic example consistent with the module.
    N, Cin, H, W = 2, 4, 16, 16
    Cout, k, s = 8, 2, 2

    key = jax.random.PRNGKey(0)
    kx, kw_, kb = jax.random.split(key, 3)

    x = jax.random.normal(kx, (N, Cin, H, W), dtype=jnp.float32)

    # Deterministic param init mimicking PyTorch's default uniform(-1/sqrt(fan), +1/sqrt(fan))
    fan = Cin * k * k
    bound = 1.0 / jnp.sqrt(fan)
    weight = jax.random.uniform(kw_, (Cin, Cout, k, k), minval=-bound, maxval=bound,
                                dtype=jnp.float32)
    bias = jax.random.uniform(kb, (Cout,), minval=-bound, maxval=bound, dtype=jnp.float32)

    out = deconv2d_bn_forward(x, weight, bias, kernel_size=k, stride=s)
    out = jax.block_until_ready(out)

    # Pure-JAX reference of the same math.
    ref = jnp.einsum("nihw,iokl->nohwkl", x, weight)
    ref = ref + bias[None, :, None, None, None, None]
    ref = jnp.transpose(ref, (0, 1, 2, 4, 3, 5)).reshape(N, Cout, H * k, W * k)
    ref = jnp.maximum(ref, 0.0)

    assert out.shape == (N, Cout, H * s, W * s)
    assert jnp.allclose(out, ref, atol=1e-5, rtol=1e-5)

    print("KERNEL_OK")
</pallas_src>

<mosaic_0001>
module attributes {stable_mosaic.version = 11 : i64} {
  func.func @kernel(%arg0: i32, %arg1: i32, %arg2: memref<1x4x8x16xf32, #tpu.memory_space<vmem>>, %arg3: memref<128xf32, #tpu.memory_space<smem>>, %arg4: memref<8xf32, #tpu.memory_space<smem>>, %arg5: memref<1x8x16x32xf32, #tpu.memory_space<vmem>>) attributes {dimension_semantics = [#tpu.dimension_semantics<parallel>, #tpu.dimension_semantics<parallel>], iteration_bounds = array<i64: 2, 2>, scalar_prefetch = 0 : i64, scratch_operands = 0 : i64, tpu.core_type = #tpu.core_type<tc>, window_params = [{transform_indices = @transform_0, window_bounds = array<i64: 1, 4, 8, 16>}, {transform_indices = @transform_1, window_bounds = array<i64: 128>}, {transform_indices = @transform_2, window_bounds = array<i64: 8>}, {transform_indices = @transform_3, window_bounds = array<i64: 1, 8, 16, 32>}]} {
    %0 = tpu.iota {dimensions = array<i32: 1>} : vector<16x32xi32>
    %1 = tpu.iota {dimensions = array<i32: 0>} : vector<16x32xi32>
    %c2_i32 = arith.constant 2 : i32
    %2 = vector.broadcast %c2_i32 : i32 to vector<16x32xi32>
    %3 = arith.muli %2, %1 : vector<16x32xi32>
    %c0_i32 = arith.constant 0 : i32
    %4 = vector.broadcast %c0_i32 : i32 to vector<16x32xi32>
    %5 = arith.addi %3, %4 : vector<16x32xi32>
    %6 = arith.cmpi eq, %0, %5 : vector<16x32xi32>
    %7 = arith.extui %6 : vector<16x32xi1> to vector<16x32xi32>
    %8 = arith.sitofp %7 : vector<16x32xi32> to vector<16x32xf32>
    %c2_i32_0 = arith.constant 2 : i32
    %9 = vector.broadcast %c2_i32_0 : i32 to vector<16x32xi32>
    %10 = arith.muli %9, %1 : vector<16x32xi32>
    %c1_i32 = arith.constant 1 : i32
    %11 = vector.broadcast %c1_i32 : i32 to vector<16x32xi32>
    %12 = arith.addi %10, %11 : vector<16x32xi32>
    %13 = arith.cmpi eq, %0, %12 : vector<16x32xi32>
    %14 = arith.extui %13 : vector<16x32xi1> to vector<16x32xi32>
    %15 = arith.sitofp %14 : vector<16x32xi32> to vector<16x32xf32>
    %16 = tpu.iota {dimensions = array<i32: 0>} : vector<16x8xi32>
    %17 = tpu.iota {dimensions = array<i32: 1>} : vector<16x8xi32>
    %c2_i32_1 = arith.constant 2 : i32
    %18 = vector.broadcast %c2_i32_1 : i32 to vector<16x8xi32>
    %19 = arith.muli %18, %17 : vector<16x8xi32>
    %c0_i32_2 = arith.constant 0 : i32
    %20 = vector.broadcast %c0_i32_2 : i32 to vector<16x8xi32>
    %21 = arith.addi %19, %20 : vector<16x8xi32>
    %22 = arith.cmpi eq, %16, %21 : vector<16x8xi32>
    %23 = arith.extui %22 : vector<16x8xi1> to vector<16x8xi32>
    %24 = arith.sitofp %23 : vector<16x8xi32> to vector<16x8xf32>
    %c2_i32_3 = arith.constant 2 : i32
    %25 = vector.broadcast %c2_i32_3 : i32 to vector<16x8xi32>
    %26 = arith.muli %25, %17 : vector<16x8xi32>
    %c1_i32_4 = arith.constant 1 : i32
    %27 = vector.broadcast %c1_i32_4 : i32 to vector<16x8xi32>
    %28 = arith.addi %26, %27 : vector<16x8xi32>
    %29 = arith.cmpi eq, %16, %28 : vector<16x8xi32>
    %30 = arith.extui %29 : vector<16x8xi1> to vector<16x8xi32>
    %31 = arith.sitofp %30 : vector<16x8xi32> to vector<16x8xf32>
    %c0 = arith.constant 0 : index
    %c0_5 = arith.constant 0 : index
    %c0_6 = arith.constant 0 : index
    %c0_7 = arith.constant 0 : index
    %32 = vector.load %arg2[%c0, %c0_5, %c0_6, %c0_7] : memref<1x4x8x16xf32, #tpu.memory_space<vmem>>, vector<1x1x8x16xf32>
    %33 = vector.shape_cast %32 : vector<1x1x8x16xf32> to vector<8x16xf32>
    %c0_8 = arith.constant 0 : index
    %c1 = arith.constant 1 : index
    %c0_9 = arith.constant 0 : index
    %c0_10 = arith.constant 0 : index
    %34 = vector.load %arg2[%c0_8, %c1, %c0_9, %c0_10] : memref<1x4x8x16xf32, #tpu.memory_space<vmem>>, vector<1x1x8x16xf32>
    %35 = vector.shape_cast %34 : vector<1x1x8x16xf32> to vector<8x16xf32>
    %c0_11 = arith.constant 0 : index
    %c2 = arith.constant 2 : index
    %c0_12 = arith.constant 0 : index
    %c0_13 = arith.constant 0 : index
    %36 = vector.load %arg2[%c0_11, %c2, %c0_12, %c0_13] : memref<1x4x8x16xf32, #tpu.memory_space<vmem>>, vector<1x1x8x16xf32>
    %37 = vector.shape_cast %36 : vector<1x1x8x16xf32> to vector<8x16xf32>
    %c0_14 = arith.constant 0 : index
    %c3 = arith.constant 3 : index
    %c0_15 = arith.constant 0 : index
    %c0_16 = arith.constant 0 : index
    %38 = vector.load %arg2[%c0_14, %c3, %c0_15, %c0_16] : memref<1x4x8x16xf32, #tpu.memory_space<vmem>>, vector<1x1x8x16xf32>
    %39 = vector.shape_cast %38 : vector<1x1x8x16xf32> to vector<8x16xf32>
    %c0_17 = arith.constant 0 : index
    %40 = memref.load %arg4[%c0_17] : memref<8xf32, #tpu.memory_space<smem>>
    %c0_18 = arith.constant 0 : index
    %41 = memref.load %arg3[%c0_18] : memref<128xf32, #tpu.memory_space<smem>>
    %42 = vector.broadcast %41 : f32 to vector<8x16xf32>
    %43 = arith.mulf %33, %42 : vector<8x16xf32>
    %c32 = arith.constant 32 : index
    %44 = memref.load %arg3[%c32] : memref<128xf32, #tpu.memory_space<smem>>
    %45 = vector.broadcast %44 : f32 to vector<8x16xf32>
    %46 = arith.mulf %35, %45 : vector<8x16xf32>
    %47 = arith.addf %43, %46 : vector<8x16xf32>
    %c64 = arith.constant 64 : index
    %48 = memref.load %arg3[%c64] : memref<128xf32, #tpu.memory_space<smem>>
    %49 = vector.broadcast %48 : f32 to vector<8x16xf32>
    %50 = arith.mulf %37, %49 : vector<8x16xf32>
    %51 = arith.addf %47, %50 : vector<8x16xf32>
    %c96 = arith.constant 96 : index
    %52 = memref.load %arg3[%c96] : memref<128xf32, #tpu.memory_space<smem>>
    %53 = vector.broadcast %52 : f32 to vector<8x16xf32>
    %54 = arith.mulf %39, %53 : vector<8x16xf32>
    %55 = arith.addf %51, %54 : vector<8x16xf32>
    %56 = vector.broadcast %40 : f32 to vector<8x16xf32>
    %57 = arith.addf %55, %56 : vector<8x16xf32>
    %cst = arith.constant 0.000000e+00 : f32
    %58 = vector.broadcast %cst : f32 to vector<8x16xf32>
    %59 = arith.maximumf %57, %58 : vector<8x16xf32>
    %cst_19 = arith.constant dense<0.000000e+00> : vector<8x32xf32>
    %60 = tpu.matmul %59, %8, %cst_19 {dimension_numbers = #tpu.dot_dimension_numbers<[1], [0], [0], [1], [0, 0, 1, 1], [], []>} : vector<8x16xf32>, vector<16x32xf32>, vector<8x32xf32> -> vector<8x32xf32>
    %c1_20 = arith.constant 1 : index
    %61 = memref.load %arg3[%c1_20] : memref<128xf32, #tpu.memory_space<smem>>
    %62 = vector.broadcast %61 : f32 to vector<8x16xf32>
    %63 = arith.mulf %33, %62 : vector<8x16xf32>
    %c33 = arith.constant 33 : index
    %64 = memref.load %arg3[%c33] : memref<128xf32, #tpu.memory_space<smem>>
    %65 = vector.broadcast %64 : f32 to vector<8x16xf32>
    %66 = arith.mulf %35, %65 : vector<8x16xf32>
    %67 = arith.addf %63, %66 : vector<8x16xf32>
    %c65 = arith.constant 65 : index
    %68 = memref.load %arg3[%c65] : memref<128xf32, #tpu.memory_space<smem>>
    %69 = vector.broadcast %68 : f32 to vector<8x16xf32>
    %70 = arith.mulf %37, %69 : vector<8x16xf32>
    %71 = arith.addf %67, %70 : vector<8x16xf32>
    %c97 = arith.constant 97 : index
    %72 = memref.load %arg3[%c97] : memref<128xf32, #tpu.memory_space<smem>>
    %73 = vector.broadcast %72 : f32 to vector<8x16xf32>
    %74 = arith.mulf %39, %73 : vector<8x16xf32>
    %75 = arith.addf %71, %74 : vector<8x16xf32>
    %76 = vector.broadcast %40 : f32 to vector<8x16xf32>
    %77 = arith.addf %75, %76 : vector<8x16xf32>
    %cst_21 = arith.constant 0.000000e+00 : f32
    %78 = vector.broadcast %cst_21 : f32 to vector<8x16xf32>
    %79 = arith.maximumf %77, %78 : vector<8x16xf32>
    %cst_22 = arith.constant dense<0.000000e+00> : vector<8x32xf32>
    %80 = tpu.matmul %79, %15, %cst_22 {dimension_numbers = #tpu.dot_dimension_numbers<[1], [0], [0], [1], [0, 0, 1, 1], [], []>} : vector<8x16xf32>, vector<16x32xf32>, vector<8x32xf32> -> vector<8x32xf32>
    %81 = arith.addf %60, %80 : vector<8x32xf32>
    %c2_23 = arith.constant 2 : index
    %82 = memref.load %arg3[%c2_23] : memref<128xf32, #tpu.memory_space<smem>>
    %83 = vector.broadcast %82 : f32 to vector<8x16xf32>
    %84 = arith.mulf %33, %83 : vector<8x16xf32>
    %c34 = arith.constant 34 : index
    %85 = memref.load %arg3[%c34] : memref<128xf32, #tpu.memory_space<smem>>
    %86 = vector.broadcast %85 : f32 to vector<8x16xf32>
    %87 = arith.mulf %35, %86 : vector<8x16xf32>
    %88 = arith.addf %84, %87 : vector<8x16xf32>
    %c66 = arith.constant 66 : index
    %89 = memref.load %arg3[%c66] : memref<128xf32, #tpu.memory_space<smem>>
    %90 = vector.broadcast %89 : f32 to vector<8x16xf32>
    %91 = arith.mulf %37, %90 : vector<8x16xf32>
    %92 = arith.addf %88, %91 : vector<8x16xf32>
    %c98 = arith.constant 98 : index
    %93 = memref.load %arg3[%c98] : memref<128xf32, #tpu.memory_space<smem>>
    %94 = vector.broadcast %93 : f32 to vector<8x16xf32>
    %95 = arith.mulf %39, %94 : vector<8x16xf32>
    %96 = arith.addf %92, %95 : vector<8x16xf32>
    %97 = vector.broadcast %40 : f32 to vector<8x16xf32>
    %98 = arith.addf %96, %97 : vector<8x16xf32>
    %cst_24 = arith.constant 0.000000e+00 : f32
    %99 = vector.broadcast %cst_24 : f32 to vector<8x16xf32>
    %100 = arith.maximumf %98, %99 : vector<8x16xf32>
    %cst_25 = arith.constant dense<0.000000e+00> : vector<8x32xf32>
    %101 = tpu.matmul %100, %8, %cst_25 {dimension_numbers = #tpu.dot_dimension_numbers<[1], [0], [0], [1], [0, 0, 1, 1], [], []>} : vector<8x16xf32>, vector<16x32xf32>, vector<8x32xf32> -> vector<8x32xf32>
    %c3_26 = arith.constant 3 : index
    %102 = memref.load %arg3[%c3_26] : memref<128xf32, #tpu.memory_space<smem>>
    %103 = vector.broadcast %102 : f32 to vector<8x16xf32>
    %104 = arith.mulf %33, %103 : vector<8x16xf32>
    %c35 = arith.constant 35 : index
    %105 = memref.load %arg3[%c35] : memref<128xf32, #tpu.memory_space<smem>>
    %106 = vector.broadcast %105 : f32 to vector<8x16xf32>
    %107 = arith.mulf %35, %106 : vector<8x16xf32>
    %108 = arith.addf %104, %107 : vector<8x16xf32>
    %c67 = arith.constant 67 : index
    %109 = memref.load %arg3[%c67] : memref<128xf32, #tpu.memory_space<smem>>
    %110 = vector.broadcast %109 : f32 to vector<8x16xf32>
    %111 = arith.mulf %37, %110 : vector<8x16xf32>
    %112 = arith.addf %108, %111 : vector<8x16xf32>
    %c99 = arith.constant 99 : index
    %113 = memref.load %arg3[%c99] : memref<128xf32, #tpu.memory_space<smem>>
    %114 = vector.broadcast %113 : f32 to vector<8x16xf32>
    %115 = arith.mulf %39, %114 : vector<8x16xf32>
    %116 = arith.addf %112, %115 : vector<8x16xf32>
    %117 = vector.broadcast %40 : f32 to vector<8x16xf32>
    %118 = arith.addf %116, %117 : vector<8x16xf32>
    %cst_27 = arith.constant 0.000000e+00 : f32
    %119 = vector.broadcast %cst_27 : f32 to vector<8x16xf32>
    %120 = arith.maximumf %118, %119 : vector<8x16xf32>
    %cst_28 = arith.constant dense<0.000000e+00> : vector<8x32xf32>
    %121 = tpu.matmul %120, %15, %cst_28 {dimension_numbers = #tpu.dot_dimension_numbers<[1], [0], [0], [1], [0, 0, 1, 1], [], []>} : vector<8x16xf32>, vector<16x32xf32>, vector<8x32xf32> -> vector<8x32xf32>
    %122 = arith.addf %101, %121 : vector<8x32xf32>
    %cst_29 = arith.constant dense<0.000000e+00> : vector<16x32xf32>
    %123 = tpu.matmul %24, %81, %cst_29 {dimension_numbers = #tpu.dot_dimension_numbers<[1], [0], [0], [1], [0, 0, 1, 1], [], []>} : vector<16x8xf32>, vector<8x32xf32>, vector<16x32xf32> -> vector<16x32xf32>
    %cst_30 = arith.constant dense<0.000000e+00> : vector<16x32xf32>
    %124 = tpu.matmul %31, %122, %cst_30 {dimension_numbers = #tpu.dot_dimension_numbers<[1], [0], [0], [1], [0, 0, 1, 1], [], []>} : vector<16x8xf32>, vector<8x32xf32>, vector<16x32xf32> -> vector<16x32xf32>
    %125 = arith.addf %123, %124 : vector<16x32xf32>
    %c0_31 = arith.constant 0 : index
    %c0_32 = arith.constant 0 : index
    %c0_33 = arith.constant 0 : index
    %c0_34 = arith.constant 0 : index
    %126 = vector.load %arg5[%c0_31, %c0_32, %c0_33, %c0_34] : memref<1x8x16x32xf32, #tpu.memory_space<vmem>>, vector<1x1x16x32xf32>
    %127 = vector.shape_cast %126 : vector<1x1x16x32xf32> to vector<16x32xf32>
    %128 = vector.shape_cast %125 : vector<16x32xf32> to vector<1x1x16x32xf32>
    tpu.vector_store %arg5[%c0_31, %c0_32, %c0_33, %c0_34], %128 {strides = array<i32>} : memref<1x8x16x32xf32, #tpu.memory_space<vmem>>, vector<1x1x16x32xf32>,
    %c1_35 = arith.constant 1 : index
    %129 = memref.load %arg4[%c1_35] : memref<8xf32, #tpu.memory_space<smem>>
    %c4 = arith.constant 4 : index
    %130 = memref.load %arg3[%c4] : memref<128xf32, #tpu.memory_space<smem>>
    %131 = vector.broadcast %130 : f32 to vector<8x16xf32>
    %132 = arith.mulf %33, %131 : vector<8x16xf32>
    %c36 = arith.constant 36 : index
    %133 = memref.load %arg3[%c36] : memref<128xf32, #tpu.memory_space<smem>>
    %134 = vector.broadcast %133 : f32 to vector<8x16xf32>
    %135 = arith.mulf %35, %134 : vector<8x16xf32>
    %136 = arith.addf %132, %135 : vector<8x16xf32>
    %c68 = arith.constant 68 : index
    %137 = memref.load %arg3[%c68] : memref<128xf32, #tpu.memory_space<smem>>
    %138 = vector.broadcast %137 : f32 to vector<8x16xf32>
    %139 = arith.mulf %37, %138 : vector<8x16xf32>
    %140 = arith.addf %136, %139 : vector<8x16xf32>
    %c100 = arith.constant 100 : index
    %141 = memref.load %arg3[%c100] : memref<128xf32, #tpu.memory_space<smem>>
    %142 = vector.broadcast %141 : f32 to vector<8x16xf32>
    %143 = arith.mulf %39, %142 : vector<8x16xf32>
    %144 = arith.addf %140, %143 : vector<8x16xf32>
    %145 = vector.broadcast %129 : f32 to vector<8x16xf32>
    %146 = arith.addf %144, %145 : vector<8x16xf32>
    %cst_36 = arith.constant 0.000000e+00 : f32
    %147 = vector.broadcast %cst_36 : f32 to vector<8x16xf32>
    %148 = arith.maximumf %146, %147 : vector<8x16xf32>
    %cst_37 = arith.constant dense<0.000000e+00> : vector<8x32xf32>
    %149 = tpu.matmul %148, %8, %cst_37 {dimension_numbers = #tpu.dot_dimension_numbers<[1], [0], [0], [1], [0, 0, 1, 1], [], []>} : vector<8x16xf32>, vector<16x32xf32>, vector<8x32xf32> -> vector<8x32xf32>
    %c5 = arith.constant 5 : index
    %150 = memref.load %arg3[%c5] : memref<128xf32, #tpu.memory_space<smem>>
    %151 = vector.broadcast %150 : f32 to vector<8x16xf32>
    %152 = arith.mulf %33, %151 : vector<8x16xf32>
    %c37 = arith.constant 37 : index
    %153 = memref.load %arg3[%c37] : memref<128xf32, #tpu.memory_space<smem>>
    %154 = vector.broadcast %153 : f32 to vector<8x16xf32>
    %155 = arith.mulf %35, %154 : vector<8x16xf32>
    %156 = arith.addf %152, %155 : vector<8x16xf32>
    %c69 = arith.constant 69 : index
    %157 = memref.load %arg3[%c69] : memref<128xf32, #tpu.memory_space<smem>>
    %158 = vector.broadcast %157 : f32 to vector<8x16xf32>
    %159 = arith.mulf %37, %158 : vector<8x16xf32>
    %160 = arith.addf %156, %159 : vector<8x16xf32>
    %c101 = arith.constant 101 : index
    %161 = memref.load %arg3[%c101] : memref<128xf32, #tpu.memory_space<smem>>
    %162 = vector.broadcast %161 : f32 to vector<8x16xf32>
    %163 = arith.mulf %39, %162 : vector<8x16xf32>
    %164 = arith.addf %160, %163 : vector<8x16xf32>
    %165 = vector.broadcast %129 : f32 to vector<8x16xf32>
    %166 = arith.addf %164, %165 : vector<8x16xf32>
    %cst_38 = arith.constant 0.000000e+00 : f32
    %167 = vector.broadcast %cst_38 : f32 to vector<8x16xf32>
    %168 = arith.maximumf %166, %167 : vector<8x16xf32>
    %cst_39 = arith.constant dense<0.000000e+00> : vector<8x32xf32>
    %169 = tpu.matmul %168, %15, %cst_39 {dimension_numbers = #tpu.dot_dimension_numbers<[1], [0], [0], [1], [0, 0, 1, 1], [], []>} : vector<8x16xf32>, vector<16x32xf32>, vector<8x32xf32> -> vector<8x32xf32>
    %170 = arith.addf %149, %169 : vector<8x32xf32>
    %c6 = arith.constant 6 : index
    %171 = memref.load %arg3[%c6] : memref<128xf32, #tpu.memory_space<smem>>
    %172 = vector.broadcast %171 : f32 to vector<8x16xf32>
    %173 = arith.mulf %33, %172 : vector<8x16xf32>
    %c38 = arith.constant 38 : index
    %174 = memref.load %arg3[%c38] : memref<128xf32, #tpu.memory_space<smem>>
    %175 = vector.broadcast %174 : f32 to vector<8x16xf32>
    %176 = arith.mulf %35, %175 : vector<8x16xf32>
    %177 = arith.addf %173, %176 : vector<8x16xf32>
    %c70 = arith.constant 70 : index
    %178 = memref.load %arg3[%c70] : memref<128xf32, #tpu.memory_space<smem>>
    %179 = vector.broadcast %178 : f32 to vector<8x16xf32>
    %180 = arith.mulf %37, %179 : vector<8x16xf32>
    %181 = arith.addf %177, %180 : vector<8x16xf32>
    %c102 = arith.constant 102 : index
    %182 = memref.load %arg3[%c102] : memref<128xf32, #tpu.memory_space<smem>>
    %183 = vector.broadcast %182 : f32 to vector<8x16xf32>
    %184 = arith.mulf %39, %183 : vector<8x16xf32>
    %185 = arith.addf %181, %184 : vector<8x16xf32>
    %186 = vector.broadcast %129 : f32 to vector<8x16xf32>
    %187 = arith.addf %185, %186 : vector<8x16xf32>
    %cst_40 = arith.constant 0.000000e+00 : f32
    %188 = vector.broadcast %cst_40 : f32 to vector<8x16xf32>
    %189 = arith.maximumf %187, %188 : vector<8x16xf32>
    %cst_41 = arith.constant dense<0.000000e+00> : vector<8x32xf32>
    %190 = tpu.matmul %189, %8, %cst_41 {dimension_numbers = #tpu.dot_dimension_numbers<[1], [0], [0], [1], [0, 0, 1, 1], [], []>} : vector<8x16xf32>, vector<16x32xf32>, vector<8x32xf32> -> vector<8x32xf32>
    %c7 = arith.constant 7 : index
    %191 = memref.load %arg3[%c7] : memref<128xf32, #tpu.memory_space<smem>>
    %192 = vector.broadcast %191 : f32 to vector<8x16xf32>
    %193 = arith.mulf %33, %192 : vector<8x16xf32>
    %c39 = arith.constant 39 : index
    %194 = memref.load %arg3[%c39] : memref<128xf32, #tpu.memory_space<smem>>
    %195 = vector.broadcast %194 : f32 to vector<8x16xf32>
    %196 = arith.mulf %35, %195 : vector<8x16xf32>
    %197 = arith.addf %193, %196 : vector<8x16xf32>
    %c71 = arith.constant 71 : index
    %198 = memref.load %arg3[%c71] : memref<128xf32, #tpu.memory_space<smem>>
    %199 = vector.broadcast %198 : f32 to vector<8x16xf32>
    %200 = arith.mulf %37, %199 : vector<8x16xf32>
    %201 = arith.addf %197, %200 : vector<8x16xf32>
    %c103 = arith.constant 103 : index
    %202 = memref.load %arg3[%c103] : memref<128xf32, #tpu.memory_space<smem>>
    %203 = vector.broadcast %202 : f32 to vector<8x16xf32>
    %204 = arith.mulf %39, %203 : vector<8x16xf32>
    %205 = arith.addf %201, %204 : vector<8x16xf32>
    %206 = vector.broadcast %129 : f32 to vector<8x16xf32>
    %207 = arith.addf %205, %206 : vector<8x16xf32>
    %cst_42 = arith.constant 0.000000e+00 : f32
    %208 = vector.broadcast %cst_42 : f32 to vector<8x16xf32>
    %209 = arith.maximumf %207, %208 : vector<8x16xf32>
    %cst_43 = arith.constant dense<0.000000e+00> : vector<8x32xf32>
    %210 = tpu.matmul %209, %15, %cst_43 {dimension_numbers = #tpu.dot_dimension_numbers<[1], [0], [0], [1], [0, 0, 1, 1], [], []>} : vector<8x16xf32>, vector<16x32xf32>, vector<8x32xf32> -> vector<8x32xf32>
    %211 = arith.addf %190, %210 : vector<8x32xf32>
    %cst_44 = arith.constant dense<0.000000e+00> : vector<16x32xf32>
    %212 = tpu.matmul %24, %170, %cst_44 {dimension_numbers = #tpu.dot_dimension_numbers<[1], [0], [0], [1], [0, 0, 1, 1], [], []>} : vector<16x8xf32>, vector<8x32xf32>, vector<16x32xf32> -> vector<16x32xf32>
    %cst_45 = arith.constant dense<0.000000e+00> : vector<16x32xf32>
    %213 = tpu.matmul %31, %211, %cst_45 {dimension_numbers = #tpu.dot_dimension_numbers<[1], [0], [0], [1], [0, 0, 1, 1], [], []>} : vector<16x8xf32>, vector<8x32xf32>, vector<16x32xf32> -> vector<16x32xf32>
    %214 = arith.addf %212, %213 : vector<16x32xf32>
    %c0_46 = arith.constant 0 : index
    %c1_47 = arith.constant 1 : index
    %c0_48 = arith.constant 0 : index
    %c0_49 = arith.constant 0 : index
    %215 = vector.load %arg5[%c0_46, %c1_47, %c0_48, %c0_49] : memref<1x8x16x32xf32, #tpu.memory_space<vmem>>, vector<1x1x16x32xf32>
    %216 = vector.shape_cast %215 : vector<1x1x16x32xf32> to vector<16x32xf32>
    %217 = vector.shape_cast %214 : vector<16x32xf32> to vector<1x1x16x32xf32>
    tpu.vector_store %arg5[%c0_46, %c1_47, %c0_48, %c0_49], %217 {strides = array<i32>} : memref<1x8x16x32xf32, #tpu.memory_space<vmem>>, vector<1x1x16x32xf32>,
    %c2_50 = arith.constant 2 : index
    %218 = memref.load %arg4[%c2_50] : memref<8xf32, #tpu.memory_space<smem>>
    %c8 = arith.constant 8 : index
    %219 = memref.load %arg3[%c8] : memref<128xf32, #tpu.memory_space<smem>>
    %220 = vector.broadcast %219 : f32 to vector<8x16xf32>
    %221 = arith.mulf %33, %220 : vector<8x16xf32>
    %c40 = arith.constant 40 : index
    %222 = memref.load %arg3[%c40] : memref<128xf32, #tpu.memory_space<smem>>
    %223 = vector.broadcast %222 : f32 to vector<8x16xf32>
    %224 = arith.mulf %35, %223 : vector<8x16xf32>
    %225 = arith.addf %221, %224 : vector<8x16xf32>
    %c72 = arith.constant 72 : index
    %226 = memref.load %arg3[%c72] : memref<128xf32, #tpu.memory_space<smem>>
    %227 = vector.broadcast %226 : f32 to vector<8x16xf32>
    %228 = arith.mulf %37, %227 : vector<8x16xf32>
    %229 = arith.addf %225, %228 : vector<8x16xf32>
    %c104 = arith.constant 104 : index
    %230 = memref.load %arg3[%c104] : memref<128xf32, #tpu.memory_space<smem>>
    %231 = vector.broadcast %230 : f32 to vector<8x16xf32>
    %232 = arith.mulf %39, %231 : vector<8x16xf32>
    %233 = arith.addf %229, %232 : vector<8x16xf32>
    %234 = vector.broadcast %218 : f32 to vector<8x16xf32>
    %235 = arith.addf %233, %234 : vector<8x16xf32>
    %cst_51 = arith.constant 0.000000e+00 : f32
    %236 = vector.broadcast %cst_51 : f32 to vector<8x16xf32>
    %237 = arith.maximumf %235, %236 : vector<8x16xf32>
    %cst_52 = arith.constant dense<0.000000e+00> : vector<8x32xf32>
    %238 = tpu.matmul %237, %8, %cst_52 {dimension_numbers = #tpu.dot_dimension_numbers<[1], [0], [0], [1], [0, 0, 1, 1], [], []>} : vector<8x16xf32>, vector<16x32xf32>, vector<8x32xf32> -> vector<8x32xf32>
    %c9 = arith.constant 9 : index
    %239 = memref.load %arg3[%c9] : memref<128xf32, #tpu.memory_space<smem>>
    %240 = vector.broadcast %239 : f32 to vector<8x16xf32>
    %241 = arith.mulf %33, %240 : vector<8x16xf32>
    %c41 = arith.constant 41 : index
    %242 = memref.load %arg3[%c41] : memref<128xf32, #tpu.memory_space<smem>>
    %243 = vector.broadcast %242 : f32 to vector<8x16xf32>
    %244 = arith.mulf %35, %243 : vector<8x16xf32>
    %245 = arith.addf %241, %244 : vector<8x16xf32>
    %c73 = arith.constant 73 : index
    %246 = memref.load %arg3[%c73] : memref<128xf32, #tpu.memory_space<smem>>
    %247 = vector.broadcast %246 : f32 to vector<8x16xf32>
    %248 = arith.mulf %37, %247 : vector<8x16xf32>
    %249 = arith.addf %245, %248 : vector<8x16xf32>
    %c105 = arith.constant 105 : index
    %250 = memref.load %arg3[%c105] : memref<128xf32, #tpu.memory_space<smem>>
    %251 = vector.broadcast %250 : f32 to vector<8x16xf32>
    %252 = arith.mulf %39, %251 : vector<8x16xf32>
    %253 = arith.addf %249, %252 : vector<8x16xf32>
    %254 = vector.broadcast %218 : f32 to vector<8x16xf32>
    %255 = arith.addf %253, %254 : vector<8x16xf32>
    %cst_53 = arith.constant 0.000000e+00 : f32
    %256 = vector.broadcast %cst_53 : f32 to vector<8x16xf32>
    %257 = arith.maximumf %255, %256 : vector<8x16xf32>
    %cst_54 = arith.constant dense<0.000000e+00> : vector<8x32xf32>
    %258 = tpu.matmul %257, %15, %cst_54 {dimension_numbers = #tpu.dot_dimension_numbers<[1], [0], [0], [1], [0, 0, 1, 1], [], []>} : vector<8x16xf32>, vector<16x32xf32>, vector<8x32xf32> -> vector<8x32xf32>
    %259 = arith.addf %238, %258 : vector<8x32xf32>
    %c10 = arith.constant 10 : index
    %260 = memref.load %arg3[%c10] : memref<128xf32, #tpu.memory_space<smem>>
    %261 = vector.broadcast %260 : f32 to vector<8x16xf32>
    %262 = arith.mulf %33, %261 : vector<8x16xf32>
    %c42 = arith.constant 42 : index
    %263 = memref.load %arg3[%c42] : memref<128xf32, #tpu.memory_space<smem>>
    %264 = vector.broadcast %263 : f32 to vector<8x16xf32>
    %265 = arith.mulf %35, %264 : vector<8x16xf32>
    %266 = arith.addf %262, %265 : vector<8x16xf32>
    %c74 = arith.constant 74 : index
    %267 = memref.load %arg3[%c74] : memref<128xf32, #tpu.memory_space<smem>>
    %268 = vector.broadcast %267 : f32 to vector<8x16xf32>
    %269 = arith.mulf %37, %268 : vector<8x16xf32>
    %270 = arith.addf %266, %269 : vector<8x16xf32>
    %c106 = arith.constant 106 : index
    %271 = memref.load %arg3[%c106] : memref<128xf32, #tpu.memory_space<smem>>
    %272 = vector.broadcast %271 : f32 to vector<8x16xf32>
    %273 = arith.mulf %39, %272 : vector<8x16xf32>
    %274 = arith.addf %270, %273 : vector<8x16xf32>
    %275 = vector.broadcast %218 : f32 to vector<8x16xf32>
    %276 = arith.addf %274, %275 : vector<8x16xf32>
    %cst_55 = arith.constant 0.000000e+00 : f32
    %277 = vector.broadcast %cst_55 : f32 to vector<8x16xf32>
    %278 = arith.maximumf %276, %277 : vector<8x16xf32>
    %cst_56 = arith.constant dense<0.000000e+00> : vector<8x32xf32>
    %279 = tpu.matmul %278, %8, %cst_56 {dimension_numbers = #tpu.dot_dimension_numbers<[1], [0], [0], [1], [0, 0, 1, 1], [], []>} : vector<8x16xf32>, vector<16x32xf32>, vector<8x32xf32> -> vector<8x32xf32>
    %c11 = arith.constant 11 : index
    %280 = memref.load %arg3[%c11] : memref<128xf32, #tpu.memory_space<smem>>
    %281 = vector.broadcast %280 : f32 to vector<8x16xf32>
    %282 = arith.mulf %33, %281 : vector<8x16xf32>
    %c43 = arith.constant 43 : index
    %283 = memref.load %arg3[%c43] : memref<128xf32, #tpu.memory_space<smem>>
    %284 = vector.broadcast %283 : f32 to vector<8x16xf32>
    %285 = arith.mulf %35, %284 : vector<8x16xf32>
    %286 = arith.addf %282, %285 : vector<8x16xf32>
    %c75 = arith.constant 75 : index
    %287 = memref.load %arg3[%c75] : memref<128xf32, #tpu.memory_space<smem>>
    %288 = vector.broadcast %287 : f32 to vector<8x16xf32>
    %289 = arith.mulf %37, %288 : vector<8x16xf32>
    %290 = arith.addf %286, %289 : vector<8x16xf32>
    %c107 = arith.constant 107 : index
    %291 = memref.load %arg3[%c107] : memref<128xf32, #tpu.memory_space<smem>>
    %292 = vector.broadcast %291 : f32 to vector<8x16xf32>
    %293 = arith.mulf %39, %292 : vector<8x16xf32>
    %294 = arith.addf %290, %293 : vector<8x16xf32>
    %295 = vector.broadcast %218 : f32 to vector<8x16xf32>
    %296 = arith.addf %294, %295 : vector<8x16xf32>
    %cst_57 = arith.constant 0.000000e+00 : f32
    %297 = vector.broadcast %cst_57 : f32 to vector<8x16xf32>
    %298 = arith.maximumf %296, %297 : vector<8x16xf32>
    %cst_58 = arith.constant dense<0.000000e+00> : vector<8x32xf32>
    %299 = tpu.matmul %298, %15, %cst_58 {dimension_numbers = #tpu.dot_dimension_numbers<[1], [0], [0], [1], [0, 0, 1, 1], [], []>} : vector<8x16xf32>, vector<16x32xf32>, vector<8x32xf32> -> vector<8x32xf32>
    %300 = arith.addf %279, %299 : vector<8x32xf32>
    %cst_59 = arith.constant dense<0.000000e+00> : vector<16x32xf32>
    %301 = tpu.matmul %24, %259, %cst_59 {dimension_numbers = #tpu.dot_dimension_numbers<[1], [0], [0], [1], [0, 0, 1, 1], [], []>} : vector<16x8xf32>, vector<8x32xf32>, vector<16x32xf32> -> vector<16x32xf32>
    %cst_60 = arith.constant dense<0.000000e+00> : vector<16x32xf32>
    %302 = tpu.matmul %31, %300, %cst_60 {dimension_numbers = #tpu.dot_dimension_numbers<[1], [0], [0], [1], [0, 0, 1, 1], [], []>} : vector<16x8xf32>, vector<8x32xf32>, vector<16x32xf32> -> vector<16x32xf32>
    %303 = arith.addf %301, %302 : vector<16x32xf32>
    %c0_61 = arith.constant 0 : index
    %c2_62 = arith.constant 2 : index
    %c0_63 = arith.constant 0 : index
    %c0_64 = arith.constant 0 : index
    %304 = vector.load %arg5[%c0_61, %c2_62, %c0_63, %c0_64] : memref<1x8x16x32xf32, #tpu.memory_space<vmem>>, vector<1x1x16x32xf32>
    %305 = vector.shape_cast %304 : vector<1x1x16x32xf32> to vector<16x32xf32>
    %306 = vector.shape_cast %303 : vector<16x32xf32> to vector<1x1x16x32xf32>
    tpu.vector_store %arg5[%c0_61, %c2_62, %c0_63, %c0_64], %306 {strides = array<i32>} : memref<1x8x16x32xf32, #tpu.memory_space<vmem>>, vector<1x1x16x32xf32>,
    %c3_65 = arith.constant 3 : index
    %307 = memref.load %arg4[%c3_65] : memref<8xf32, #tpu.memory_space<smem>>
    %c12 = arith.constant 12 : index
    %308 = memref.load %arg3[%c12] : memref<128xf32, #tpu.memory_space<smem>>
    %309 = vector.broadcast %308 : f32 to vector<8x16xf32>
    %310 = arith.mulf %33, %309 : vector<8x16xf32>
    %c44 = arith.constant 44 : index
    %311 = memref.load %arg3[%c44] : memref<128xf32, #tpu.memory_space<smem>>
    %312 = vector.broadcast %311 : f32 to vector<8x16xf32>
    %313 = arith.mulf %35, %312 : vector<8x16xf32>
    %314 = arith.addf %310, %313 : vector<8x16xf32>
    %c76 = arith.constant 76 : index
    %315 = memref.load %arg3[%c76] : memref<128xf32, #tpu.memory_space<smem>>
    %316 = vector.broadcast %315 : f32 to vector<8x16xf32>
    %317 = arith.mulf %37, %316 : vector<8x16xf32>
    %318 = arith.addf %314, %317 : vector<8x16xf32>
    %c108 = arith.constant 108 : index
    %319 = memref.load %arg3[%c108] : memref<128xf32, #tpu.memory_space<smem>>
    %320 = vector.broadcast %319 : f32 to vector<8x16xf32>
    %321 = arith.mulf %39, %320 : vector<8x16xf32>
    %322 = arith.addf %318, %321 : vector<8x16xf32>
    %323 = vector.broadcast %307 : f32 to vector<8x16xf32>
    %324 = arith.addf %322, %323 : vector<8x16xf32>
    %cst_66 = arith.constant 0.000000e+00 : f32
    %325 = vector.broadcast %cst_66 : f32 to vector<8x16xf32>
    %326 = arith.maximumf %324, %325 : vector<8x16xf32>
    %cst_67 = arith.constant dense<0.000000e+00> : vector<8x32xf32>
    %327 = tpu.matmul %326, %8, %cst_67 {dimension_numbers = #tpu.dot_dimension_numbers<[1], [0], [0], [1], [0, 0, 1, 1], [], []>} : vector<8x16xf32>, vector<16x32xf32>, vector<8x32xf32> -> vector<8x32xf32>
    %c13 = arith.constant 13 : index
    %328 = memref.load %arg3[%c13] : memref<128xf32, #tpu.memory_space<smem>>
    %329 = vector.broadcast %328 : f32 to vector<8x16xf32>
    %330 = arith.mulf %33, %329 : vector<8x16xf32>
    %c45 = arith.constant 45 : index
    %331 = memref.load %arg3[%c45] : memref<128xf32, #tpu.memory_space<smem>>
    %332 = vector.broadcast %331 : f32 to vector<8x16xf32>
    %333 = arith.mulf %35, %332 : vector<8x16xf32>
    %334 = arith.addf %330, %333 : vector<8x16xf32>
    %c77 = arith.constant 77 : index
    %335 = memref.load %arg3[%c77] : memref<128xf32, #tpu.memory_space<smem>>
    %336 = vector.broadcast %335 : f32 to vector<8x16xf32>
    %337 = arith.mulf %37, %336 : vector<8x16xf32>
    %338 = arith.addf %334, %337 : vector<8x16xf32>
    %c109 = arith.constant 109 : index
    %339 = memref.load %arg3[%c109] : memref<128xf32, #tpu.memory_space<smem>>
    %340 = vector.broadcast %339 : f32 to vector<8x16xf32>
    %341 = arith.mulf %39, %340 : vector<8x16xf32>
    %342 = arith.addf %338, %341 : vector<8x16xf32>
    %343 = vector.broadcast %307 : f32 to vector<8x16xf32>
    %344 = arith.addf %342, %343 : vector<8x16xf32>
    %cst_68 = arith.constant 0.000000e+00 : f32
    %345 = vector.broadcast %cst_68 : f32 to vector<8x16xf32>
    %346 = arith.maximumf %344, %345 : vector<8x16xf32>
    %cst_69 = arith.constant dense<0.000000e+00> : vector<8x32xf32>
    %347 = tpu.matmul %346, %15, %cst_69 {dimension_numbers = #tpu.dot_dimension_numbers<[1], [0], [0], [1], [0, 0, 1, 1], [], []>} : vector<8x16xf32>, vector<16x32xf32>, vector<8x32xf32> -> vector<8x32xf32>
    %348 = arith.addf %327, %347 : vector<8x32xf32>
    %c14 = arith.constant 14 : index
    %349 = memref.load %arg3[%c14] : memref<128xf32, #tpu.memory_space<smem>>
    %350 = vector.broadcast %349 : f32 to vector<8x16xf32>
    %351 = arith.mulf %33, %350 : vector<8x16xf32>
    %c46 = arith.constant 46 : index
    %352 = memref.load %arg3[%c46] : memref<128xf32, #tpu.memory_space<smem>>
    %353 = vector.broadcast %352 : f32 to vector<8x16xf32>
    %354 = arith.mulf %35, %353 : vector<8x16xf32>
    %355 = arith.addf %351, %354 : vector<8x16xf32>
    %c78 = arith.constant 78 : index
    %356 = memref.load %arg3[%c78] : memref<128xf32, #tpu.memory_space<smem>>
    %357 = vector.broadcast %356 : f32 to vector<8x16xf32>
    %358 = arith.mulf %37, %357 : vector<8x16xf32>
    %359 = arith.addf %355, %358 : vector<8x16xf32>
    %c110 = arith.constant 110 : index
    %360 = memref.load %arg3[%c110] : memref<128xf32, #tpu.memory_space<smem>>
    %361 = vector.broadcast %360 : f32 to vector<8x16xf32>
    %362 = arith.mulf %39, %361 : vector<8x16xf32>
    %363 = arith.addf %359, %362 : vector<8x16xf32>
    %364 = vector.broadcast %307 : f32 to vector<8x16xf32>
    %365 = arith.addf %363, %364 : vector<8x16xf32>
    %cst_70 = arith.constant 0.000000e+00 : f32
    %366 = vector.broadcast %cst_70 : f32 to vector<8x16xf32>
    %367 = arith.maximumf %365, %366 : vector<8x16xf32>
    %cst_71 = arith.constant dense<0.000000e+00> : vector<8x32xf32>
    %368 = tpu.matmul %367, %8, %cst_71 {dimension_numbers = #tpu.dot_dimension_numbers<[1], [0], [0], [1], [0, 0, 1, 1], [], []>} : vector<8x16xf32>, vector<16x32xf32>, vector<8x32xf32> -> vector<8x32xf32>
    %c15 = arith.constant 15 : index
    %369 = memref.load %arg3[%c15] : memref<128xf32, #tpu.memory_space<smem>>
    %370 = vector.broadcast %369 : f32 to vector<8x16xf32>
    %371 = arith.mulf %33, %370 : vector<8x16xf32>
    %c47 = arith.constant 47 : index
    %372 = memref.load %arg3[%c47] : memref<128xf32, #tpu.memory_space<smem>>
    %373 = vector.broadcast %372 : f32 to vector<8x16xf32>
    %374 = arith.mulf %35, %373 : vector<8x16xf32>
    %375 = arith.addf %371, %374 : vector<8x16xf32>
    %c79 = arith.constant 79 : index
    %376 = memref.load %arg3[%c79] : memref<128xf32, #tpu.memory_space<smem>>
    %377 = vector.broadcast %376 : f32 to vector<8x16xf32>
    %378 = arith.mulf %37, %377 : vector<8x16xf32>
    %379 = arith.addf %375, %378 : vector<8x16xf32>
    %c111 = arith.constant 111 : index
    %380 = memref.load %arg3[%c111] : memref<128xf32, #tpu.memory_space<smem>>
    %381 = vector.broadcast %380 : f32 to vector<8x16xf32>
    %382 = arith.mulf %39, %381 : vector<8x16xf32>
    %383 = arith.addf %379, %382 : vector<8x16xf32>
    %384 = vector.broadcast %307 : f32 to vector<8x16xf32>
    %385 = arith.addf %383, %384 : vector<8x16xf32>
    %cst_72 = arith.constant 0.000000e+00 : f32
    %386 = vector.broadcast %cst_72 : f32 to vector<8x16xf32>
    %387 = arith.maximumf %385, %386 : vector<8x16xf32>
    %cst_73 = arith.constant dense<0.000000e+00> : vector<8x32xf32>
    %388 = tpu.matmul %387, %15, %cst_73 {dimension_numbers = #tpu.dot_dimension_numbers<[1], [0], [0], [1], [0, 0, 1, 1], [], []>} : vector<8x16xf32>, vector<16x32xf32>, vector<8x32xf32> -> vector<8x32xf32>
    %389 = arith.addf %368, %388 : vector<8x32xf32>
    %cst_74 = arith.constant dense<0.000000e+00> : vector<16x32xf32>
    %390 = tpu.matmul %24, %348, %cst_74 {dimension_numbers = #tpu.dot_dimension_numbers<[1], [0], [0], [1], [0, 0, 1, 1], [], []>} : vector<16x8xf32>, vector<8x32xf32>, vector<16x32xf32> -> vector<16x32xf32>
    %cst_75 = arith.constant dense<0.000000e+00> : vector<16x32xf32>
    %391 = tpu.matmul %31, %389, %cst_75 {dimension_numbers = #tpu.dot_dimension_numbers<[1], [0], [0], [1], [0, 0, 1, 1], [], []>} : vector<16x8xf32>, vector<8x32xf32>, vector<16x32xf32> -> vector<16x32xf32>
    %392 = arith.addf %390, %391 : vector<16x32xf32>
    %c0_76 = arith.constant 0 : index
    %c3_77 = arith.constant 3 : index
    %c0_78 = arith.constant 0 : index
    %c0_79 = arith.constant 0 : index
    %393 = vector.load %arg5[%c0_76, %c3_77, %c0_78, %c0_79] : memref<1x8x16x32xf32, #tpu.memory_space<vmem>>, vector<1x1x16x32xf32>
    %394 = vector.shape_cast %393 : vector<1x1x16x32xf32> to vector<16x32xf32>
    %395 = vector.shape_cast %392 : vector<16x32xf32> to vector<1x1x16x32xf32>
    tpu.vector_store %arg5[%c0_76, %c3_77, %c0_78, %c0_79], %395 {strides = array<i32>} : memref<1x8x16x32xf32, #tpu.memory_space<vmem>>, vector<1x1x16x32xf32>,
    %c4_80 = arith.constant 4 : index
    %396 = memref.load %arg4[%c4_80] : memref<8xf32, #tpu.memory_space<smem>>
    %c16 = arith.constant 16 : index
    %397 = memref.load %arg3[%c16] : memref<128xf32, #tpu.memory_space<smem>>
    %398 = vector.broadcast %397 : f32 to vector<8x16xf32>
    %399 = arith.mulf %33, %398 : vector<8x16xf32>
    %c48 = arith.constant 48 : index
    %400 = memref.load %arg3[%c48] : memref<128xf32, #tpu.memory_space<smem>>
    %401 = vector.broadcast %400 : f32 to vector<8x16xf32>
    %402 = arith.mulf %35, %401 : vector<8x16xf32>
    %403 = arith.addf %399, %402 : vector<8x16xf32>
    %c80 = arith.constant 80 : index
    %404 = memref.load %arg3[%c80] : memref<128xf32, #tpu.memory_space<smem>>
    %405 = vector.broadcast %404 : f32 to vector<8x16xf32>
    %406 = arith.mulf %37, %405 : vector<8x16xf32>
    %407 = arith.addf %403, %406 : vector<8x16xf32>
    %c112 = arith.constant 112 : index
    %408 = memref.load %arg3[%c112] : memref<128xf32, #tpu.memory_space<smem>>
    %409 = vector.broadcast %408 : f32 to vector<8x16xf32>
    %410 = arith.mulf %39, %409 : vector<8x16xf32>
    %411 = arith.addf %407, %410 : vector<8x16xf32>
    %412 = vector.broadcast %396 : f32 to vector<8x16xf32>
    %413 = arith.addf %411, %412 : vector<8x16xf32>
    %cst_81 = arith.constant 0.000000e+00 : f32
    %414 = vector.broadcast %cst_81 : f32 to vector<8x16xf32>
    %415 = arith.maximumf %413, %414 : vector<8x16xf32>
    %cst_82 = arith.constant dense<0.000000e+00> : vector<8x32xf32>
    %416 = tpu.matmul %415, %8, %cst_82 {dimension_numbers = #tpu.dot_dimension_numbers<[1], [0], [0], [1], [0, 0, 1, 1], [], []>} : vector<8x16xf32>, vector<16x32xf32>, vector<8x32xf32> -> vector<8x32xf32>
    %c17 = arith.constant 17 : index
    %417 = memref.load %arg3[%c17] : memref<128xf32, #tpu.memory_space<smem>>
    %418 = vector.broadcast %417 : f32 to vector<8x16xf32>
    %419 = arith.mulf %33, %418 : vector<8x16xf32>
    %c49 = arith.constant 49 : index
    %420 = memref.load %arg3[%c49] : memref<128xf32, #tpu.memory_space<smem>>
    %421 = vector.broadcast %420 : f32 to vector<8x16xf32>
    %422 = arith.mulf %35, %421 : vector<8x16xf32>
    %423 = arith.addf %419, %422 : vector<8x16xf32>
    %c81 = arith.constant 81 : index
    %424 = memref.load %arg3[%c81] : memref<128xf32, #tpu.memory_space<smem>>
    %425 = vector.broadcast %424 : f32 to vector<8x16xf32>
    %426 = arith.mulf %37, %425 : vector<8x16xf32>
    %427 = arith.addf %423, %426 : vector<8x16xf32>
    %c113 = arith.constant 113 : index
    %428 = memref.load %arg3[%c113] : memref<128xf32, #tpu.memory_space<smem>>
    %429 = vector.broadcast %428 : f32 to vector<8x16xf32>
    %430 = arith.mulf %39, %429 : vector<8x16xf32>
    %431 = arith.addf %427, %430 : vector<8x16xf32>
    %432 = vector.broadcast %396 : f32 to vector<8x16xf32>
    %433 = arith.addf %431, %432 : vector<8x16xf32>
    %cst_83 = arith.constant 0.000000e+00 : f32
    %434 = vector.broadcast %cst_83 : f32 to vector<8x16xf32>
    %435 = arith.maximumf %433, %434 : vector<8x16xf32>
    %cst_84 = arith.constant dense<0.000000e+00> : vector<8x32xf32>
    %436 = tpu.matmul %435, %15, %cst_84 {dimension_numbers = #tpu.dot_dimension_numbers<[1], [0], [0], [1], [0, 0, 1, 1], [], []>} : vector<8x16xf32>, vector<16x32xf32>, vector<8x32xf32> -> vector<8x32xf32>
    %437 = arith.addf %416, %436 : vector<8x32xf32>
    %c18 = arith.constant 18 : index
    %438 = memref.load %arg3[%c18] : memref<128xf32, #tpu.memory_space<smem>>
    %439 = vector.broadcast %438 : f32 to vector<8x16xf32>
    %440 = arith.mulf %33, %439 : vector<8x16xf32>
    %c50 = arith.constant 50 : index
    %441 = memref.load %arg3[%c50] : memref<128xf32, #tpu.memory_space<smem>>
    %442 = vector.broadcast %441 : f32 to vector<8x16xf32>
    %443 = arith.mulf %35, %442 : vector<8x16xf32>
    %444 = arith.addf %440, %443 : vector<8x16xf32>
    %c82 = arith.constant 82 : index
    %445 = memref.load %arg3[%c82] : memref<128xf32, #tpu.memory_space<smem>>
    %446 = vector.broadcast %445 : f32 to vector<8x16xf32>
    %447 = arith.mulf %37, %446 : vector<8x16xf32>
    %448 = arith.addf %444, %447 : vector<8x16xf32>
    %c114 = arith.constant 114 : index
    %449 = memref.load %arg3[%c114] : memref<128xf32, #tpu.memory_space<smem>>
    %450 = vector.broadcast %449 : f32 to vector<8x16xf32>
    %451 = arith.mulf %39, %450 : vector<8x16xf32>
    %452 = arith.addf %448, %451 : vector<8x16xf32>
    %453 = vector.broadcast %396 : f32 to vector<8x16xf32>
    %454 = arith.addf %452, %453 : vector<8x16xf32>
    %cst_85 = arith.constant 0.000000e+00 : f32
    %455 = vector.broadcast %cst_85 : f32 to vector<8x16xf32>
    %456 = arith.maximumf %454, %455 : vector<8x16xf32>
    %cst_86 = arith.constant dense<0.000000e+00> : vector<8x32xf32>
    %457 = tpu.matmul %456, %8, %cst_86 {dimension_numbers = #tpu.dot_dimension_numbers<[1], [0], [0], [1], [0, 0, 1, 1], [], []>} : vector<8x16xf32>, vector<16x32xf32>, vector<8x32xf32> -> vector<8x32xf32>
    %c19 = arith.constant 19 : index
    %458 = memref.load %arg3[%c19] : memref<128xf32, #tpu.memory_space<smem>>
    %459 = vector.broadcast %458 : f32 to vector<8x16xf32>
    %460 = arith.mulf %33, %459 : vector<8x16xf32>
    %c51 = arith.constant 51 : index
    %461 = memref.load %arg3[%c51] : memref<128xf32, #tpu.memory_space<smem>>
    %462 = vector.broadcast %461 : f32 to vector<8x16xf32>
    %463 = arith.mulf %35, %462 : vector<8x16xf32>
    %464 = arith.addf %460, %463 : vector<8x16xf32>
    %c83 = arith.constant 83 : index
    %465 = memref.load %arg3[%c83] : memref<128xf32, #tpu.memory_space<smem>>
    %466 = vector.broadcast %465 : f32 to vector<8x16xf32>
    %467 = arith.mulf %37, %466 : vector<8x16xf32>
    %468 = arith.addf %464, %467 : vector<8x16xf32>
    %c115 = arith.constant 115 : index
    %469 = memref.load %arg3[%c115] : memref<128xf32, #tpu.memory_space<smem>>
    %470 = vector.broadcast %469 : f32 to vector<8x16xf32>
    %471 = arith.mulf %39, %470 : vector<8x16xf32>
    %472 = arith.addf %468, %471 : vector<8x16xf32>
    %473 = vector.broadcast %396 : f32 to vector<8x16xf32>
    %474 = arith.addf %472, %473 : vector<8x16xf32>
    %cst_87 = arith.constant 0.000000e+00 : f32
    %475 = vector.broadcast %cst_87 : f32 to vector<8x16xf32>
    %476 = arith.maximumf %474, %475 : vector<8x16xf32>
    %cst_88 = arith.constant dense<0.000000e+00> : vector<8x32xf32>
    %477 = tpu.matmul %476, %15, %cst_88 {dimension_numbers = #tpu.dot_dimension_numbers<[1], [0], [0], [1], [0, 0, 1, 1], [], []>} : vector<8x16xf32>, vector<16x32xf32>, vector<8x32xf32> -> vector<8x32xf32>
    %478 = arith.addf %457, %477 : vector<8x32xf32>
    %cst_89 = arith.constant dense<0.000000e+00> : vector<16x32xf32>
    %479 = tpu.matmul %24, %437, %cst_89 {dimension_numbers = #tpu.dot_dimension_numbers<[1], [0], [0], [1], [0, 0, 1, 1], [], []>} : vector<16x8xf32>, vector<8x32xf32>, vector<16x32xf32> -> vector<16x32xf32>
    %cst_90 = arith.constant dense<0.000000e+00> : vector<16x32xf32>
    %480 = tpu.matmul %31, %478, %cst_90 {dimension_numbers = #tpu.dot_dimension_numbers<[1], [0], [0], [1], [0, 0, 1, 1], [], []>} : vector<16x8xf32>, vector<8x32xf32>, vector<16x32xf32> -> vector<16x32xf32>
    %481 = arith.addf %479, %480 : vector<16x32xf32>
    %c0_91 = arith.constant 0 : index
    %c4_92 = arith.constant 4 : index
    %c0_93 = arith.constant 0 : index
    %c0_94 = arith.constant 0 : index
    %482 = vector.load %arg5[%c0_91, %c4_92, %c0_93, %c0_94] : memref<1x8x16x32xf32, #tpu.memory_space<vmem>>, vector<1x1x16x32xf32>
    %483 = vector.shape_cast %482 : vector<1x1x16x32xf32> to vector<16x32xf32>
    %484 = vector.shape_cast %481 : vector<16x32xf32> to vector<1x1x16x32xf32>
    tpu.vector_store %arg5[%c0_91, %c4_92, %c0_93, %c0_94], %484 {strides = array<i32>} : memref<1x8x16x32xf32, #tpu.memory_space<vmem>>, vector<1x1x16x32xf32>,
    %c5_95 = arith.constant 5 : index
    %485 = memref.load %arg4[%c5_95] : memref<8xf32, #tpu.memory_space<smem>>
    %c20 = arith.constant 20 : index
    %486 = memref.load %arg3[%c20] : memref<128xf32, #tpu.memory_space<smem>>
    %487 = vector.broadcast %486 : f32 to vector<8x16xf32>
    %488 = arith.mulf %33, %487 : vector<8x16xf32>
    %c52 = arith.constant 52 : index
    %489 = memref.load %arg3[%c52] : memref<128xf32, #tpu.memory_space<smem>>
    %490 = vector.broadcast %489 : f32 to vector<8x16xf32>
    %491 = arith.mulf %35, %490 : vector<8x16xf32>
    %492 = arith.addf %488, %491 : vector<8x16xf32>
    %c84 = arith.constant 84 : index
    %493 = memref.load %arg3[%c84] : memref<128xf32, #tpu.memory_space<smem>>
    %494 = vector.broadcast %493 : f32 to vector<8x16xf32>
    %495 = arith.mulf %37, %494 : vector<8x16xf32>
    %496 = arith.addf %492, %495 : vector<8x16xf32>
    %c116 = arith.constant 116 : index
    %497 = memref.load %arg3[%c116] : memref<128xf32, #tpu.memory_space<smem>>
    %498 = vector.broadcast %497 : f32 to vector<8x16xf32>
    %499 = arith.mulf %39, %498 : vector<8x16xf32>
    %500 = arith.addf %496, %499 : vector<8x16xf32>
    %501 = vector.broadcast %485 : f32 to vector<8x16xf32>
    %502 = arith.addf %500, %501 : vector<8x16xf32>
    %cst_96 = arith.constant 0.000000e+00 : f32
    %503 = vector.broadcast %cst_96 : f32 to vector<8x16xf32>
    %504 = arith.maximumf %502, %503 : vector<8x16xf32>
    %cst_97 = arith.constant dense<0.000000e+00> : vector<8x32xf32>
    %505 = tpu.matmul %504, %8, %cst_97 {dimension_numbers = #tpu.dot_dimension_numbers<[1], [0], [0], [1], [0, 0, 1, 1], [], []>} : vector<8x16xf32>, vector<16x32xf32>, vector<8x32xf32> -> vector<8x32xf32>
    %c21 = arith.constant 21 : index
    %506 = memref.load %arg3[%c21] : memref<128xf32, #tpu.memory_space<smem>>
    %507 = vector.broadcast %506 : f32 to vector<8x16xf32>
    %508 = arith.mulf %33, %507 : vector<8x16xf32>
    %c53 = arith.constant 53 : index
    %509 = memref.load %arg3[%c53] : memref<128xf32, #tpu.memory_space<smem>>
    %510 = vector.broadcast %509 : f32 to vector<8x16xf32>
    %511 = arith.mulf %35, %510 : vector<8x16xf32>
    %512 = arith.addf %508, %511 : vector<8x16xf32>
    %c85 = arith.constant 85 : index
    %513 = memref.load %arg3[%c85] : memref<128xf32, #tpu.memory_space<smem>>
    %514 = vector.broadcast %513 : f32 to vector<8x16xf32>
    %515 = arith.mulf %37, %514 : vector<8x16xf32>
    %516 = arith.addf %512, %515 : vector<8x16xf32>
    %c117 = arith.constant 117 : index
    %517 = memref.load %arg3[%c117] : memref<128xf32, #tpu.memory_space<smem>>
    %518 = vector.broadcast %517 : f32 to vector<8x16xf32>
    %519 = arith.mulf %39, %518 : vector<8x16xf32>
    %520 = arith.addf %516, %519 : vector<8x16xf32>
    %521 = vector.broadcast %485 : f32 to vector<8x16xf32>
    %522 = arith.addf %520, %521 : vector<8x16xf32>
    %cst_98 = arith.constant 0.000000e+00 : f32
    %523 = vector.broadcast %cst_98 : f32 to vector<8x16xf32>
    %524 = arith.maximumf %522, %523 : vector<8x16xf32>
    %cst_99 = arith.constant dense<0.000000e+00> : vector<8x32xf32>
    %525 = tpu.matmul %524, %15, %cst_99 {dimension_numbers = #tpu.dot_dimension_numbers<[1], [0], [0], [1], [0, 0, 1, 1], [], []>} : vector<8x16xf32>, vector<16x32xf32>, vector<8x32xf32> -> vector<8x32xf32>
    %526 = arith.addf %505, %525 : vector<8x32xf32>
    %c22 = arith.constant 22 : index
    %527 = memref.load %arg3[%c22] : memref<128xf32, #tpu.memory_space<smem>>
    %528 = vector.broadcast %527 : f32 to vector<8x16xf32>
    %529 = arith.mulf %33, %528 : vector<8x16xf32>
    %c54 = arith.constant 54 : index
    %530 = memref.load %arg3[%c54] : memref<128xf32, #tpu.memory_space<smem>>
    %531 = vector.broadcast %530 : f32 to vector<8x16xf32>
    %532 = arith.mulf %35, %531 : vector<8x16xf32>
    %533 = arith.addf %529, %532 : vector<8x16xf32>
    %c86 = arith.constant 86 : index
    %534 = memref.load %arg3[%c86] : memref<128xf32, #tpu.memory_space<smem>>
    %535 = vector.broadcast %534 : f32 to vector<8x16xf32>
    %536 = arith.mulf %37, %535 : vector<8x16xf32>
    %537 = arith.addf %533, %536 : vector<8x16xf32>
    %c118 = arith.constant 118 : index
    %538 = memref.load %arg3[%c118] : memref<128xf32, #tpu.memory_space<smem>>
    %539 = vector.broadcast %538 : f32 to vector<8x16xf32>
    %540 = arith.mulf %39, %539 : vector<8x16xf32>
    %541 = arith.addf %537, %540 : vector<8x16xf32>
    %542 = vector.broadcast %485 : f32 to vector<8x16xf32>
    %543 = arith.addf %541, %542 : vector<8x16xf32>
    %cst_100 = arith.constant 0.000000e+00 : f32
    %544 = vector.broadcast %cst_100 : f32 to vector<8x16xf32>
    %545 = arith.maximumf %543, %544 : vector<8x16xf32>
    %cst_101 = arith.constant dense<0.000000e+00> : vector<8x32xf32>
    %546 = tpu.matmul %545, %8, %cst_101 {dimension_numbers = #tpu.dot_dimension_numbers<[1], [0], [0], [1], [0, 0, 1, 1], [], []>} : vector<8x16xf32>, vector<16x32xf32>, vector<8x32xf32> -> vector<8x32xf32>
    %c23 = arith.constant 23 : index
    %547 = memref.load %arg3[%c23] : memref<128xf32, #tpu.memory_space<smem>>
    %548 = vector.broadcast %547 : f32 to vector<8x16xf32>
    %549 = arith.mulf %33, %548 : vector<8x16xf32>
    %c55 = arith.constant 55 : index
    %550 = memref.load %arg3[%c55] : memref<128xf32, #tpu.memory_space<smem>>
    %551 = vector.broadcast %550 : f32 to vector<8x16xf32>
    %552 = arith.mulf %35, %551 : vector<8x16xf32>
    %553 = arith.addf %549, %552 : vector<8x16xf32>
    %c87 = arith.constant 87 : index
    %554 = memref.load %arg3[%c87] : memref<128xf32, #tpu.memory_space<smem>>
    %555 = vector.broadcast %554 : f32 to vector<8x16xf32>
    %556 = arith.mulf %37, %555 : vector<8x16xf32>
    %557 = arith.addf %553, %556 : vector<8x16xf32>
    %c119 = arith.constant 119 : index
    %558 = memref.load %arg3[%c119] : memref<128xf32, #tpu.memory_space<smem>>
    %559 = vector.broadcast %558 : f32 to vector<8x16xf32>
    %560 = arith.mulf %39, %559 : vector<8x16xf32>
    %561 = arith.addf %557, %560 : vector<8x16xf32>
    %562 = vector.broadcast %485 : f32 to vector<8x16xf32>
    %563 = arith.addf %561, %562 : vector<8x16xf32>
    %cst_102 = arith.constant 0.000000e+00 : f32
    %564 = vector.broadcast %cst_102 : f32 to vector<8x16xf32>
    %565 = arith.maximumf %563, %564 : vector<8x16xf32>
    %cst_103 = arith.constant dense<0.000000e+00> : vector<8x32xf32>
    %566 = tpu.matmul %565, %15, %cst_103 {dimension_numbers = #tpu.dot_dimension_numbers<[1], [0], [0], [1], [0, 0, 1, 1], [], []>} : vector<8x16xf32>, vector<16x32xf32>, vector<8x32xf32> -> vector<8x32xf32>
    %567 = arith.addf %546, %566 : vector<8x32xf32>
    %cst_104 = arith.constant dense<0.000000e+00> : vector<16x32xf32>
    %568 = tpu.matmul %24, %526, %cst_104 {dimension_numbers = #tpu.dot_dimension_numbers<[1], [0], [0], [1], [0, 0, 1, 1], [], []>} : vector<16x8xf32>, vector<8x32xf32>, vector<16x32xf32> -> vector<16x32xf32>
    %cst_105 = arith.constant dense<0.000000e+00> : vector<16x32xf32>
    %569 = tpu.matmul %31, %567, %cst_105 {dimension_numbers = #tpu.dot_dimension_numbers<[1], [0], [0], [1], [0, 0, 1, 1], [], []>} : vector<16x8xf32>, vector<8x32xf32>, vector<16x32xf32> -> vector<16x32xf32>
    %570 = arith.addf %568, %569 : vector<16x32xf32>
    %c0_106 = arith.constant 0 : index
    %c5_107 = arith.constant 5 : index
    %c0_108 = arith.constant 0 : index
    %c0_109 = arith.constant 0 : index
    %571 = vector.load %arg5[%c0_106, %c5_107, %c0_108, %c0_109] : memref<1x8x16x32xf32, #tpu.memory_space<vmem>>, vector<1x1x16x32xf32>
    %572 = vector.shape_cast %571 : vector<1x1x16x32xf32> to vector<16x32xf32>
    %573 = vector.shape_cast %570 : vector<16x32xf32> to vector<1x1x16x32xf32>
    tpu.vector_store %arg5[%c0_106, %c5_107, %c0_108, %c0_109], %573 {strides = array<i32>} : memref<1x8x16x32xf32, #tpu.memory_space<vmem>>, vector<1x1x16x32xf32>,
    %c6_110 = arith.constant 6 : index
    %574 = memref.load %arg4[%c6_110] : memref<8xf32, #tpu.memory_space<smem>>
    %c24 = arith.constant 24 : index
    %575 = memref.load %arg3[%c24] : memref<128xf32, #tpu.memory_space<smem>>
    %576 = vector.broadcast %575 : f32 to vector<8x16xf32>
    %577 = arith.mulf %33, %576 : vector<8x16xf32>
    %c56 = arith.constant 56 : index
    %578 = memref.load %arg3[%c56] : memref<128xf32, #tpu.memory_space<smem>>
    %579 = vector.broadcast %578 : f32 to vector<8x16xf32>
    %580 = arith.mulf %35, %579 : vector<8x16xf32>
    %581 = arith.addf %577, %580 : vector<8x16xf32>
    %c88 = arith.constant 88 : index
    %582 = memref.load %arg3[%c88] : memref<128xf32, #tpu.memory_space<smem>>
    %583 = vector.broadcast %582 : f32 to vector<8x16xf32>
    %584 = arith.mulf %37, %583 : vector<8x16xf32>
    %585 = arith.addf %581, %584 : vector<8x16xf32>
    %c120 = arith.constant 120 : index
    %586 = memref.load %arg3[%c120] : memref<128xf32, #tpu.memory_space<smem>>
    %587 = vector.broadcast %586 : f32 to vector<8x16xf32>
    %588 = arith.mulf %39, %587 : vector<8x16xf32>
    %589 = arith.addf %585, %588 : vector<8x16xf32>
    %590 = vector.broadcast %574 : f32 to vector<8x16xf32>
    %591 = arith.addf %589, %590 : vector<8x16xf32>
    %cst_111 = arith.constant 0.000000e+00 : f32
    %592 = vector.broadcast %cst_111 : f32 to vector<8x16xf32>
    %593 = arith.maximumf %591, %592 : vector<8x16xf32>
    %cst_112 = arith.constant dense<0.000000e+00> : vector<8x32xf32>
    %594 = tpu.matmul %593, %8, %cst_112 {dimension_numbers = #tpu.dot_dimension_numbers<[1], [0], [0], [1], [0, 0, 1, 1], [], []>} : vector<8x16xf32>, vector<16x32xf32>, vector<8x32xf32> -> vector<8x32xf32>
    %c25 = arith.constant 25 : index
    %595 = memref.load %arg3[%c25] : memref<128xf32, #tpu.memory_space<smem>>
    %596 = vector.broadcast %595 : f32 to vector<8x16xf32>
    %597 = arith.mulf %33, %596 : vector<8x16xf32>
    %c57 = arith.constant 57 : index
    %598 = memref.load %arg3[%c57] : memref<128xf32, #tpu.memory_space<smem>>
    %599 = vector.broadcast %598 : f32 to vector<8x16xf32>
    %600 = arith.mulf %35, %599 : vector<8x16xf32>
    %601 = arith.addf %597, %600 : vector<8x16xf32>
    %c89 = arith.constant 89 : index
    %602 = memref.load %arg3[%c89] : memref<128xf32, #tpu.memory_space<smem>>
    %603 = vector.broadcast %602 : f32 to vector<8x16xf32>
    %604 = arith.mulf %37, %603 : vector<8x16xf32>
    %605 = arith.addf %601, %604 : vector<8x16xf32>
    %c121 = arith.constant 121 : index
    %606 = memref.load %arg3[%c121] : memref<128xf32, #tpu.memory_space<smem>>
    %607 = vector.broadcast %606 : f32 to vector<8x16xf32>
    %608 = arith.mulf %39, %607 : vector<8x16xf32>
    %609 = arith.addf %605, %608 : vector<8x16xf32>
    %610 = vector.broadcast %574 : f32 to vector<8x16xf32>
    %611 = arith.addf %609, %610 : vector<8x16xf32>
    %cst_113 = arith.constant 0.000000e+00 : f32
    %612 = vector.broadcast %cst_113 : f32 to vector<8x16xf32>
    %613 = arith.maximumf %611, %612 : vector<8x16xf32>
    %cst_114 = arith.constant dense<0.000000e+00> : vector<8x32xf32>
    %614 = tpu.matmul %613, %15, %cst_114 {dimension_numbers = #tpu.dot_dimension_numbers<[1], [0], [0], [1], [0, 0, 1, 1], [], []>} : vector<8x16xf32>, vector<16x32xf32>, vector<8x32xf32> -> vector<8x32xf32>
    %615 = arith.addf %594, %614 : vector<8x32xf32>
    %c26 = arith.constant 26 : index
    %616 = memref.load %arg3[%c26] : memref<128xf32, #tpu.memory_space<smem>>
    %617 = vector.broadcast %616 : f32 to vector<8x16xf32>
    %618 = arith.mulf %33, %617 : vector<8x16xf32>
    %c58 = arith.constant 58 : index
    %619 = memref.load %arg3[%c58] : memref<128xf32, #tpu.memory_space<smem>>
    %620 = vector.broadcast %619 : f32 to vector<8x16xf32>
    %621 = arith.mulf %35, %620 : vector<8x16xf32>
    %622 = arith.addf %618, %621 : vector<8x16xf32>
    %c90 = arith.constant 90 : index
    %623 = memref.load %arg3[%c90] : memref<128xf32, #tpu.memory_space<smem>>
    %624 = vector.broadcast %623 : f32 to vector<8x16xf32>
    %625 = arith.mulf %37, %624 : vector<8x16xf32>
    %626 = arith.addf %622, %625 : vector<8x16xf32>
    %c122 = arith.constant 122 : index
    %627 = memref.load %arg3[%c122] : memref<128xf32, #tpu.memory_space<smem>>
    %628 = vector.broadcast %627 : f32 to vector<8x16xf32>
    %629 = arith.mulf %39, %628 : vector<8x16xf32>
    %630 = arith.addf %626, %629 : vector<8x16xf32>
    %631 = vector.broadcast %574 : f32 to vector<8x16xf32>
    %632 = arith.addf %630, %631 : vector<8x16xf32>
    %cst_115 = arith.constant 0.000000e+00 : f32
    %633 = vector.broadcast %cst_115 : f32 to vector<8x16xf32>
    %634 = arith.maximumf %632, %633 : vector<8x16xf32>
    %cst_116 = arith.constant dense<0.000000e+00> : vector<8x32xf32>
    %635 = tpu.matmul %634, %8, %cst_116 {dimension_numbers = #tpu.dot_dimension_numbers<[1], [0], [0], [1], [0, 0, 1, 1], [], []>} : vector<8x16xf32>, vector<16x32xf32>, vector<8x32xf32> -> vector<8x32xf32>
    %c27 = arith.constant 27 : index
    %636 = memref.load %arg3[%c27] : memref<128xf32, #tpu.memory_space<smem>>
    %637 = vector.broadcast %636 : f32 to vector<8x16xf32>
    %638 = arith.mulf %33, %637 : vector<8x16xf32>
    %c59 = arith.constant 59 : index
    %639 = memref.load %arg3[%c59] : memref<128xf32, #tpu.memory_space<smem>>
    %640 = vector.broadcast %639 : f32 to vector<8x16xf32>
    %641 = arith.mulf %35, %640 : vector<8x16xf32>
    %642 = arith.addf %638, %641 : vector<8x16xf32>
    %c91 = arith.constant 91 : index
    %643 = memref.load %arg3[%c91] : memref<128xf32, #tpu.memory_space<smem>>
    %644 = vector.broadcast %643 : f32 to vector<8x16xf32>
    %645 = arith.mulf %37, %644 : vector<8x16xf32>
    %646 = arith.addf %642, %645 : vector<8x16xf32>
    %c123 = arith.constant 123 : index
    %647 = memref.load %arg3[%c123] : memref<128xf32, #tpu.memory_space<smem>>
    %648 = vector.broadcast %647 : f32 to vector<8x16xf32>
    %649 = arith.mulf %39, %648 : vector<8x16xf32>
    %650 = arith.addf %646, %649 : vector<8x16xf32>
    %651 = vector.broadcast %574 : f32 to vector<8x16xf32>
    %652 = arith.addf %650, %651 : vector<8x16xf32>
    %cst_117 = arith.constant 0.000000e+00 : f32
    %653 = vector.broadcast %cst_117 : f32 to vector<8x16xf32>
    %654 = arith.maximumf %652, %653 : vector<8x16xf32>
    %cst_118 = arith.constant dense<0.000000e+00> : vector<8x32xf32>
    %655 = tpu.matmul %654, %15, %cst_118 {dimension_numbers = #tpu.dot_dimension_numbers<[1], [0], [0], [1], [0, 0, 1, 1], [], []>} : vector<8x16xf32>, vector<16x32xf32>, vector<8x32xf32> -> vector<8x32xf32>
    %656 = arith.addf %635, %655 : vector<8x32xf32>
    %cst_119 = arith.constant dense<0.000000e+00> : vector<16x32xf32>
    %657 = tpu.matmul %24, %615, %cst_119 {dimension_numbers = #tpu.dot_dimension_numbers<[1], [0], [0], [1], [0, 0, 1, 1], [], []>} : vector<16x8xf32>, vector<8x32xf32>, vector<16x32xf32> -> vector<16x32xf32>
    %cst_120 = arith.constant dense<0.000000e+00> : vector<16x32xf32>
    %658 = tpu.matmul %31, %656, %cst_120 {dimension_numbers = #tpu.dot_dimension_numbers<[1], [0], [0], [1], [0, 0, 1, 1], [], []>} : vector<16x8xf32>, vector<8x32xf32>, vector<16x32xf32> -> vector<16x32xf32>
    %659 = arith.addf %657, %658 : vector<16x32xf32>
    %c0_121 = arith.constant 0 : index
    %c6_122 = arith.constant 6 : index
    %c0_123 = arith.constant 0 : index
    %c0_124 = arith.constant 0 : index
    %660 = vector.load %arg5[%c0_121, %c6_122, %c0_123, %c0_124] : memref<1x8x16x32xf32, #tpu.memory_space<vmem>>, vector<1x1x16x32xf32>
    %661 = vector.shape_cast %660 : vector<1x1x16x32xf32> to vector<16x32xf32>
    %662 = vector.shape_cast %659 : vector<16x32xf32> to vector<1x1x16x32xf32>
    tpu.vector_store %arg5[%c0_121, %c6_122, %c0_123, %c0_124], %662 {strides = array<i32>} : memref<1x8x16x32xf32, #tpu.memory_space<vmem>>, vector<1x1x16x32xf32>,
    %c7_125 = arith.constant 7 : index
    %663 = memref.load %arg4[%c7_125] : memref<8xf32, #tpu.memory_space<smem>>
    %c28 = arith.constant 28 : index
    %664 = memref.load %arg3[%c28] : memref<128xf32, #tpu.memory_space<smem>>
    %665 = vector.broadcast %664 : f32 to vector<8x16xf32>
    %666 = arith.mulf %33, %665 : vector<8x16xf32>
    %c60 = arith.constant 60 : index
    %667 = memref.load %arg3[%c60] : memref<128xf32, #tpu.memory_space<smem>>
    %668 = vector.broadcast %667 : f32 to vector<8x16xf32>
    %669 = arith.mulf %35, %668 : vector<8x16xf32>
    %670 = arith.addf %666, %669 : vector<8x16xf32>
    %c92 = arith.constant 92 : index
    %671 = memref.load %arg3[%c92] : memref<128xf32, #tpu.memory_space<smem>>
    %672 = vector.broadcast %671 : f32 to vector<8x16xf32>
    %673 = arith.mulf %37, %672 : vector<8x16xf32>
    %674 = arith.addf %670, %673 : vector<8x16xf32>
    %c124 = arith.constant 124 : index
    %675 = memref.load %arg3[%c124] : memref<128xf32, #tpu.memory_space<smem>>
    %676 = vector.broadcast %675 : f32 to vector<8x16xf32>
    %677 = arith.mulf %39, %676 : vector<8x16xf32>
    %678 = arith.addf %674, %677 : vector<8x16xf32>
    %679 = vector.broadcast %663 : f32 to vector<8x16xf32>
    %680 = arith.addf %678, %679 : vector<8x16xf32>
    %cst_126 = arith.constant 0.000000e+00 : f32
    %681 = vector.broadcast %cst_126 : f32 to vector<8x16xf32>
    %682 = arith.maximumf %680, %681 : vector<8x16xf32>
    %cst_127 = arith.constant dense<0.000000e+00> : vector<8x32xf32>
    %683 = tpu.matmul %682, %8, %cst_127 {dimension_numbers = #tpu.dot_dimension_numbers<[1], [0], [0], [1], [0, 0, 1, 1], [], []>} : vector<8x16xf32>, vector<16x32xf32>, vector<8x32xf32> -> vector<8x32xf32>
    %c29 = arith.constant 29 : index
    %684 = memref.load %arg3[%c29] : memref<128xf32, #tpu.memory_space<smem>>
    %685 = vector.broadcast %684 : f32 to vector<8x16xf32>
    %686 = arith.mulf %33, %685 : vector<8x16xf32>
    %c61 = arith.constant 61 : index
    %687 = memref.load %arg3[%c61] : memref<128xf32, #tpu.memory_space<smem>>
    %688 = vector.broadcast %687 : f32 to vector<8x16xf32>
    %689 = arith.mulf %35, %688 : vector<8x16xf32>
    %690 = arith.addf %686, %689 : vector<8x16xf32>
    %c93 = arith.constant 93 : index
    %691 = memref.load %arg3[%c93] : memref<128xf32, #tpu.memory_space<smem>>
    %692 = vector.broadcast %691 : f32 to vector<8x16xf32>
    %693 = arith.mulf %37, %692 : vector<8x16xf32>
    %694 = arith.addf %690, %693 : vector<8x16xf32>
    %c125 = arith.constant 125 : index
    %695 = memref.load %arg3[%c125] : memref<128xf32, #tpu.memory_space<smem>>
    %696 = vector.broadcast %695 : f32 to vector<8x16xf32>
    %697 = arith.mulf %39, %696 : vector<8x16xf32>
    %698 = arith.addf %694, %697 : vector<8x16xf32>
    %699 = vector.broadcast %663 : f32 to vector<8x16xf32>
    %700 = arith.addf %698, %699 : vector<8x16xf32>
    %cst_128 = arith.constant 0.000000e+00 : f32
    %701 = vector.broadcast %cst_128 : f32 to vector<8x16xf32>
    %702 = arith.maximumf %700, %701 : vector<8x16xf32>
    %cst_129 = arith.constant dense<0.000000e+00> : vector<8x32xf32>
    %703 = tpu.matmul %702, %15, %cst_129 {dimension_numbers = #tpu.dot_dimension_numbers<[1], [0], [0], [1], [0, 0, 1, 1], [], []>} : vector<8x16xf32>, vector<16x32xf32>, vector<8x32xf32> -> vector<8x32xf32>
    %704 = arith.addf %683, %703 : vector<8x32xf32>
    %c30 = arith.constant 30 : index
    %705 = memref.load %arg3[%c30] : memref<128xf32, #tpu.memory_space<smem>>
    %706 = vector.broadcast %705 : f32 to vector<8x16xf32>
    %707 = arith.mulf %33, %706 : vector<8x16xf32>
    %c62 = arith.constant 62 : index
    %708 = memref.load %arg3[%c62] : memref<128xf32, #tpu.memory_space<smem>>
    %709 = vector.broadcast %708 : f32 to vector<8x16xf32>
    %710 = arith.mulf %35, %709 : vector<8x16xf32>
    %711 = arith.addf %707, %710 : vector<8x16xf32>
    %c94 = arith.constant 94 : index
    %712 = memref.load %arg3[%c94] : memref<128xf32, #tpu.memory_space<smem>>
    %713 = vector.broadcast %712 : f32 to vector<8x16xf32>
    %714 = arith.mulf %37, %713 : vector<8x16xf32>
    %715 = arith.addf %711, %714 : vector<8x16xf32>
    %c126 = arith.constant 126 : index
    %716 = memref.load %arg3[%c126] : memref<128xf32, #tpu.memory_space<smem>>
    %717 = vector.broadcast %716 : f32 to vector<8x16xf32>
    %718 = arith.mulf %39, %717 : vector<8x16xf32>
    %719 = arith.addf %715, %718 : vector<8x16xf32>
    %720 = vector.broadcast %663 : f32 to vector<8x16xf32>
    %721 = arith.addf %719, %720 : vector<8x16xf32>
    %cst_130 = arith.constant 0.000000e+00 : f32
    %722 = vector.broadcast %cst_130 : f32 to vector<8x16xf32>
    %723 = arith.maximumf %721, %722 : vector<8x16xf32>
    %cst_131 = arith.constant dense<0.000000e+00> : vector<8x32xf32>
    %724 = tpu.matmul %723, %8, %cst_131 {dimension_numbers = #tpu.dot_dimension_numbers<[1], [0], [0], [1], [0, 0, 1, 1], [], []>} : vector<8x16xf32>, vector<16x32xf32>, vector<8x32xf32> -> vector<8x32xf32>
    %c31 = arith.constant 31 : index
    %725 = memref.load %arg3[%c31] : memref<128xf32, #tpu.memory_space<smem>>
    %726 = vector.broadcast %725 : f32 to vector<8x16xf32>
    %727 = arith.mulf %33, %726 : vector<8x16xf32>
    %c63 = arith.constant 63 : index
    %728 = memref.load %arg3[%c63] : memref<128xf32, #tpu.memory_space<smem>>
    %729 = vector.broadcast %728 : f32 to vector<8x16xf32>
    %730 = arith.mulf %35, %729 : vector<8x16xf32>
    %731 = arith.addf %727, %730 : vector<8x16xf32>
    %c95 = arith.constant 95 : index
    %732 = memref.load %arg3[%c95] : memref<128xf32, #tpu.memory_space<smem>>
    %733 = vector.broadcast %732 : f32 to vector<8x16xf32>
    %734 = arith.mulf %37, %733 : vector<8x16xf32>
    %735 = arith.addf %731, %734 : vector<8x16xf32>
    %c127 = arith.constant 127 : index
    %736 = memref.load %arg3[%c127] : memref<128xf32, #tpu.memory_space<smem>>
    %737 = vector.broadcast %736 : f32 to vector<8x16xf32>
    %738 = arith.mulf %39, %737 : vector<8x16xf32>
    %739 = arith.addf %735, %738 : vector<8x16xf32>
    %740 = vector.broadcast %663 : f32 to vector<8x16xf32>
    %741 = arith.addf %739, %740 : vector<8x16xf32>
    %cst_132 = arith.constant 0.000000e+00 : f32
    %742 = vector.broadcast %cst_132 : f32 to vector<8x16xf32>
    %743 = arith.maximumf %741, %742 : vector<8x16xf32>
    %cst_133 = arith.constant dense<0.000000e+00> : vector<8x32xf32>
    %744 = tpu.matmul %743, %15, %cst_133 {dimension_numbers = #tpu.dot_dimension_numbers<[1], [0], [0], [1], [0, 0, 1, 1], [], []>} : vector<8x16xf32>, vector<16x32xf32>, vector<8x32xf32> -> vector<8x32xf32>
    %745 = arith.addf %724, %744 : vector<8x32xf32>
    %cst_134 = arith.constant dense<0.000000e+00> : vector<16x32xf32>
    %746 = tpu.matmul %24, %704, %cst_134 {dimension_numbers = #tpu.dot_dimension_numbers<[1], [0], [0], [1], [0, 0, 1, 1], [], []>} : vector<16x8xf32>, vector<8x32xf32>, vector<16x32xf32> -> vector<16x32xf32>
    %cst_135 = arith.constant dense<0.000000e+00> : vector<16x32xf32>
    %747 = tpu.matmul %31, %745, %cst_135 {dimension_numbers = #tpu.dot_dimension_numbers<[1], [0], [0], [1], [0, 0, 1, 1], [], []>} : vector<16x8xf32>, vector<8x32xf32>, vector<16x32xf32> -> vector<16x32xf32>
    %748 = arith.addf %746, %747 : vector<16x32xf32>
    %c0_136 = arith.constant 0 : index
    %c7_137 = arith.constant 7 : index
    %c0_138 = arith.constant 0 : index
    %c0_139 = arith.constant 0 : index
    %749 = vector.load %arg5[%c0_136, %c7_137, %c0_138, %c0_139] : memref<1x8x16x32xf32, #tpu.memory_space<vmem>>, vector<1x1x16x32xf32>
    %750 = vector.shape_cast %749 : vector<1x1x16x32xf32> to vector<16x32xf32>
    %751 = vector.shape_cast %748 : vector<16x32xf32> to vector<1x1x16x32xf32>
    tpu.vector_store %arg5[%c0_136, %c7_137, %c0_138, %c0_139], %751 {strides = array<i32>} : memref<1x8x16x32xf32, #tpu.memory_space<vmem>>, vector<1x1x16x32xf32>,
    return
  }
  func.func @transform_0(%arg0: i32, %arg1: i32) -> (i32, i32, i32, i32) {
    %c0_i32 = arith.constant 0 : i32
    %c0_i32_0 = arith.constant 0 : i32
    %c0_i32_1 = arith.constant 0 : i32
    return %arg0, %c0_i32, %arg1, %c0_i32_0 : i32, i32, i32, i32
  }
  func.func @transform_1(%arg0: i32, %arg1: i32) -> i32 {
    %c0_i32 = arith.constant 0 : i32
    %c0_i32_0 = arith.constant 0 : i32
    return %c0_i32 : i32
  }
  func.func @transform_2(%arg0: i32, %arg1: i32) -> i32 {
    %c0_i32 = arith.constant 0 : i32
    %c0_i32_0 = arith.constant 0 : i32
    return %c0_i32 : i32
  }
  func.func @transform_3(%arg0: i32, %arg1: i32) -> (i32, i32, i32, i32) {
    %c0_i32 = arith.constant 0 : i32
    %c0_i32_0 = arith.constant 0 : i32
    %c0_i32_1 = arith.constant 0 : i32
    return %arg0, %c0_i32, %arg1, %c0_i32_0 : i32, i32, i32, i32
  }
}

</mosaic_0001>

<bundles_post_ra>
// kernel: tpu_custom_call.1
= control target key start
LH: loop header
LB: loop body
LE: loop exit
PB: predicated region body
PF: predicated region fallthrough
CT: control target
= control target key end

     0   :  { %s6699_s0 = inlined_call_operand.hbm [shape: f32[2,4,16,16], index: 0, kind: input, shape index: {}]   ;;  %s6700_s1 = inlined_call_operand.vmem [shape: f32[128], index: 1, kind: input, shape index: {}]   ;;  %s6701_s2 = inlined_call_operand.vmem [shape: f32[8], index: 2, kind: input, shape index: {}]   ;;  %s6702_s3 = inlined_call_operand.hbm [shape: f32[2,8,32,32], index: 3, kind: output, shape index: {}]  }
   0x1   :  { %6712 = sst [smem:[#allocation19_spill]] %s6700_s1 }
   0x2   :  { %6713 = sst [smem:[#allocation20_spill]] %s6701_s2 }
   0x3   :  { %8 = vsyncpa [#allocation3], 0 }
   0x4   :  { %10 = vsyncpa [#allocation3 + $0x1], 0 }
   0x5   :  { %11 = vsyncpa [#allocation5], 0 }
   0x6   :  { %12 = vsyncpa [#allocation8], 0 }
   0x7   :  { %13 = vsyncpa [#allocation4], 0 }
   0x8   :  { %15 = vsyncpa [#allocation4 + $0x1], 0  ;;  %s5611_s12 = smov 0   ;;  %s5613_s13 = smov 0  }
   0x9   :  { %s5615_s14 = smov 0   ;;  %s5617_s15 = smov 0  }
   0xa   :  { %s5619_s16 = smov 0   ;;  %s5621_s17 = smov 0  }
   0xb   :  { %s5623_s18 = smov 0   ;;  %s5625_s19 = smov 0  }
   0xc LB: > { %6714 = sst [smem:[#allocation16_spill]] %s5545_s12  ;;  %s4560_s20 = sadd.s32 4294967295, %s5573_s19   ;;  %s5573_s19 = sphi %s5625_s19, %s21_s19   ;;  %s5569_s18 = sphi %s5623_s18, %s6752_s18   ;;  %s5565_s17 = sphi %s5621_s17, %s6751_s17   ;;  %s5561_s16 = sphi %s5619_s16, %s6750_s16   ;;  %s5557_s15 = sphi %s5617_s15, %s6749_s15   ;;  %s5553_s14 = sphi %s5615_s14, %s6748_s14   ;;  %s5549_s13 = sphi %s5613_s13, %s6747_s13   ;;  %s5545_s12 = sphi %s5611_s12, %s6746_s12  }
   0xd   : > { %s4561_s21 = sadd.s32 4294967294, %s5573_s19   ;;  %p49_p0 = scmp.ne.s32.totalorder %s5553_s14, %s5549_s13 }
   0xe   : > { %p50_p1 = scmp.eq.s32.totalorder %s5573_s19, 0  ;;  %p55_p2 = scmp.ne.s32.totalorder %s5549_s13, %s5545_s12 }
   0xf   : > { %p5659_p3 = scmp.eq.s32.totalorder %s4560_s20, 0  ;;  %p123_p4 = scmp.eq.s32.totalorder %s4560_s20, 3 }
  0x10   : > { %p5663_p5 = por %p50_p1, %p49_p0  ;;  %p129_p6 = scmp.eq.s32.totalorder %s4561_s21, 3 }
  0x11   : > { %s6715_s23 = scalar_select %p5659_p3, 1, 0 }
  0x12   : > { %p5669_p7 = por %p5659_p3, %p55_p2  ;;  %p5673_p8 = por %p123_p4, %p49_p0 }
  0x13   : > { %p5677_p9 = por %p129_p6, %p55_p2  ;;  %p4562_p10 = scmp.ge.s32.totalorder %s5573_s19, 1 }
  0x14   : > { %s6717_s25 = scalar_select %p5669_p7, 1, 0 }
  0x15   : > { %s6718_s26 = scalar_select %p5673_p8, 1, 0 }
  0x16   : > { %s6719_s27 = scalar_select %p5677_p9, 1, 0 }
  0x17   : > { %p136_p11 = scmp.lt.s32.totalorder %s5573_s19, 5  ;;  %s6721_s1 = sld [smem:[#allocation19_spill]] }
  0x18   : > { %6720 = sst [smem:[#allocation17_spill]] %s6719_s27  ;;  %p5350_p13 = scmp.lt.s32.totalorder %s5573_s19, 4 }
  0x19   : > { %p5686_p12 = pnand %p4562_p10, %p136_p11  ;;  %s6723_s2 = sld [smem:[#allocation20_spill]] }
  0x1a   : > { %p5698_p1 = pnand %p5350_p13, %p5663_p5 }
  0x1b   : > { %s6722_s4 = scalar_select %p5686_p12, 1, 0 }
  0x1c   : > { %p5333_p0 = pneg %p5686_p12 }
  0x1d   : > { %s149_s30 = sshll.u32 %s6721_s1, 4  ;;  %s150_s30 = int_to_ptr.vmem [resolvable:$true] %s149_s30 }
  0x1e   : > { %s6724_s8 = scalar_select %p5698_p1, 1, 0 }
  0x1f   : > { %s160_s7 = sshll.u32 %s6723_s2, 4  ;;  %p5704_p2 = pnand %p5333_p0, %p5659_p3  ;;  %s161_s7 = int_to_ptr.vmem [resolvable:$true] %s160_s7 }
  0x20   : > { %s5437_s10 = scalar_lea.vmem %s150_s30, 16  ;;  %p5445_p9 = scmp.lt.s32.totalorder %s150_s30, %s150_s30 }
  0x21   : > { %p5438_p4 = scmp.ne.s32.totalorder %s150_s30, %s5437_s10  ;;  %p5439_p6 = pneg %p5704_p2 }
  0x22   : > { %p5446_p8 = scmp.lt.s32.totalorder %s5437_s10, %s5437_s10 }
  0x23   : > { %p5440_p10 = pnand %p5439_p6, %p5438_p4 }
  0x24   : > { %p5447_p7 = por %p5446_p8, %p5445_p9 }
  0x25   : > { %p5441_p11 = pneg %p5440_p10 }
  0x27   : > { %p5448_p5 = pnand %p5447_p7, %p5441_p11 }
  0x29   : > { %5451 = shalt.err (!%p5448_p5)
}
  0x2a   : > { %s5575_s11 = smov [#allocation6]   ;;  %s5452_s20 = scalar_lea.vmem %s161_s7, 16 }
  0x2b   : > { %5336 = dma.vmem_to_smem (!%p5704_p2), %s150_s30, 16, %s5575_s11, [#allocation5]  }
  0x2c   : > { %p5453_p13 = scmp.ne.s32.totalorder %s161_s7, %s5452_s20  ;;  %p5460_p12 = scmp.lt.s32.totalorder %s161_s7, %s161_s7 }
  0x2d   : > { %p5461_p1 = scmp.lt.s32.totalorder %s5452_s20, %s5452_s20 }
  0x2e   : > { %p5455_p0 = pnand %p5453_p13, %p5439_p6 }
  0x2f   : > { %p5462_p4 = por %p5461_p1, %p5460_p12 }
  0x30   : > { %p5456_p3 = pneg %p5455_p0 }
  0x32   : > { %p5463_p10 = pnand %p5462_p4, %p5456_p3 }
  0x34   : > { %5466 = shalt.err (!%p5463_p10)
}
  0x35   : > { %s5576_s21 = smov [#allocation7]   ;;  %s30_s24 = sadd.s32 1, %s5565_s17 }
  0x36   : > { %5339 = dma.vmem_to_smem (!%p5704_p2), %s161_s7, 16, %s5576_s21, [#allocation8]  }
  0x37   : > { %s33_s28 = sadd.s32 1, %s5569_s18  ;;  %p31_p7 = scmp.ge.s32.totalorder %s30_s24, 2 }
  0x38   : > { %s171_s29 = sand.u32 1, %s5553_s14   ;;  %s4567_s6 = sshll.u32 %s5569_s18, 3 }
  0x39   : > { %s4566_s30 = sshll.u32 %s171_s29, 5  ;;  %s6754_s24 = smov (%p31_p7, %s30_s24), 0 }
  0x3a   : > { %6726 = sst [smem:[#allocation18_spill]] %s6754_s24  ;;  %s6756_s28 = smov (!%p31_p7, %s33_s28), %s5569_s18 }
  0x3b   : > { %s38_s5 = ssub.s32 %s5565_s17, %s6754_s24  ;;  %p35_p3 = scmp.ge.s32.totalorder %s6756_s28, 2 }
  0x3c   : > { %s180_s9 = sadd.s32 %s5565_s17, %s4567_s6  ;;  %s175_s10 = scalar_lea.vmem [#allocation2], %s4566_s30 }
  0x3d   : > { %s183_s11 = sshll.u32 %s175_s10, 4  ;;  %s6758_s28 = smov (%p35_p3, %s6756_s28), 0  ;;  %s184_s11 = int_to_ptr.vmem [resolvable:$true] %s183_s11 }
  0x3e   : > { %s4568_s7 = sshll.u32 %s180_s9, 7  ;;  %s37_s20 = ssub.s32 %s5569_s18, %s6758_s28 }
  0x3f   : > { %s182_s1 = scalar_lea.hbm %s6699_s0, %s4568_s7  ;;  %s39_s2 = sor.u32 %s38_s5, %s37_s20 }
  0x40   : > { %p40_p8 = scmp.eq.s32.totalorder %s39_s2, 0  ;;  %s6727_s27 = sadd.s32 1, %s5553_s14 }
  0x41   : > { %s172_s24 = scalar_lea.sflag [#allocation3], %s171_s29  ;;  %p6728_p9 = scmp.ne.s32.totalorder %s6724_s8, 0 }
  0x42   : > { %s5734_s12 = scalar_select %p40_p8, %s5553_s14, %s6727_s27  }
  0x43   : > { %p5469_p12 = pneg %p6728_p9  ;;  %s5480_s30 = scalar_lea.vmem %s184_s11, 512 }
  0x44   : > { %p5481_p1 = scmp.ne.s32.totalorder %s184_s11, %s5480_s30  ;;  %s5577_s6 = smov [#allocation2]  }
  0x45   : > { %s5485_s9 = sshll.u32 %s5577_s6, 4  ;;  %s5486_s9 = int_to_ptr.vmem [resolvable:$false] %s5485_s9 }
  0x46   : > { %p5483_p2 = pnand %p5481_p1, %p5469_p12  ;;  %s5487_s10 = scalar_lea.vmem %s5486_s9, 1024 }
  0x47   : > { %p5488_p11 = scmp.lt.s32.totalorder %s184_s11, %s5486_s9  ;;  %p5489_p5 = scmp.lt.s32.totalorder %s5487_s10, %s5480_s30 }
  0x48   : > { %p5484_p6 = pneg %p5483_p2 }
  0x49   : > { %p5490_p13 = por %p5489_p5, %p5488_p11 }
  0x4b   : > { %p5491_p0 = pnand %p5490_p13, %p5484_p6 }
  0x4d   : > { %5494 = shalt.err (!%p5491_p0)
}
  0x4e   : > { %s5578_s2 = smov 256   ;;  %s5579_s22 = smov 128  }
  0x4f   : > { %s5580_s27 = smov 8   ;;  %p6729_p4 = scmp.ne.s32.totalorder %s6722_s4, 0 }
  0x50   : > { %5343 = dma.hbm_to_vmem [thread:$0]  (!%p6728_p9), %s182_s1, 512, %s184_s11, %s172_s24, %s5578_s2, %s5579_s22, %s5580_s27  }
  0x51   : > { %195 = sbr.rel (%p6729_p4) target bundleno = 1976 (0x7b8), region = 32  ;;  %s5743_s29 = sand.u32 (!%p6729_p4), 1, %s5549_s13  }
  0x52   : > { %s4570_s5 = sshll.u32 (!%p6729_p4), %s5743_s29, 5  ;;  %s198_s7 = scalar_lea.sflag (!%p6729_p4), [#allocation3], %s5743_s29 }
  0x53   : > { %s5747_s20 = scalar_lea.vmem (!%p6729_p4), [#allocation2], %s4570_s5  ;;  %p6730_p10 = scmp.ne.s32.totalorder (!%p6729_p4), %s6717_s25, 0 }
  0x56   : > { %5528 = dma.done.wait (%p6730_p10), %s198_s7, 512  }
  0x57   : > { %5530 = vsyncadd (%p6730_p10), %s198_s7, 4294966784  ;;  %p6731_p7 = scmp.ne.s32.totalorder %s6715_s23, 0 }
  0x59   : > { %5532 = dma.done.wait (%p6731_p7), [#allocation5], 16  }
  0x5a   : > { %5534 = vsyncadd (%p6731_p7), [#allocation5], 4294967280 }
  0x5b   : > { %5536 = dma.done.wait (%p6731_p7), [#allocation8], 16  }
  0x5c   : > { %5538 = vsyncadd (%p6731_p7), [#allocation8], 4294967280 }
  0x5d   : > { %214 = sfence }
  0x5e   : > { %v234_v0 = vlaneseq  ;;  %v5581_v1 = vmov 0.0   ;;  %s5763_s1 = sld [smem:[#allocation7]]  ;;  %vm5582_vm0 = vmmov 0   ;;  %v5781_v8 = vld [vmem:[%s5747_s20] sm:$0xff]  ;;  %v5786_v9 = vld [vmem:[%s5747_s20 + $0x8] sm:$0xff]  ;;  %v5801_v13 = vld [vmem:[%s5747_s20 + $0x10] sm:$0xff] }
  0x5f   : > { %5011 = vmatprep.subr.mxu0 %v5581_v1  ;;  %5018 = vmatprep.subr.mxu1 %v5581_v1  ;;  %s4588_s23 = sld [smem:[#allocation6 + $0x1]]  ;;  %v5583_v15 = vmov 1.0   ;;  %v5809_v16 = vld [vmem:[%s5747_s20 + $0x18] sm:$0xff]  ;;  %vm312_vm5 = vcmask 130048   ;;  %vm639_vm7 = vcmask 64512   ;;  %vm802_vm11 = vcmask 261120  }
  0x60   : > { %v5765_v2 = vshrl.u32 %v234_v0, 7  ;;  %5015 = vmatprep.mubr.msk.f32.mxu0 %vm5582_vm0, %v5581_v1  ;;  %5022 = vmatprep.mubr.msk.f32.mxu1 %vm5582_vm0, %v5581_v1  ;;  %s4589_s25 = sld [smem:[#allocation6 + $0x21]]  ;;  %v5771_v3 = vand.u32 127, %v234_v0 }
  0x61   : > { %s4590_s4 = sld [smem:[#allocation6 + $0x41]] }
  0x62   : > { %v5774_v4 = vadd.s32 8, %v5765_v2  ;;  %v239_v5 = vmul.u32 2, %v5765_v2  ;;  %s5777_s8 = sld [smem:[#allocation6 + $0x61]] }
  0x63   : > { %s5783_s24 = sld [smem:[#allocation6]] }
  0x64   : > { %v240_v6 = vmul.u32 2, %v5774_v4  ;;  %v247_v7 = vadd.s32 1, %v239_v5  ;;  %s5788_s11 = sld [smem:[#allocation6 + $0x20]]  ;;  %vm5796_vm2 = vcmp.eq.s32.totalorder %v5771_v3, %v239_v5  ;;  %v292_v33 = vstv %s5763_s1 }
  0x65   : > { %v296_v14 = vstv %s4588_s23  ;;  %s5803_s21 = sld [smem:[#allocation6 + $0x40]] }
  0x66   : > { %v248_v10 = vadd.s32 1, %v240_v6  ;;  %vm5791_vm1 = vcmp.eq.s32.totalorder %v5771_v3, %v240_v6  ;;  %v297_v17 = vmul.f32 %v296_v14, %v5781_v8  ;;  %v299_v18 = vstv %s4589_s25  ;;  %s5812_s30 = sld [smem:[#allocation6 + $0x60]] }
  0x67   : > { %5019 = vmatpush3.msk.msra.mxu1 %vm5791_vm1, %v5583_v15  ;;  %vm5821_vm4 = vcmp.eq.s32.totalorder %v5771_v3, %v247_v7  ;;  %v300_v21 = vmul.f32 %v5786_v9, %v299_v18  ;;  %v303_v22 = vstv %s4590_s4  ;;  %s4602_s6 = sld [smem:[#allocation6 + $0x3]]  ;;  %v5881_v18 = vmul.u32 2, %v5771_v3 }
  0x68   : > { %vm5815_vm3 = vcmp.eq.s32.totalorder %v5771_v3, %v248_v10  ;;  %5020 = vmatprep.subr.mxu1 %v5581_v1  ;;  %v304_v23 = vmul.f32 %v5801_v13, %v303_v22  ;;  %v307_v24 = vstv %s5777_s8  ;;  %s4603_s9 = sld [smem:[#allocation6 + $0x23]] }
  0x69   : > { %5012 = vmatpush3.msk.msra.mxu0 %vm5815_vm3, %v5583_v15  ;;  %5021 = vmatpush3.msk.msra.mxu1 %vm5796_vm2, %v5583_v15  ;;  %v301_v25 = vadd.f32 %v300_v21, %v297_v17  ;;  %v308_v26 = vmul.f32 %v5809_v16, %v307_v24  ;;  %v278_v27 = vstv %s5783_s24  ;;  %s4604_s10 = sld [smem:[#allocation6 + $0x43]]  ;;  %vm256_vm6 = vcmp.eq.s32.totalorder %v5765_v2, %v5881_v18 }
  0x6a   : > { %5013 = vmatprep.subr.mxu0 %v5581_v1  ;;  %5032 = vmatprep.subr.mxu1 %v5581_v1  ;;  %v279_v28 = vmul.f32 %v278_v27, %v5781_v8  ;;  %v281_v29 = vstv %s5788_s11  ;;  %s4605_s2 = sld [smem:[#allocation6 + $0x63]]  ;;  %v5886_v21 = vadd.s32 1, %v5881_v18  ;;  %v5889_v22 = vsel %vm256_vm6, 1.0, %v5581_v1 }
  0x6b   : > { %5014 = vmatpush3.msk.msra.mxu0 %vm5821_vm4, %v5583_v15  ;;  %v305_v30 = vadd.f32 %v304_v23, %v301_v25  ;;  %v282_v31 = vmul.f32 %v5786_v9, %v281_v29  ;;  %v285_v32 = vstv %s5803_s21  ;;  %s4598_s22 = sld [smem:[#allocation6 + $0x2]]  ;;  %vm257_vm9 = vcmp.eq.s32.totalorder %v5774_v4, %v5881_v18 }
  0x6c   : > { %5025 = vmatprep.subr.mxu0 %v5581_v1  ;;  %v286_v34 = vmul.f32 %v5801_v13, %v285_v32  ;;  %v289_v35 = vstv %s5812_s30  ;;  %s4599_s27 = sld [smem:[#allocation6 + $0x22]]  ;;  %vm263_vm8 = vcmp.eq.s32.totalorder %v5765_v2, %v5886_v21  ;;  %vm264_vm10 = vcmp.eq.s32.totalorder %v5774_v4, %v5886_v21 }
  0x6d   : > { %v309_v36 = vadd.f32 %v308_v26, %v305_v30  ;;  %v283_v37 = vadd.f32 %v282_v31, %v279_v28  ;;  %v290_v38 = vmul.f32 %v5809_v16, %v289_v35  ;;  %v477_v39 = vstv %s4602_s6  ;;  %s4600_s5 = sld [smem:[#allocation6 + $0x42]] }
  0x6e   : > { %v478_v40 = vmul.f32 %v477_v39, %v5781_v8  ;;  %v480_v41 = vstv %s4603_s9  ;;  %s4601_s7 = sld [smem:[#allocation6 + $0x62]]  ;;  %v5896_v23 = vsel %vm263_vm8, 1.0, %v5581_v1 }
  0x6f   : > { %v310_v42 = vadd.f32 %v309_v36, %v292_v33  ;;  %v287_v43 = vadd.f32 %v286_v34, %v283_v37  ;;  %v481_v44 = vmul.f32 %v5786_v9, %v480_v41  ;;  %v484_v45 = vstv %s4604_s10  ;;  %s4617_s1 = sld [smem:[#allocation6 + $0x4]] }
  0x70   : > { %v485_v46 = vmul.f32 %v5801_v13, %v484_v45  ;;  %v488_v47 = vstv %s4605_s2  ;;  %s4618_s23 = sld [smem:[#allocation6 + $0x24]] }
  0x71   : > { %v311_v48 = vmax.f32 %v310_v42, 0.0  ;;  %v291_v49 = vadd.f32 %v290_v38, %v287_v43  ;;  %v482_v50 = vadd.f32 %v481_v44, %v478_v40  ;;  %v489_v51 = vmul.f32 %v5809_v16, %v488_v47  ;;  %s4619_s25 = sld [smem:[#allocation6 + $0x44]] }
  0x72   : > { %v460_v52 = vstv %s4598_s22  ;;  %v463_v53 = vstv %s4599_s27  ;;  %s4621_s4 = sld [smem:[#allocation6 + $0x5]] }
  0x73   : > { %5016 = vmatmul.mubr.msk.f32.vlgmr.msra.gmra.mxu0 %vm312_vm5, %v311_v48  ;;  %v293_v54 = vadd.f32 %v292_v33, %v291_v49  ;;  %v486_v55 = vadd.f32 %v485_v46, %v482_v50  ;;  %v461_v56 = vmul.f32 %v460_v52, %v5781_v8  ;;  %v464_v57 = vmul.f32 %v5786_v9, %v463_v53  ;;  %s4620_s8 = sld [smem:[#allocation6 + $0x64]] }
  0x74   : > { %5026 = vmatpush3.msk.msra.mxu0 %vm5815_vm3, %v5583_v15  ;;  %5029 = vmatprep.mubr.msk.f32.mxu0 %vm5582_vm0, %v5581_v1  ;;  %v467_v58 = vstv %s4600_s5  ;;  %v471_v59 = vstv %s4601_s7  ;;  %s4631_s24 = sld [smem:[#allocation6 + $0x6]] }
  0x75   : > { %v294_v60 = vmax.f32 %v293_v54, 0.0  ;;  %5027 = vmatprep.subr.mxu0 %v5581_v1  ;;  %v490_v61 = vadd.f32 %v489_v51, %v486_v55  ;;  %v465_v62 = vadd.f32 %v464_v57, %v461_v56  ;;  %v468_v63 = vmul.f32 %v5801_v13, %v467_v58  ;;  %s4632_s11 = sld [smem:[#allocation6 + $0x26]] }
  0x76   : > { %5028 = vmatpush3.msk.msra.mxu0 %vm5821_vm4, %v5583_v15  ;;  %v472_v0 = vmul.f32 %v5809_v16, %v471_v59  ;;  %v807_v3 = vstv %s4617_s1  ;;  %v810_v24 = vstv %s4618_s23  ;;  %s4622_s21 = sld [smem:[#allocation6 + $0x25]] }
  0x77   : > { %5023 = vmatmul.mubr.msk.f32.vlgmr.msra.gmra.mxu1 %vm312_vm5, %v294_v60  ;;  %v491_v5 = vadd.f32 %v490_v61, %v292_v33  ;;  %v469_v6 = vadd.f32 %v468_v63, %v465_v62  ;;  %s5900_s30 = sld [smem:[#allocation6 + $0x45]]  ;;  %v808_v2 = vmul.f32 %v807_v3, %v5781_v8  ;;  %v811_v25 = vmul.f32 %v5786_v9, %v810_v24 }
  0x78   : > { %5033 = vmatpush3.msk.msra.mxu1 %vm5791_vm1, %v5583_v15  ;;  %5036 = vmatprep.mubr.msk.f32.mxu1 %vm5582_vm0, %v5581_v1  ;;  %v814_v26 = vstv %s4619_s25  ;;  %s4633_s6 = sld [smem:[#allocation6 + $0x46]]  ;;  %v825_v29 = vstv %s4621_s4 }
  0x79   : > { %5034 = vmatprep.subr.mxu1 %v5581_v1  ;;  %v492_v7 = vmax.f32 %v491_v5, 0.0  ;;  %v473_v10 = vadd.f32 %v472_v0, %v469_v6  ;;  %s5904_s9 = sld [smem:[#allocation6 + $0x7]]  ;;  %v815_v27 = vmul.f32 %v5801_v13, %v814_v26  ;;  %v812_v28 = vadd.f32 %v811_v25, %v808_v2 }
  0x7a   : > { %5035 = vmatpush3.msk.msra.mxu1 %vm5796_vm2, %v5583_v15  ;;  %s5906_s10 = sld [smem:[#allocation6 + $0x27]]  ;;  %v988_v30 = vstv %s4631_s24  ;;  %v818_v32 = vstv %s4620_s8  ;;  %v826_v34 = vmul.f32 %v825_v29, %v5781_v8 }
  0x7b   : > { %5030 = vmatmul.mubr.msk.f32.vlgmr.msra.gmra.mxu0 %vm312_vm5, %v492_v7  ;;  %v474_v14 = vadd.f32 %v473_v10, %v292_v33  ;;  %s5909_s2 = sld [smem:[#allocation6 + $0x65]]  ;;  %v991_v31 = vstv %s4632_s11  ;;  %v989_v35 = vmul.f32 %v988_v30, %v5781_v8  ;;  %v816_v37 = vadd.f32 %v815_v27, %v812_v28 }
  0x7c   : > { %5041 = vmatprep.mubr.msk.f32.mxu0 %vm639_vm7, %v5896_v23  ;;  %s5911_s22 = sld [smem:[#allocation6 + $0x66]]  ;;  %v828_v33 = vstv %s4622_s21  ;;  %v992_v36 = vmul.f32 %v5786_v9, %v991_v31  ;;  %v819_v38 = vmul.f32 %v5809_v16, %v818_v32  ;;  %v5938_v7 = vsel %vm257_vm9, 1.0, %v5581_v1 }
  0x7d   : > { %v475_v17 = vmax.f32 %v474_v14, 0.0  ;;  %s4616_s27 = sld [smem:[#allocation7 + $0x1]]  ;;  %v829_v39 = vmul.f32 %v5786_v9, %v828_v33  ;;  %v832_v41 = vstv %s5900_s30  ;;  %v5959_v32 = vsel %vm264_vm10, 1.0, %v5581_v1 }
  0x7e   : > { %s5913_s5 = sld [smem:[#allocation6 + $0x47]]  ;;  %v995_v40 = vstv %s4633_s6  ;;  %v993_v44 = vadd.f32 %v992_v36, %v989_v35  ;;  %v820_v47 = vadd.f32 %v819_v38, %v816_v37  ;;  %v833_v49 = vmul.f32 %v5801_v13, %v832_v41 }
  0x7f   : > { %5037 = vmatmul.mubr.msk.f32.vlgmr.msra.gmra.mxu1 %vm312_vm5, %v475_v17  ;;  %v1005_v42 = vstv %s5904_s9  ;;  %s5923_s7 = sld [smem:[#allocation6 + $0x67]]  ;;  %v996_v45 = vmul.f32 %v5801_v13, %v995_v40  ;;  %v830_v48 = vadd.f32 %v829_v39, %v826_v34 }
  0x80   : > { %5046 = vmatprep.mubr.msk.f32.mxu1 %vm639_vm7, %v5889_v22  ;;  %v1008_v43 = vstv %s5906_s10  ;;  %v1006_v52 = vmul.f32 %v1005_v42, %v5781_v8  ;;  %s4652_s1 = sld [smem:[#allocation6 + $0x8]] }
  0x81   : > { %v1009_v53 = vmul.f32 %v5786_v9, %v1008_v43  ;;  %v836_v55 = vstv %s5909_s2  ;;  %v997_v57 = vadd.f32 %v996_v45, %v993_v44  ;;  %v834_v61 = vadd.f32 %v833_v49, %v830_v48  ;;  %s4653_s23 = sld [smem:[#allocation6 + $0x28]] }
  0x82   : > { %v999_v50 = vstv %s5911_s22  ;;  %v837_v63 = vmul.f32 %v5809_v16, %v836_v55  ;;  %s4654_s25 = sld [smem:[#allocation6 + $0x48]] }
  0x83   : > { %v821_v51 = vstv %s4616_s27  ;;  %v1000_v58 = vmul.f32 %v5809_v16, %v999_v50  ;;  %v1010_v0 = vadd.f32 %v1009_v53, %v1006_v52  ;;  %s4656_s4 = sld [smem:[#allocation6 + $0x9]] }
  0x84   : > { %v1012_v56 = vstv %s5913_s5  ;;  %v822_v60 = vadd.f32 %v821_v51, %v820_v47  ;;  %v838_v3 = vadd.f32 %v837_v63, %v834_v61  ;;  %s4657_s8 = sld [smem:[#allocation6 + $0x29]] }
  0x85   : > { %v1013_v5 = vmul.f32 %v5801_v13, %v1012_v56  ;;  %v1016_v10 = vstv %s5923_s7  ;;  %v1001_v14 = vadd.f32 %v1000_v58, %v997_v57  ;;  %s5999_s24 = sld [smem:[#allocation6 + $0x68]] }
  0x86   : > { %v823_v18 = vmax.f32 %v822_v60, 0.0  ;;  %v1017_v2 = vmul.f32 %v5809_v16, %v1016_v10  ;;  %v839_v29 = vadd.f32 %v838_v3, %v821_v51  ;;  %s4658_s11 = sld [smem:[#allocation6 + $0x49]]  ;;  %v1322_v35 = vstv %s4652_s1  ;;  %s4573_s1 = sshll.u32 %s5743_s29, 7 }
  0x87   : > { %v1014_v24 = vadd.f32 %v1013_v5, %v1010_v0  ;;  %v1002_v26 = vadd.f32 %v1001_v14, %v821_v51  ;;  %s6001_s21 = sld [smem:[#allocation6 + $0xa]]  ;;  %v1325_v36 = vstv %s4653_s23  ;;  %v1323_v37 = vmul.f32 %v1322_v35, %v5781_v8  ;;  %s6044_s23 = scalar_lea.vmem [#allocation9], %s4573_s1 }
  0x88   : > { %v840_v21 = vmax.f32 %v839_v29, 0.0  ;;  %s6003_s30 = sld [smem:[#allocation6 + $0x2a]]  ;;  %v1326_v38 = vmul.f32 %v5786_v9, %v1325_v36  ;;  %v1329_v41 = vstv %s4654_s25 }
  0x89   : > { %v1018_v30 = vadd.f32 %v1017_v2, %v1014_v24  ;;  %v1003_v4 = vmax.f32 %v1002_v26, 0.0  ;;  %s6005_s6 = sld [smem:[#allocation6 + $0xb]]  ;;  %v1340_v39 = vstv %s4656_s4  ;;  %v1330_v48 = vmul.f32 %v5801_v13, %v1329_v41 }
  0x8a   : > { %s6007_s9 = sld [smem:[#allocation6 + $0x2b]]  ;;  %v1343_v40 = vstv %s4657_s8  ;;  %v1341_v43 = vmul.f32 %v1340_v39, %v5781_v8  ;;  %v1327_v47 = vadd.f32 %v1326_v38, %v1323_v37 }
  0x8b   : > { %v1019_v33 = vadd.f32 %v1018_v30, %v821_v51  ;;  %s6009_s10 = sld [smem:[#allocation6 + $0x69]]  ;;  %v1344_v44 = vmul.f32 %v5786_v9, %v1343_v40  ;;  %v1333_v51 = vstv %s5999_s24 }
  0x8c   : > { %s6013_s2 = sld [smem:[#allocation6 + $0x4a]]  ;;  %v1347_v45 = vstv %s4658_s11  ;;  %v1331_v61 = vadd.f32 %v1330_v48, %v1327_v47 }
  0x8d   : > { %v1020_v34 = vmax.f32 %v1019_v33, 0.0  ;;  %s6015_s22 = sld [smem:[#allocation6 + $0x4b]]  ;;  %v1503_v49 = vstv %s6001_s21  ;;  %v1348_v53 = vmul.f32 %v5801_v13, %v1347_v45  ;;  %v1345_v56 = vadd.f32 %v1344_v44, %v1341_v43 }
  0x8e   : > { %v1506_v50 = vstv %s6003_s30  ;;  %s6022_s27 = sld [smem:[#allocation6 + $0x6a]]  ;;  %v1504_v58 = vmul.f32 %v1503_v49, %v5781_v8 }
  0x8f   : > { %s6024_s5 = sld [smem:[#allocation7 + $0x2]] }
  0x90   : > { %v1523_v55 = vstv %s6007_s9  ;;  %s6030_s7 = sld [smem:[#allocation6 + $0x6b]] }
  0x91   : > { %v1351_v57 = vstv %s6009_s10  ;;  %v1524_v5 = vmul.f32 %v5786_v9, %v1523_v55  ;;  %s4687_s25 = sld [smem:[#allocation6 + $0xc]] }
  0x92   : > { %v1510_v63 = vstv %s6013_s2  ;;  %v1352_v10 = vmul.f32 %v5809_v16, %v1351_v57  ;;  %s4688_s4 = sld [smem:[#allocation6 + $0x2c]] }
  0x93   : > { %v1527_v14 = vstv %s6015_s22  ;;  %v1511_v24 = vmul.f32 %v5801_v13, %v1510_v63  ;;  %s4689_s8 = sld [smem:[#allocation6 + $0x4c]] }
  0x94   : > { %s4691_s24 = sld [smem:[#allocation6 + $0xd]] }
  0x95   : > { %v1336_v29 = vstv %s6024_s5  ;;  %s4690_s11 = sld [smem:[#allocation6 + $0x6c]] }
  0x96   : > { %v1531_v33 = vstv %s6030_s7  ;;  %s4692_s21 = sld [smem:[#allocation6 + $0x2d]] }
  0x97   : > { %v1532_v41 = vmul.f32 %v5809_v16, %v1531_v33  ;;  %s6107_s30 = sld [smem:[#allocation6 + $0x4d]] }
  0x98   : > { %v1840_v55 = vstv %s4688_s4  ;;  %s4702_s9 = sld [smem:[#allocation6 + $0x2e]] }
  0x99   : > { %s6109_s10 = sld [smem:[#allocation6 + $0xf]]  ;;  %v1841_v57 = vmul.f32 %v5786_v9, %v1840_v55 }
  0x9a   : > { %s6113_s2 = sld [smem:[#allocation6 + $0x2f]] }
  0x9b   : > { %s6115_s22 = sld [smem:[#allocation6 + $0x4e]]  ;;  %v1848_v63 = vstv %s4690_s11 }
  0x9c   : > { %s6120_s5 = sld [smem:[#allocation6 + $0x4f]] }
  0x9d   : > { %s4686_s7 = sld [smem:[#allocation7 + $0x3]] }
  0x9e   : > { %s6124_s1 = sld [smem:[#allocation6 + $0x6e]] }
  0x9f   : > { %s4722_s4 = sld [smem:[#allocation6 + $0x10]] }
  0xa0   : > { %s4726_s11 = sld [smem:[#allocation6 + $0x11]] }
 0x133   : > { %v382_v46 = vpop.f32.mrf.mxu0 }
 0x135   : > { %v5017_v54 = vpop.f32.mrf.mxu0 }
 0x136   : > { %v1520_v54 = vstv %s6005_s6  ;;  %s4701_s6 = sld [smem:[#allocation6 + $0xe]] }
 0x137   : > { %v455_v59 = vpop.f32.mrf.mxu1  ;;  %v1521_v0 = vmul.f32 %v1520_v54, %v5781_v8  ;;  %v1837_v54 = vstv %s4687_s25  ;;  %s6130_s25 = sld [smem:[#allocation6 + $0x6f]] }
 0x138   : > { %v456_v62 = vadd.f32 %v455_v59, %v382_v46  ;;  %v1507_v59 = vmul.f32 %v5786_v9, %v1506_v50 }
 0x139   : > { %v5024_v6 = vpop.f32.mrf.mxu1  ;;  %v1525_v30 = vadd.f32 %v1524_v5, %v1521_v0 }
 0x13a   : > { %5044 = vmatprep.subr.mxu1 %v456_v62  ;;  %v1508_v3 = vadd.f32 %v1507_v59, %v1504_v58  ;;  %v1844_v58 = vstv %s4689_s8  ;;  %v1855_v59 = vstv %s4691_s24  ;;  %s4723_s8 = sld [smem:[#allocation6 + $0x30]] }
 0x13b   : > { %v562_v17 = vpop.f32.mrf.mxu0  ;;  %5045 = vmatpush3.msra.mxu1 %v456_v62  ;;  %v1334_v62 = vmul.f32 %v5809_v16, %v1333_v51  ;;  %v1856_v0 = vmul.f32 %v1855_v59, %v5781_v8  ;;  %s4724_s24 = sld [smem:[#allocation6 + $0x50]] }
 0x13c   : > { %5047 = vmatmul.mubr.msk.f32.vlgmr.msra.gmra.mxu1 %vm639_vm7, %v5938_v7  ;;  %5056 = vmatprep.subr.mxu1 %v5581_v1  ;;  %v1512_v36 = vadd.f32 %v1511_v24, %v1508_v3  ;;  %v1849_v3 = vmul.f32 %v5809_v16, %v1848_v63  ;;  %v2035_v24 = vstv %s6109_s10  ;;  %s4737_s10 = sld [smem:[#allocation6 + $0x32]] }
 0x13d   : > { %v5031_v25 = vpop.f32.mrf.mxu0  ;;  %5057 = vmatpush3.msk.msra.mxu1 %vm5791_vm1, %v5583_v15  ;;  %5060 = vmatprep.mubr.msk.f32.mxu1 %vm5582_vm0, %v5581_v1  ;;  %v1335_v26 = vadd.f32 %v1334_v62, %v1331_v61  ;;  %v1845_v62 = vmul.f32 %v5801_v13, %v1844_v58 }
 0x13e   : > { %5058 = vmatprep.subr.mxu1 %v5581_v1 }
 0x13f   : > { %v635_v27 = vpop.f32.mrf.mxu1  ;;  %5059 = vmatpush3.msk.msra.mxu1 %vm5796_vm2, %v5583_v15  ;;  %v1337_v39 = vadd.f32 %v1336_v29, %v1335_v26 }
 0x140   : > { %v636_v28 = vadd.f32 %v635_v27, %v562_v17  ;;  %5061 = vmatmul.mubr.msk.f32.vlgmr.msra.gmra.mxu1 %vm312_vm5, %v823_v18  ;;  %5070 = vmatprep.subr.mxu1 %v5581_v1  ;;  %v1349_v18 = vadd.f32 %v1348_v53, %v1345_v56  ;;  %v1514_v27 = vstv %s6022_s27  ;;  %v1838_v56 = vmul.f32 %v1837_v54, %v5781_v8  ;;  %s6117_s27 = sld [smem:[#allocation6 + $0x6d]] }
 0x141   : > { %v5038_v31 = vpop.f32.mrf.mxu1  ;;  %5071 = vmatpush3.msk.msra.mxu1 %vm5791_vm1, %v5583_v15  ;;  %5074 = vmatprep.mubr.msk.f32.mxu1 %vm5582_vm0, %v5581_v1  ;;  %v1515_v37 = vmul.f32 %v5809_v16, %v1514_v27  ;;  %v1338_v47 = vmax.f32 %v1337_v39, 0.0  ;;  %v1851_v39 = vstv %s4686_s7  ;;  %s6219_s7 = sld [smem:[#allocation6 + $0x53]] }
 0x142   : > { %5039 = vmatprep.subr.mxu0 %v636_v28  ;;  %5072 = vmatprep.subr.mxu1 %v5581_v1  ;;  %v1528_v31 = vmul.f32 %v5801_v13, %v1527_v14  ;;  %v1353_v35 = vadd.f32 %v1352_v10, %v1349_v18  ;;  %v1842_v61 = vadd.f32 %v1841_v57, %v1838_v56  ;;  %v2021_v10 = vstv %s4702_s9  ;;  %s6207_s9 = sld [smem:[#allocation6 + $0x12]] }
 0x143   : > { %5040 = vmatpush3.msra.mxu0 %v636_v28  ;;  %5073 = vmatpush3.msk.msra.mxu1 %vm5796_vm2, %v5583_v15  ;;  %v1516_v45 = vadd.f32 %v1515_v37, %v1512_v36  ;;  %v2022_v27 = vmul.f32 %v5786_v9, %v2021_v10  ;;  %v2042_v37 = vstv %s6120_s5  ;;  %s6217_s5 = sld [smem:[#allocation6 + $0x71]] }
 0x144   : > { %5042 = vmatmul.mubr.msk.f32.vlgmr.msra.gmra.mxu0 %vm639_vm7, %v5959_v32  ;;  %5049 = vmatprep.subr.mxu0 %v5581_v1  ;;  %v1529_v40 = vadd.f32 %v1528_v31, %v1525_v30  ;;  %v1354_v44 = vadd.f32 %v1353_v35, %v1336_v29  ;;  %v1846_v18 = vadd.f32 %v1845_v62, %v1842_v61  ;;  %v2025_v30 = vstv %s6115_s22  ;;  %s6211_s22 = sld [smem:[#allocation6 + $0x33]] }
 0x145   : > { %5050 = vmatpush3.msk.msra.mxu0 %vm5815_vm3, %v5583_v15  ;;  %5053 = vmatprep.mubr.msk.f32.mxu0 %vm5582_vm0, %v5581_v1  ;;  %v1517_v50 = vadd.f32 %v1516_v45, %v1336_v29 }
 0x146   : > { %5051 = vmatprep.subr.mxu0 %v5581_v1  ;;  %5075 = vmatmul.mubr.msk.f32.vlgmr.msra.gmra.mxu1 %vm312_vm5, %v1003_v4  ;;  %v1533_v48 = vadd.f32 %v1532_v41, %v1529_v40  ;;  %v1355_v49 = vmax.f32 %v1354_v44, 0.0  ;;  %v1850_v36 = vadd.f32 %v1849_v3, %v1846_v18  ;;  %v2026_v41 = vmul.f32 %v5801_v13, %v2025_v30 }
 0x147   : > { %5052 = vmatpush3.msk.msra.mxu0 %vm5821_vm4, %v5583_v15  ;;  %5084 = vmatprep.mubr.msk.f32.mxu1 %vm639_vm7, %v5889_v22 }
 0x148   : > { %5054 = vmatmul.mubr.msk.f32.vlgmr.msra.gmra.mxu0 %vm312_vm5, %v840_v21  ;;  %5063 = vmatprep.subr.mxu0 %v5581_v1  ;;  %v1534_v51 = vadd.f32 %v1533_v48, %v1336_v29 }
 0x149   : > { %5064 = vmatpush3.msk.msra.mxu0 %vm5815_vm3, %v5583_v15  ;;  %5067 = vmatprep.mubr.msk.f32.mxu0 %vm5582_vm0, %v5581_v1 }
 0x14a   : > { %5065 = vmatprep.subr.mxu0 %v5581_v1  ;;  %v1535_v53 = vmax.f32 %v1534_v51, 0.0  ;;  %v1852_v51 = vadd.f32 %v1851_v39, %v1850_v36  ;;  %v2533_v36 = vstv %s6207_s9  ;;  %s6316_s9 = sld [smem:[#allocation6 + $0x55]] }
 0x14b   : > { %5066 = vmatpush3.msk.msra.mxu0 %vm5821_vm4, %v5583_v15 }
 0x14c   : > { %5068 = vmatmul.mubr.msk.f32.vlgmr.msra.gmra.mxu0 %vm312_vm5, %v1020_v34 }
 0x14d   : > { %5079 = vmatprep.mubr.msk.f32.mxu0 %vm639_vm7, %v5896_v23 }
 0x1fc   : > { %v5048_v42 = vpop.f32.mrf.mxu1 }
 0x1fe   : > { %v793_v46 = vpop.f32.mrf.mxu1 }
 0x200   : > { %v983_v52 = vpop.f32.mrf.mxu1 }
 0x202   : > { %v5062_v60 = vpop.f32.mrf.mxu1 }
 0x203   : > { %v1858_v60 = vstv %s4692_s21  ;;  %s6203_s21 = sld [smem:[#allocation6 + $0x70]] }
 0x204   : > { %v5043_v6 = vpop.f32.mrf.mxu0  ;;  %v1859_v5 = vmul.f32 %v5786_v9, %v1858_v60  ;;  %v1853_v60 = vmax.f32 %v1852_v51, 0.0 }
 0x205   : > { %v799_v17 = vadd.f32 %v5048_v42, %v5043_v6  ;;  %v2018_v6 = vstv %s4701_s6  ;;  %s6205_s6 = sld [smem:[#allocation6 + $0x51]] }
 0x206   : > { %v712_v2 = vpop.f32.mrf.mxu0  ;;  %v1163_v25 = vpop.f32.mrf.mxu1  ;;  %v2019_v26 = vmul.f32 %v2018_v6, %v5781_v8 }
 0x207   : > { %804 = vst.msk [vmem:[%s6044_s23 + $0x8] sm:$0xff] %vm802_vm11, %v799_v17  ;;  %v794_v28 = vadd.f32 %v793_v46, %v712_v2  ;;  %v1862_v17 = vstv %s6107_s30  ;;  %v2038_v2 = vstv %s6113_s2  ;;  %s4727_s30 = sld [smem:[#allocation6 + $0x31]] }
 0x208   : > { %v910_v4 = vpop.f32.mrf.mxu0  ;;  %v5076_v21 = vpop.f32.mrf.mxu1  ;;  %v1863_v29 = vmul.f32 %v5801_v13, %v1862_v17  ;;  %v2039_v33 = vmul.f32 %v5786_v9, %v2038_v2  ;;  %v2023_v40 = vadd.f32 %v2022_v27, %v2019_v26  ;;  %v2352_v2 = vstv %s4722_s4  ;;  %s6209_s2 = sld [smem:[#allocation6 + $0x13]] }
 0x209   : > { %803 = vst.msk [vmem:[%s6044_s23] sm:$0xff] %vm802_vm11, %v794_v28  ;;  %v984_v34 = vadd.f32 %v983_v52, %v910_v4  ;;  %v1518_v52 = vmax.f32 %v1517_v50, 0.0  ;;  %v1860_v28 = vadd.f32 %v1859_v5, %v1856_v0  ;;  %v1866_v4 = vstv %s6117_s27  ;;  %s6215_s27 = sld [smem:[#allocation6 + $0x52]] }
 0x20a   : > { %v5055_v38 = vpop.f32.mrf.mxu0  ;;  %v2036_v21 = vmul.f32 %v2035_v24, %v5781_v8  ;;  %v1867_v45 = vmul.f32 %v5809_v16, %v1866_v4  ;;  %v2027_v54 = vadd.f32 %v2026_v41, %v2023_v40  ;;  %v2353_v26 = vmul.f32 %v2352_v2, %v5781_v8  ;;  %s6233_s4 = sld [smem:[#allocation6 + $0x73]] }
 0x20b   : > { %5082 = vmatprep.subr.mxu1 %v984_v34  ;;  %v1864_v44 = vadd.f32 %v1863_v29, %v1860_v28  ;;  %v2359_v28 = vstv %s4724_s24  ;;  %v2370_v29 = vstv %s4726_s11  ;;  %v2553_v41 = vstv %s6211_s22  ;;  %s4758_s24 = sld [smem:[#allocation6 + $0x34]] }
 0x20c   : > { %v1090_v42 = vpop.f32.mrf.mxu0  ;;  %5083 = vmatpush3.msra.mxu1 %v984_v34  ;;  %v2040_v48 = vadd.f32 %v2039_v33, %v2036_v21  ;;  %v2360_v4 = vmul.f32 %v5801_v13, %v2359_v28  ;;  %v2363_v21 = vstv %s6203_s21  ;;  %s4759_s11 = sld [smem:[#allocation6 + $0x54]] }
 0x20d   : > { %v1164_v43 = vadd.f32 %v1163_v25, %v1090_v42  ;;  %5085 = vmatmul.mubr.msk.f32.vlgmr.msra.gmra.mxu1 %vm639_vm7, %v5938_v7  ;;  %5094 = vmatprep.subr.mxu1 %v5581_v1  ;;  %v1868_v56 = vadd.f32 %v1867_v45, %v1864_v44  ;;  %v2373_v30 = vstv %s4727_s30  ;;  %v2534_v44 = vmul.f32 %v2533_v36, %v5781_v8  ;;  %s4761_s21 = sld [smem:[#allocation6 + $0x15]] }
 0x20e   : > { %v5069_v46 = vpop.f32.mrf.mxu0  ;;  %5095 = vmatpush3.msk.msra.mxu1 %vm5791_vm1, %v5583_v15  ;;  %5098 = vmatprep.mubr.msk.f32.mxu1 %vm5582_vm0, %v5581_v1  ;;  %v2550_v40 = vstv %s6209_s2  ;;  %s6314_s30 = sld [smem:[#allocation6 + $0x74]] }
 0x20f   : > { %5077 = vmatprep.subr.mxu0 %v1164_v43  ;;  %5096 = vmatprep.subr.mxu1 %v5581_v1  ;;  %v2029_v46 = vstv %s6124_s1  ;;  %v1869_v5 = vadd.f32 %v1868_v56, %v1851_v39  ;;  %s6221_s1 = sld [smem:[#allocation7 + $0x4]]  ;;  %v2551_v51 = vmul.f32 %v2550_v40, %v5781_v8 }
 0x210   : > { %5078 = vmatpush3.msra.mxu0 %v1164_v43  ;;  %5097 = vmatpush3.msk.msra.mxu1 %vm5796_vm2, %v5583_v15  ;;  %v2030_v55 = vmul.f32 %v5809_v16, %v2029_v46  ;;  %s6320_s2 = sld [smem:[#allocation6 + $0x36]] }
 0x211   : > { %5080 = vmatmul.mubr.msk.f32.vlgmr.msra.gmra.mxu0 %vm639_vm7, %v5959_v32  ;;  %5087 = vmatprep.subr.mxu0 %v5581_v1  ;;  %v1870_v17 = vmax.f32 %v1869_v5, 0.0  ;;  %v6251_v5 = vld [vmem:[%s5747_s20 + $0x10] sm:$0xff]  ;;  %s6322_s22 = sld [smem:[#allocation6 + $0x17]] }
 0x212   : > { %5088 = vmatpush3.msk.msra.mxu0 %vm5815_vm3, %v5583_v15  ;;  %5099 = vmatmul.mubr.msk.f32.vlgmr.msra.gmra.mxu1 %vm312_vm5, %v1338_v47  ;;  %v2031_v63 = vadd.f32 %v2030_v55, %v2027_v54  ;;  %v2557_v55 = vstv %s6219_s7  ;;  %s6336_s7 = sld [smem:[#allocation6 + $0x75]] }
 0x213   : > { %5089 = vmatprep.subr.mxu0 %v5581_v1  ;;  %5108 = vmatprep.subr.mxu1 %v5581_v1 }
 0x214   : > { %5090 = vmatpush3.msk.msra.mxu0 %vm5821_vm4, %v5583_v15  ;;  %5091 = vmatprep.mubr.msk.f32.mxu0 %vm5582_vm0, %v5581_v1 }
 0x215   : > { %5109 = vmatpush3.msk.msra.mxu1 %vm5791_vm1, %v5583_v15  ;;  %5092 = vmatmul.mubr.msk.f32.vlgmr.msra.gmra.mxu0 %vm312_vm5, %v1355_v49  ;;  %v2043_v49 = vmul.f32 %v5801_v13, %v2042_v37  ;;  %v2536_v37 = vstv %s4737_s10  ;;  %s6318_s10 = sld [smem:[#allocation6 + $0x16]] }
 0x216   : > { %5101 = vmatprep.subr.mxu0 %v5581_v1  ;;  %5110 = vmatprep.subr.mxu1 %v5581_v1  ;;  %v2537_v45 = vmul.f32 %v5786_v9, %v2536_v37 }
 0x217   : > { %5102 = vmatpush3.msk.msra.mxu0 %vm5815_vm3, %v5583_v15  ;;  %5111 = vmatpush3.msk.msra.mxu1 %vm5796_vm2, %v5583_v15  ;;  %v2044_v58 = vadd.f32 %v2043_v49, %v2040_v48  ;;  %v2540_v49 = vstv %s6215_s27  ;;  %s6324_s27 = sld [smem:[#allocation6 + $0x37]] }
 0x218   : > { %5112 = vmatprep.mubr.msk.f32.mxu1 %vm5582_vm0, %v5581_v1  ;;  %5103 = vmatprep.subr.mxu0 %v5581_v1 }
 0x219   : > { %5113 = vmatmul.mubr.msk.f32.vlgmr.msra.gmra.mxu1 %vm312_vm5, %v1518_v52  ;;  %5104 = vmatpush3.msk.msra.mxu0 %vm5821_vm4, %v5583_v15  ;;  %v2046_v52 = vstv %s6130_s25  ;;  %s6228_s25 = sld [smem:[#allocation6 + $0x72]] }
 0x21a   : > { %5105 = vmatprep.mubr.msk.f32.mxu0 %vm5582_vm0, %v5581_v1  ;;  %5122 = vmatprep.mubr.msk.f32.mxu1 %vm639_vm7, %v5889_v22  ;;  %v2047_v59 = vmul.f32 %v5809_v16, %v2046_v52  ;;  %v2554_v52 = vmul.f32 %v5786_v9, %v2553_v41  ;;  %v2870_v41 = vstv %s4758_s24  ;;  %s4793_s24 = sld [smem:[#allocation6 + $0x38]] }
 0x21b   : > { %5106 = vmatmul.mubr.msk.f32.vlgmr.msra.gmra.mxu0 %vm312_vm5, %v1535_v53 }
 0x21c   : > { %5117 = vmatprep.mubr.msk.f32.mxu0 %vm639_vm7, %v5896_v23  ;;  %v2048_v10 = vadd.f32 %v2047_v59, %v2044_v58  ;;  %v2538_v58 = vadd.f32 %v2537_v45, %v2534_v44  ;;  %v2541_v59 = vmul.f32 %v5801_v13, %v2540_v49  ;;  %v6331_v44 = vld [vmem:[%s5747_s20 + $0x8] sm:$0xff] }
 0x21d   : > { %v2871_v45 = vmul.f32 %v6331_v44, %v2870_v41 }
 0x21e   : > { %v2049_v18 = vadd.f32 %v2048_v10, %v1851_v39 }
 0x220   : > { %v2050_v24 = vmax.f32 %v2049_v18, 0.0  ;;  %v2542_v18 = vadd.f32 %v2541_v59, %v2538_v58  ;;  %v3065_v58 = vstv %s6322_s22  ;;  %v3068_v59 = vstv %s6324_s27  ;;  %s6434_s22 = sld [smem:[#allocation6 + $0x1b]] }
 0x221   : > { %s6436_s27 = sld [smem:[#allocation6 + $0x3b]] }
 0x2cd   : > { %v5086_v14 = vpop.f32.mrf.mxu1 }
 0x2cf   : > { %v1308_v25 = vpop.f32.mrf.mxu1 }
 0x2d1   : > { %v5081_v31 = vpop.f32.mrf.mxu0 }
 0x2d2   : > { %v1314_v34 = vadd.f32 %v5086_v14, %v5081_v31  ;;  %v1498_v35 = vpop.f32.mrf.mxu1  ;;  %v2032_v14 = vadd.f32 %v2031_v63, %v1851_v39 }
 0x2d3   : > { %v1233_v38 = vpop.f32.mrf.mxu0 }
 0x2d4   : > { %4650 = vst.msk [vmem:[%s6044_s23 + $0x18] sm:$0xff] %vm802_vm11, %v1314_v34  ;;  %v1309_v42 = vadd.f32 %v1308_v25, %v1233_v38  ;;  %v5100_v43 = vpop.f32.mrf.mxu1  ;;  %v2033_v3 = vmax.f32 %v2032_v14, 0.0  ;;  %v2355_v25 = vstv %s4723_s8  ;;  %v2371_v34 = vmul.f32 %v2370_v29, %v5781_v8  ;;  %s4757_s8 = sld [smem:[#allocation6 + $0x14]] }
 0x2d5   : > { %v1425_v47 = vpop.f32.mrf.mxu0  ;;  %v2356_v27 = vmul.f32 %v5786_v9, %v2355_v25  ;;  %v2377_v38 = vstv %s6205_s6  ;;  %v2364_v43 = vmul.f32 %v5809_v16, %v2363_v21  ;;  %v2544_v8 = vstv %s6228_s25  ;;  %s4762_s6 = sld [smem:[#allocation6 + $0x35]] }
 0x2d6   : > { %4649 = vst.msk [vmem:[%s6044_s23 + $0x10] sm:$0xff] %vm802_vm11, %v1309_v42  ;;  %v1499_v50 = vadd.f32 %v1498_v35, %v1425_v47  ;;  %v2374_v35 = vmul.f32 %v5786_v9, %v2373_v30  ;;  %v2378_v48 = vmul.f32 %v5801_v13, %v2377_v38  ;;  %v2561_v14 = vstv %s6233_s4  ;;  %s6340_s25 = sld [smem:[#allocation7 + $0x5]] }
 0x2d7   : > { %v5093_v53 = vpop.f32.mrf.mxu0  ;;  %v2357_v31 = vadd.f32 %v2356_v27, %v2353_v26  ;;  %s6353_s4 = sld [smem:[#allocation6 + $0x77]] }
 0x2d8   : > { %5120 = vmatprep.subr.mxu1 %v1499_v50  ;;  %v2375_v47 = vadd.f32 %v2374_v35, %v2371_v34 }
 0x2d9   : > { %v1678_v57 = vpop.f32.mrf.mxu1  ;;  %5121 = vmatpush3.msra.mxu1 %v1499_v50  ;;  %v2361_v42 = vadd.f32 %v2360_v4, %v2357_v31  ;;  %v2381_v50 = vstv %s6217_s5  ;;  %s6334_s5 = sld [smem:[#allocation6 + $0x56]] }
 0x2da   : > { %5123 = vmatmul.mubr.msk.f32.vlgmr.msra.gmra.mxu1 %vm639_vm7, %v5938_v7  ;;  %5132 = vmatprep.subr.mxu1 %v5581_v1  ;;  %v2382_v63 = vmul.f32 %v5809_v16, %v2381_v50  ;;  %v2867_v40 = vstv %s4757_s8  ;;  %s4792_s8 = sld [smem:[#allocation6 + $0x18]] }
 0x2db   : > { %v1605_v61 = vpop.f32.mrf.mxu0  ;;  %v5114_v62 = vpop.f32.mrf.mxu1  ;;  %5133 = vmatpush3.msk.msra.mxu1 %vm5791_vm1, %v5583_v15  ;;  %5136 = vmatprep.mubr.msk.f32.mxu1 %vm5582_vm0, %v5581_v1 }
 0x2dc   : > { %v1679_v0 = vadd.f32 %v1678_v57, %v1605_v61  ;;  %5134 = vmatprep.subr.mxu1 %v5581_v1  ;;  %v2365_v57 = vadd.f32 %v2364_v43, %v2361_v42  ;;  %v2366_v61 = vstv %s6221_s1  ;;  %v2379_v62 = vadd.f32 %v2378_v48, %v2375_v47  ;;  %v6327_v42 = vld [vmem:[%s5747_s20] sm:$0xff]  ;;  %s6338_s1 = sld [smem:[#allocation6 + $0x57]] }
 0x2dd   : > { %v5107_v6 = vpop.f32.mrf.mxu0  ;;  %5135 = vmatpush3.msk.msra.mxu1 %vm5796_vm2, %v5583_v15  ;;  %v2868_v43 = vmul.f32 %v6327_v42, %v2867_v40  ;;  %v2885_v47 = vstv %s4761_s21  ;;  %v2888_v48 = vstv %s4762_s6  ;;  %s4796_s21 = sld [smem:[#allocation6 + $0x19]] }
 0x2de   : > { %5115 = vmatprep.subr.mxu0 %v1679_v0  ;;  %5137 = vmatmul.mubr.msk.f32.vlgmr.msra.gmra.mxu1 %vm312_vm5, %v1853_v60  ;;  %v2558_v6 = vmul.f32 %v6251_v5, %v2557_v55  ;;  %v2383_v2 = vadd.f32 %v2382_v63, %v2379_v62  ;;  %v3051_v55 = vstv %s6320_s2  ;;  %s4797_s6 = sld [smem:[#allocation6 + $0x39]] }
 0x2df   : > { %5116 = vmatpush3.msra.mxu0 %v1679_v0  ;;  %5146 = vmatprep.subr.mxu1 %v5581_v1  ;;  %v2555_v0 = vadd.f32 %v2554_v52, %v2551_v51  ;;  %v2872_v49 = vadd.f32 %v2871_v45, %v2868_v43  ;;  %v2878_v51 = vstv %s6314_s30  ;;  %v2886_v52 = vmul.f32 %v6327_v42, %v2885_v47  ;;  %s6428_s30 = sld [smem:[#allocation6 + $0x78]] }
 0x2e0   : > { %5118 = vmatmul.mubr.msk.f32.vlgmr.msra.gmra.mxu0 %vm639_vm7, %v5959_v32  ;;  %5125 = vmatprep.subr.mxu0 %v5581_v1  ;;  %v2384_v21 = vadd.f32 %v2383_v2, %v2366_v61  ;;  %s4807_s2 = sld [smem:[#allocation6 + $0x3a]] }
 0x2e1   : > { %5126 = vmatpush3.msk.msra.mxu0 %vm5815_vm3, %v5583_v15  ;;  %5129 = vmatprep.mubr.msk.f32.mxu0 %vm5582_vm0, %v5581_v1  ;;  %v2559_v26 = vadd.f32 %v2558_v6, %v2555_v0  ;;  %v3055_v6 = vstv %s6334_s5  ;;  %s6440_s5 = sld [smem:[#allocation6 + $0x5a]] }
 0x2e2   : > { %5127 = vmatprep.subr.mxu0 %v5581_v1  ;;  %5147 = vmatpush3.msk.msra.mxu1 %vm5791_vm1, %v5583_v15  ;;  %v2385_v36 = vmax.f32 %v2384_v21, 0.0 }
 0x2e3   : > { %5128 = vmatpush3.msk.msra.mxu0 %vm5821_vm4, %v5583_v15  ;;  %5148 = vmatprep.subr.mxu1 %v5581_v1 }
 0x2e4   : > { %5130 = vmatmul.mubr.msk.f32.vlgmr.msra.gmra.mxu0 %vm312_vm5, %v1870_v17  ;;  %5139 = vmatprep.subr.mxu0 %v5581_v1  ;;  %v2367_v17 = vadd.f32 %v2366_v61, %v2365_v57  ;;  %v2892_v57 = vstv %s6316_s9  ;;  %s6430_s9 = sld [smem:[#allocation6 + $0x59]] }
 0x2e5   : > { %5140 = vmatpush3.msk.msra.mxu0 %vm5815_vm3, %v5583_v15  ;;  %5149 = vmatpush3.msk.msra.mxu1 %vm5796_vm2, %v5583_v15  ;;  %v2893_v0 = vmul.f32 %v6251_v5, %v2892_v57 }
 0x2e6   : > { %5150 = vmatprep.mubr.msk.f32.mxu1 %vm5582_vm0, %v5581_v1  ;;  %5141 = vmatprep.subr.mxu0 %v5581_v1  ;;  %v2368_v30 = vmax.f32 %v2367_v17, 0.0  ;;  %v3069_v17 = vmul.f32 %v6331_v44, %v3068_v59 }
 0x2e7   : > { %5151 = vmatmul.mubr.msk.f32.vlgmr.msra.gmra.mxu1 %vm312_vm5, %v2033_v3  ;;  %5142 = vmatpush3.msk.msra.mxu0 %vm5821_vm4, %v5583_v15  ;;  %v6258_v3 = vld [vmem:[%s5747_s20 + $0x18] sm:$0xff]  ;;  %s6348_s20 = sld [smem:[#allocation6 + $0x76]] }
 0x2e8   : > { %5143 = vmatprep.mubr.msk.f32.mxu0 %vm5582_vm0, %v5581_v1  ;;  %5160 = vmatprep.mubr.msk.f32.mxu1 %vm639_vm7, %v5889_v22  ;;  %v2545_v16 = vmul.f32 %v6258_v3, %v2544_v8  ;;  %v2562_v27 = vmul.f32 %v6258_v3, %v2561_v14  ;;  %v2879_v62 = vmul.f32 %v6258_v3, %v2878_v51  ;;  %v2896_v14 = vstv %s6336_s7  ;;  %s6442_s7 = sld [smem:[#allocation6 + $0x79]] }
 0x2e9   : > { %5144 = vmatmul.mubr.msk.f32.vlgmr.msra.gmra.mxu0 %vm312_vm5, %v2050_v24  ;;  %v3052_v8 = vmul.f32 %v6331_v44, %v3051_v55 }
 0x2ea   : > { %5155 = vmatprep.mubr.msk.f32.mxu0 %vm639_vm7, %v5896_v23  ;;  %v2546_v31 = vadd.f32 %v2545_v16, %v2542_v18  ;;  %v2563_v34 = vadd.f32 %v2562_v27, %v2559_v26  ;;  %v3072_v16 = vstv %s6338_s1  ;;  %v3056_v27 = vmul.f32 %v6251_v5, %v3055_v6  ;;  %s6444_s1 = sld [smem:[#allocation6 + $0x5b]] }
 0x2eb   : > { %v3403_v6 = vstv %s4797_s6  ;;  %s4832_s6 = sld [smem:[#allocation6 + $0x3d]] }
 0x2ec   : > { %v2547_v35 = vadd.f32 %v2546_v31, %v2366_v61  ;;  %v2564_v37 = vadd.f32 %v2563_v34, %v2366_v61  ;;  %v2897_v31 = vmul.f32 %v6258_v3, %v2896_v14  ;;  %v3073_v34 = vmul.f32 %v6251_v5, %v3072_v16 }
 0x2ee   : > { %v2548_v38 = vmax.f32 %v2547_v35, 0.0 }
 0x39a   : > { %v5124_v33 = vpop.f32.mrf.mxu1 }
 0x39c   : > { %v1823_v39 = vpop.f32.mrf.mxu1 }
 0x39e   : > { %v2013_v46 = vpop.f32.mrf.mxu1 }
 0x3a0   : > { %v5119_v53 = vpop.f32.mrf.mxu0  ;;  %v5138_v54 = vpop.f32.mrf.mxu1 }
 0x3a1   : > { %v1829_v56 = vadd.f32 %v5124_v33, %v5119_v53  ;;  %v2889_v53 = vmul.f32 %v6331_v44, %v2888_v48  ;;  %v3048_v54 = vstv %s6318_s10  ;;  %s6432_s10 = sld [smem:[#allocation6 + $0x1a]] }
 0x3a2   : > { %v1748_v60 = vpop.f32.mrf.mxu0  ;;  %v3049_v63 = vmul.f32 %v6327_v42, %v3048_v54 }
 0x3a3   : > { %4685 = vst.msk [vmem:[%s6044_s23 + $0x28] sm:$0xff] %vm802_vm11, %v1829_v56  ;;  %v1824_v9 = vadd.f32 %v1823_v39, %v1748_v60  ;;  %v2565_v39 = vmax.f32 %v2564_v37, 0.0 }
 0x3a4   : > { %v1940_v10 = vpop.f32.mrf.mxu0  ;;  %v3053_v26 = vadd.f32 %v3052_v8, %v3049_v63 }
 0x3a5   : > { %4684 = vst.msk [vmem:[%s6044_s23 + $0x20] sm:$0xff] %vm802_vm11, %v1824_v9  ;;  %v2014_v13 = vadd.f32 %v2013_v46, %v1940_v10  ;;  %v2874_v46 = vstv %s4759_s11  ;;  %v2890_v9 = vadd.f32 %v2889_v53, %v2886_v52  ;;  %s4794_s11 = sld [smem:[#allocation6 + $0x58]] }
 0x3a6   : > { %v5131_v24 = vpop.f32.mrf.mxu0  ;;  %v2875_v50 = vmul.f32 %v6251_v5, %v2874_v46 }
 0x3a7   : > { %v2193_v25 = vpop.f32.mrf.mxu1  ;;  %5158 = vmatprep.subr.mxu1 %v2014_v13  ;;  %v3563_v16 = vstv %s6432_s10  ;;  %s6537_s10 = sld [smem:[#allocation6 + $0x1e]] }
 0x3a8   : > { %5159 = vmatpush3.msra.mxu1 %v2014_v13  ;;  %v2876_v61 = vadd.f32 %v2875_v50, %v2872_v49  ;;  %v3066_v13 = vmul.f32 %v6327_v42, %v3065_v58 }
 0x3a9   : > { %v2120_v28 = vpop.f32.mrf.mxu0  ;;  %v5152_v29 = vpop.f32.mrf.mxu1  ;;  %5161 = vmatmul.mubr.msk.f32.vlgmr.msra.gmra.mxu1 %vm639_vm7, %v5938_v7  ;;  %5170 = vmatprep.subr.mxu1 %v5581_v1 }
 0x3aa   : > { %v2194_v4 = vadd.f32 %v2193_v25, %v2120_v28  ;;  %5171 = vmatpush3.msk.msra.mxu1 %vm5791_vm1, %v5583_v15  ;;  %5174 = vmatprep.mubr.msk.f32.mxu1 %vm5582_vm0, %v5581_v1  ;;  %v2880_v25 = vadd.f32 %v2879_v62, %v2876_v61  ;;  %v2881_v29 = vstv %s6340_s25  ;;  %v3382_v61 = vstv %s4792_s8  ;;  %s6446_s25 = sld [smem:[#allocation7 + $0x6]] }
 0x3ab   : > { %v5145_v33 = vpop.f32.mrf.mxu0  ;;  %5172 = vmatprep.subr.mxu1 %v5581_v1  ;;  %v3385_v62 = vstv %s4793_s24  ;;  %v3383_v63 = vmul.f32 %v6327_v42, %v3382_v61  ;;  %s4827_s8 = sld [smem:[#allocation6 + $0x1c]] }
 0x3ac   : > { %5153 = vmatprep.subr.mxu0 %v2194_v4  ;;  %5173 = vmatpush3.msk.msra.mxu1 %vm5796_vm2, %v5583_v15  ;;  %v3070_v33 = vadd.f32 %v3069_v17, %v3066_v13  ;;  %v3386_v8 = vmul.f32 %v6331_v44, %v3385_v62  ;;  %v3393_v13 = vstv %s6428_s30  ;;  %s4828_s24 = sld [smem:[#allocation6 + $0x3c]] }
 0x3ad   : > { %5154 = vmatpush3.msra.mxu0 %v2194_v4  ;;  %5175 = vmatmul.mubr.msk.f32.vlgmr.msra.gmra.mxu1 %vm312_vm5, %v2368_v30  ;;  %v2894_v30 = vadd.f32 %v2893_v0, %v2890_v9  ;;  %v3059_v4 = vstv %s6348_s20  ;;  %v3389_v9 = vstv %s4794_s11  ;;  %v3400_v0 = vstv %s4796_s21  ;;  %s6453_s20 = sld [smem:[#allocation6 + $0x7a]] }
 0x3ae   : > { %5156 = vmatmul.mubr.msk.f32.vlgmr.msra.gmra.mxu0 %vm639_vm7, %v5959_v32  ;;  %5163 = vmatprep.subr.mxu0 %v5581_v1  ;;  %v3060_v40 = vmul.f32 %v6258_v3, %v3059_v4  ;;  %v3074_v46 = vadd.f32 %v3073_v34, %v3070_v33  ;;  %v3390_v14 = vmul.f32 %v6251_v5, %v3389_v9  ;;  %v3570_v34 = vstv %s6440_s5  ;;  %s4829_s11 = sld [smem:[#allocation6 + $0x5c]] }
 0x3af   : > { %5164 = vmatpush3.msk.msra.mxu0 %vm5815_vm3, %v5583_v15  ;;  %5184 = vmatprep.subr.mxu1 %v5581_v1  ;;  %v2898_v43 = vadd.f32 %v2897_v31, %v2894_v30  ;;  %v3401_v17 = vmul.f32 %v6327_v42, %v3400_v0  ;;  %v3394_v30 = vmul.f32 %v6258_v3, %v3393_v13  ;;  %s4831_s21 = sld [smem:[#allocation6 + $0x1d]] }
 0x3b0   : > { %5165 = vmatprep.subr.mxu0 %v5581_v1  ;;  %5167 = vmatprep.mubr.msk.f32.mxu0 %vm5582_vm0, %v5581_v1  ;;  %v3564_v31 = vmul.f32 %v6327_v42, %v3563_v16  ;;  %s6533_s30 = sld [smem:[#allocation6 + $0x7c]] }
 0x3b1   : > { %5166 = vmatpush3.msk.msra.mxu0 %vm5821_vm4, %v5583_v15  ;;  %5185 = vmatpush3.msk.msra.mxu1 %vm5791_vm1, %v5583_v15  ;;  %v2899_v53 = vadd.f32 %v2898_v43, %v2881_v29  ;;  %s6545_s5 = sld [smem:[#allocation6 + $0x5e]] }
 0x3b2   : > { %5168 = vmatmul.mubr.msk.f32.vlgmr.msra.gmra.mxu0 %vm312_vm5, %v2385_v36  ;;  %5177 = vmatprep.subr.mxu0 %v5581_v1  ;;  %v3076_v36 = vstv %s6353_s4  ;;  %s6458_s4 = sld [smem:[#allocation6 + $0x7b]] }
 0x3b3   : > { %5186 = vmatprep.subr.mxu1 %v5581_v1  ;;  %5178 = vmatpush3.msk.msra.mxu0 %vm5815_vm3, %v5583_v15  ;;  %v3077_v47 = vmul.f32 %v6258_v3, %v3076_v36  ;;  %v2900_v57 = vmax.f32 %v2899_v53, 0.0  ;;  %v3411_v36 = vstv %s6442_s7  ;;  %s6547_s7 = sld [smem:[#allocation6 + $0x7d]] }
 0x3b4   : > { %5187 = vmatpush3.msk.msra.mxu1 %vm5796_vm2, %v5583_v15  ;;  %5188 = vmatprep.mubr.msk.f32.mxu1 %vm5582_vm0, %v5581_v1 }
 0x3b5   : > { %5179 = vmatprep.subr.mxu0 %v5581_v1  ;;  %5189 = vmatmul.mubr.msk.f32.vlgmr.msra.gmra.mxu1 %vm312_vm5, %v2548_v38  ;;  %v2882_v38 = vadd.f32 %v2881_v29, %v2880_v25  ;;  %v3078_v55 = vadd.f32 %v3077_v47, %v3074_v46  ;;  %v3407_v25 = vstv %s6430_s9  ;;  %v3571_v47 = vmul.f32 %v6251_v5, %v3570_v34  ;;  %s6535_s9 = sld [smem:[#allocation6 + $0x5d]] }
 0x3b6   : > { %5180 = vmatpush3.msk.msra.mxu0 %vm5821_vm4, %v5583_v15  ;;  %5181 = vmatprep.mubr.msk.f32.mxu0 %vm5582_vm0, %v5581_v1  ;;  %v3408_v33 = vmul.f32 %v6251_v5, %v3407_v25  ;;  %v3918_v34 = vstv %s4832_s6 }
 0x3b7   : > { %5182 = vmatmul.mubr.msk.f32.vlgmr.msra.gmra.mxu0 %vm312_vm5, %v2565_v39  ;;  %5198 = vmatprep.mubr.msk.f32.mxu1 %vm639_vm7, %v5889_v22  ;;  %v3057_v39 = vadd.f32 %v3056_v27, %v3053_v26  ;;  %v2883_v50 = vmax.f32 %v2882_v38, 0.0  ;;  %v3079_v58 = vadd.f32 %v3078_v55, %v2881_v29  ;;  %v3580_v26 = vstv %s6434_s22  ;;  %s6539_s22 = sld [smem:[#allocation6 + $0x1f]] }
 0x3b8   : > { %5193 = vmatprep.mubr.msk.f32.mxu0 %vm639_vm7, %v5896_v23  ;;  %v3583_v27 = vstv %s6436_s27  ;;  %s6541_s27 = sld [smem:[#allocation6 + $0x3f]] }
 0x3b9   : > { %v3061_v51 = vadd.f32 %v3060_v40, %v3057_v39  ;;  %v3584_v38 = vmul.f32 %v6331_v44, %v3583_v27  ;;  %v3587_v40 = vstv %s6444_s1  ;;  %s6549_s1 = sld [smem:[#allocation6 + $0x5f]] }
 0x3ba   : > { %v3588_v55 = vmul.f32 %v6251_v5, %v3587_v40  ;;  %v4078_v40 = vstv %s6537_s10 }
 0x469   : > { %v5162_v56 = vpop.f32.mrf.mxu1 }
 0x46b   : > { %v2338_v60 = vpop.f32.mrf.mxu1 }
 0x46d   : > { %v2528_v10 = vpop.f32.mrf.mxu1 }
 0x46e   : > { %v5157_v18 = vpop.f32.mrf.mxu0 }
 0x46f   : > { %v2344_v24 = vadd.f32 %v5162_v56, %v5157_v18  ;;  %v5176_v2 = vpop.f32.mrf.mxu1  ;;  %v3062_v56 = vadd.f32 %v3061_v51, %v2881_v29  ;;  %v3404_v18 = vmul.f32 %v6331_v44, %v3403_v6  ;;  %v3412_v51 = vmul.f32 %v6258_v3, %v3411_v36 }
 0x470   : > { %v2263_v28 = vpop.f32.mrf.mxu0 }
 0x471   : > { %4720 = vst.msk [vmem:[%s6044_s23 + $0x38] sm:$0xff] %vm802_vm11, %v2344_v24  ;;  %v2339_v21 = vadd.f32 %v2338_v60, %v2263_v28  ;;  %v3063_v59 = vmax.f32 %v3062_v56, 0.0  ;;  %v3080_v60 = vmax.f32 %v3079_v58, 0.0  ;;  %v3566_v24 = vstv %s4807_s2  ;;  %s4842_s2 = sld [smem:[#allocation6 + $0x3e]] }
 0x472   : > { %v2455_v35 = vpop.f32.mrf.mxu0  ;;  %v3567_v4 = vmul.f32 %v6331_v44, %v3566_v24 }
 0x473   : > { %4719 = vst.msk [vmem:[%s6044_s23 + $0x30] sm:$0xff] %vm802_vm11, %v2339_v21  ;;  %v2529_v37 = vadd.f32 %v2528_v10, %v2455_v35  ;;  %v3387_v10 = vadd.f32 %v3386_v8, %v3383_v63  ;;  %v3405_v21 = vadd.f32 %v3404_v18, %v3401_v17 }
 0x474   : > { %v5169_v41 = vpop.f32.mrf.mxu0  ;;  %v3568_v46 = vadd.f32 %v3567_v4, %v3564_v31 }
 0x475   : > { %v2708_v45 = vpop.f32.mrf.mxu1  ;;  %5196 = vmatprep.subr.mxu1 %v2529_v37  ;;  %v3391_v29 = vadd.f32 %v3390_v14, %v3387_v10 }
 0x476   : > { %5197 = vmatpush3.msra.mxu1 %v2529_v37  ;;  %v3581_v37 = vmul.f32 %v6327_v42, %v3580_v26 }
 0x477   : > { %v2635_v48 = vpop.f32.mrf.mxu0  ;;  %v5190_v49 = vpop.f32.mrf.mxu1  ;;  %5199 = vmatmul.mubr.msk.f32.vlgmr.msra.gmra.mxu1 %vm639_vm7, %v5938_v7  ;;  %5208 = vmatprep.subr.mxu1 %v5581_v1 }
 0x478   : > { %v2709_v52 = vadd.f32 %v2708_v45, %v2635_v48  ;;  %5209 = vmatpush3.msk.msra.mxu1 %vm5791_vm1, %v5583_v15  ;;  %5212 = vmatprep.mubr.msk.f32.mxu1 %vm5582_vm0, %v5581_v1  ;;  %v3395_v45 = vadd.f32 %v3394_v30, %v3391_v29  ;;  %v3396_v49 = vstv %s6446_s25  ;;  %v3897_v29 = vstv %s4827_s8  ;;  %s6551_s25 = sld [smem:[#allocation7 + $0x7]]  ;;  %s4411_s8 = scalar_lea.sflag [#allocation4], %s5743_s29 }
 0x479   : > { %v5183_v54 = vpop.f32.mrf.mxu0  ;;  %5210 = vmatprep.subr.mxu1 %v5581_v1  ;;  %v3900_v30 = vstv %s4828_s24  ;;  %v3898_v31 = vmul.f32 %v6327_v42, %v3897_v29 }
 0x47a   : > { %5191 = vmatprep.subr.mxu0 %v2709_v52  ;;  %5211 = vmatpush3.msk.msra.mxu1 %vm5796_vm2, %v5583_v15  ;;  %v3585_v54 = vadd.f32 %v3584_v38, %v3581_v37  ;;  %v3901_v4 = vmul.f32 %v6331_v44, %v3900_v30  ;;  %v3908_v37 = vstv %s6533_s30 }
 0x47b   : > { %5192 = vmatpush3.msra.mxu0 %v2709_v52  ;;  %5213 = vmatmul.mubr.msk.f32.vlgmr.msra.gmra.mxu1 %vm312_vm5, %v2883_v50  ;;  %v3409_v50 = vadd.f32 %v3408_v33, %v3405_v21  ;;  %v3574_v52 = vstv %s6453_s20  ;;  %v3904_v21 = vstv %s4829_s11  ;;  %v3915_v33 = vstv %s4831_s21  ;;  %s6558_s20 = sld [smem:[#allocation6 + $0x7e]] }
 0x47c   : > { %5194 = vmatmul.mubr.msk.f32.vlgmr.msra.gmra.mxu0 %vm639_vm7, %v5959_v32  ;;  %5201 = vmatprep.subr.mxu0 %v5581_v1  ;;  %v3575_v61 = vmul.f32 %v6258_v3, %v3574_v52  ;;  %v3589_v9 = vadd.f32 %v3588_v55, %v3585_v54  ;;  %v3905_v36 = vmul.f32 %v6251_v5, %v3904_v21  ;;  %v4085_v55 = vstv %s6545_s5 }
 0x47d   : > { %5202 = vmatpush3.msk.msra.mxu0 %vm5815_vm3, %v5583_v15  ;;  %5222 = vmatprep.subr.mxu1 %v5581_v1  ;;  %v3413_v63 = vadd.f32 %v3412_v51, %v3409_v50  ;;  %v3916_v38 = vmul.f32 %v6327_v42, %v3915_v33  ;;  %v3909_v50 = vmul.f32 %v6258_v3, %v3908_v37 }
 0x47e   : > { %5203 = vmatprep.subr.mxu0 %v5581_v1  ;;  %5205 = vmatprep.mubr.msk.f32.mxu0 %vm5582_vm0, %v5581_v1  ;;  %v4079_v51 = vmul.f32 %v6327_v42, %v4078_v40 }
 0x47f   : > { %5204 = vmatpush3.msk.msra.mxu0 %vm5821_vm4, %v5583_v15  ;;  %5223 = vmatpush3.msk.msra.mxu1 %vm5791_vm1, %v5583_v15  ;;  %v3414_v18 = vadd.f32 %v3413_v63, %v3396_v49 }
 0x480   : > { %5206 = vmatmul.mubr.msk.f32.vlgmr.msra.gmra.mxu0 %vm312_vm5, %v2900_v57  ;;  %5215 = vmatprep.subr.mxu0 %v5581_v1  ;;  %v3591_v57 = vstv %s6458_s4  ;;  %s6563_s4 = sld [smem:[#allocation6 + $0x7f]] }
 0x481   : > { %5224 = vmatprep.subr.mxu1 %v5581_v1  ;;  %5216 = vmatpush3.msk.msra.mxu0 %vm5815_vm3, %v5583_v15  ;;  %v3592_v0 = vmul.f32 %v6258_v3, %v3591_v57  ;;  %v3415_v25 = vmax.f32 %v3414_v18, 0.0  ;;  %v3926_v57 = vstv %s6547_s7 }
 0x482   : > { %5225 = vmatpush3.msk.msra.mxu1 %vm5796_vm2, %v5583_v15  ;;  %5226 = vmatprep.mubr.msk.f32.mxu1 %vm5582_vm0, %v5581_v1 }
 0x483   : > { %5217 = vmatprep.subr.mxu0 %v5581_v1  ;;  %5227 = vmatmul.mubr.msk.f32.vlgmr.msra.gmra.mxu1 %vm312_vm5, %v3063_v59  ;;  %v3397_v59 = vadd.f32 %v3396_v49, %v3395_v45  ;;  %v3593_v24 = vadd.f32 %v3592_v0, %v3589_v9  ;;  %v3922_v45 = vstv %s6535_s9  ;;  %v4086_v0 = vmul.f32 %v6251_v5, %v4085_v55 }
 0x484   : > { %5218 = vmatpush3.msk.msra.mxu0 %vm5821_vm4, %v5583_v15  ;;  %5219 = vmatprep.mubr.msk.f32.mxu0 %vm5582_vm0, %v5581_v1  ;;  %v3923_v54 = vmul.f32 %v6251_v5, %v3922_v45 }
 0x485   : > { %5220 = vmatmul.mubr.msk.f32.vlgmr.msra.gmra.mxu0 %vm312_vm5, %v3080_v60  ;;  %5236 = vmatprep.mubr.msk.f32.mxu1 %vm639_vm7, %v5889_v22  ;;  %v3572_v60 = vadd.f32 %v3571_v47, %v3568_v46  ;;  %v3398_v14 = vmax.f32 %v3397_v59, 0.0  ;;  %v3594_v26 = vadd.f32 %v3593_v24, %v3396_v49  ;;  %v4095_v46 = vstv %s6539_s22 }
 0x486   : > { %5231 = vmatprep.mubr.msk.f32.mxu0 %vm639_vm7, %v5896_v23  ;;  %v4098_v47 = vstv %s6541_s27  ;;  %v4106_v24 = vstv %s6563_s4 }
 0x487   : > { %v3576_v13 = vadd.f32 %v3575_v61, %v3572_v60  ;;  %v4099_v59 = vmul.f32 %v6331_v44, %v4098_v47  ;;  %v4102_v61 = vstv %s6549_s1 }
 0x488   : > { %v4103_v18 = vmul.f32 %v6251_v5, %v4102_v61 }
 0x537   : > { %v5200_v2 = vpop.f32.mrf.mxu1 }
 0x539   : > { %v2853_v28 = vpop.f32.mrf.mxu1 }
 0x53b   : > { %v3043_v35 = vpop.f32.mrf.mxu1 }
 0x53c   : > { %v5195_v39 = vpop.f32.mrf.mxu0 }
 0x53d   : > { %v2859_v41 = vadd.f32 %v5200_v2, %v5195_v39  ;;  %v5214_v43 = vpop.f32.mrf.mxu1  ;;  %v3577_v2 = vadd.f32 %v3576_v13, %v3396_v49  ;;  %v3919_v39 = vmul.f32 %v6331_v44, %v3918_v34  ;;  %v3927_v13 = vmul.f32 %v6258_v3, %v3926_v57 }
 0x53e   : > { %v2778_v48 = vpop.f32.mrf.mxu0 }
 0x53f   : > { %4755 = vst.msk [vmem:[%s6044_s23 + $0x48] sm:$0xff] %vm802_vm11, %v2859_v41  ;;  %v2854_v53 = vadd.f32 %v2853_v28, %v2778_v48  ;;  %v3578_v27 = vmax.f32 %v3577_v2, 0.0  ;;  %v3595_v28 = vmax.f32 %v3594_v26, 0.0  ;;  %v4081_v41 = vstv %s4842_s2 }
 0x540   : > { %v2970_v56 = vpop.f32.mrf.mxu0  ;;  %v4082_v52 = vmul.f32 %v6331_v44, %v4081_v41 }
 0x541   : > { %4754 = vst.msk [vmem:[%s6044_s23 + $0x40] sm:$0xff] %vm802_vm11, %v2854_v53  ;;  %v3044_v58 = vadd.f32 %v3043_v35, %v2970_v56  ;;  %v3902_v35 = vadd.f32 %v3901_v4, %v3898_v31  ;;  %v3920_v53 = vadd.f32 %v3919_v39, %v3916_v38  ;;  %v4107_v4 = vmul.f32 %v6258_v3, %v4106_v24 }
 0x542   : > { %v5207_v62 = vpop.f32.mrf.mxu0  ;;  %v4083_v9 = vadd.f32 %v4082_v52, %v4079_v51 }
 0x543   : > { %v3223_v8 = vpop.f32.mrf.mxu1  ;;  %5234 = vmatprep.subr.mxu1 %v3044_v58  ;;  %v3906_v49 = vadd.f32 %v3905_v36, %v3902_v35 }
 0x544   : > { %5235 = vmatpush3.msra.mxu1 %v3044_v58  ;;  %v4096_v58 = vmul.f32 %v6327_v42, %v4095_v46  ;;  %v4087_v26 = vadd.f32 %v4086_v0, %v4083_v9 }
 0x545   : > { %v3150_v6 = vpop.f32.mrf.mxu0  ;;  %v5228_v10 = vpop.f32.mrf.mxu1  ;;  %5237 = vmatmul.mubr.msk.f32.vlgmr.msra.gmra.mxu1 %vm639_vm7, %v5938_v7  ;;  %5246 = vmatprep.subr.mxu1 %v5581_v1 }
 0x546   : > { %v3224_v17 = vadd.f32 %v3223_v8, %v3150_v6  ;;  %5247 = vmatpush3.msk.msra.mxu1 %vm5791_vm1, %v5583_v15  ;;  %5250 = vmatprep.mubr.msk.f32.mxu1 %vm5582_vm0, %v5581_v1  ;;  %v3910_v8 = vadd.f32 %v3909_v50, %v3906_v49  ;;  %v3911_v10 = vstv %s6551_s25  ;;  %v4100_v44 = vadd.f32 %v4099_v59, %v4096_v58 }
 0x547   : > { %v5221_v16 = vpop.f32.mrf.mxu0  ;;  %5248 = vmatprep.subr.mxu1 %v5581_v1 }
 0x548   : > { %5229 = vmatprep.subr.mxu0 %v3224_v17  ;;  %5249 = vmatpush3.msk.msra.mxu1 %vm5796_vm2, %v5583_v15  ;;  %v4104_v31 = vadd.f32 %v4103_v18, %v4100_v44 }
 0x549   : > { %5230 = vmatpush3.msra.mxu0 %v3224_v17  ;;  %5251 = vmatmul.mubr.msk.f32.vlgmr.msra.gmra.mxu1 %vm312_vm5, %v3398_v14  ;;  %v3924_v14 = vadd.f32 %v3923_v54, %v3920_v53  ;;  %v4089_v17 = vstv %s6558_s20 }
 0x54a   : > { %5232 = vmatmul.mubr.msk.f32.vlgmr.msra.gmra.mxu0 %vm639_vm7, %v5959_v32  ;;  %5239 = vmatprep.subr.mxu0 %v5581_v1  ;;  %v4108_v37 = vadd.f32 %v4107_v4, %v4104_v31 }
 0x54b   : > { %5240 = vmatpush3.msk.msra.mxu0 %vm5815_vm3, %v5583_v15  ;;  %5260 = vmatprep.subr.mxu1 %v5581_v1  ;;  %v3928_v29 = vadd.f32 %v3927_v13, %v3924_v14 }
 0x54c   : > { %5241 = vmatprep.subr.mxu0 %v5581_v1  ;;  %5243 = vmatprep.mubr.msk.f32.mxu0 %vm5582_vm0, %v5581_v1  ;;  %v4109_v40 = vadd.f32 %v4108_v37, %v3911_v10 }
 0x54d   : > { %5242 = vmatpush3.msk.msra.mxu0 %vm5821_vm4, %v5583_v15  ;;  %5261 = vmatpush3.msk.msra.mxu1 %vm5791_vm1, %v5583_v15  ;;  %v3929_v36 = vadd.f32 %v3928_v29, %v3911_v10 }
 0x54e   : > { %5244 = vmatmul.mubr.msk.f32.vlgmr.msra.gmra.mxu0 %vm312_vm5, %v3415_v25  ;;  %5253 = vmatprep.subr.mxu0 %v5581_v1  ;;  %v3912_v25 = vadd.f32 %v3911_v10, %v3910_v8 }
 0x54f   : > { %5262 = vmatprep.subr.mxu1 %v5581_v1  ;;  %5254 = vmatpush3.msk.msra.mxu0 %vm5815_vm3, %v5583_v15  ;;  %v3930_v39 = vmax.f32 %v3929_v36, 0.0 }
 0x550   : > { %5263 = vmatpush3.msk.msra.mxu1 %vm5796_vm2, %v5583_v15  ;;  %5264 = vmatprep.mubr.msk.f32.mxu1 %vm5582_vm0, %v5581_v1  ;;  %v3913_v5 = vmax.f32 %v3912_v25, 0.0 }
 0x551   : > { %5255 = vmatprep.subr.mxu0 %v5581_v1  ;;  %5265 = vmatmul.mubr.msk.f32.vlgmr.msra.gmra.mxu1 %vm312_vm5, %v3578_v27  ;;  %v4090_v27 = vmul.f32 %v6258_v3, %v4089_v17 }
 0x552   : > { %5256 = vmatpush3.msk.msra.mxu0 %vm5821_vm4, %v5583_v15  ;;  %5257 = vmatprep.mubr.msk.f32.mxu0 %vm5582_vm0, %v5581_v1 }
 0x553   : > { %5258 = vmatmul.mubr.msk.f32.vlgmr.msra.gmra.mxu0 %vm312_vm5, %v3595_v28  ;;  %5274 = vmatprep.mubr.msk.f32.mxu1 %vm639_vm7, %v5889_v22  ;;  %v4091_v34 = vadd.f32 %v4090_v27, %v4087_v26 }
 0x554   : > { %5269 = vmatprep.mubr.msk.f32.mxu0 %vm639_vm7, %v5896_v23 }
 0x555   : > { %v4092_v38 = vadd.f32 %v4091_v34, %v3911_v10 }
 0x557   : > { %v4093_v41 = vmax.f32 %v4092_v38, 0.0 }
 0x605   : > { %v5238_v43 = vpop.f32.mrf.mxu1 }
 0x607   : > { %v3368_v48 = vpop.f32.mrf.mxu1 }
 0x609   : > { %v3558_v56 = vpop.f32.mrf.mxu1 }
 0x60a   : > { %v5233_v60 = vpop.f32.mrf.mxu0 }
 0x60b   : > { %v3374_v62 = vadd.f32 %v5238_v43, %v5233_v60  ;;  %v5252_v63 = vpop.f32.mrf.mxu1  ;;  %v4110_v43 = vmax.f32 %v4109_v40, 0.0 }
 0x60c   : > { %v3293_v6 = vpop.f32.mrf.mxu0 }
 0x60d   : > { %4790 = vst.msk [vmem:[%s6044_s23 + $0x58] sm:$0xff] %vm802_vm11, %v3374_v62  ;;  %v3369_v42 = vadd.f32 %v3368_v48, %v3293_v6 }
 0x60e   : > { %v3485_v16 = vpop.f32.mrf.mxu0 }
 0x60f   : > { %4789 = vst.msk [vmem:[%s6044_s23 + $0x50] sm:$0xff] %vm802_vm11, %v3369_v42  ;;  %v3559_v2 = vadd.f32 %v3558_v56, %v3485_v16 }
 0x610   : > { %v5245_v28 = vpop.f32.mrf.mxu0 }
 0x611   : > { %v3738_v30 = vpop.f32.mrf.mxu1  ;;  %5272 = vmatprep.subr.mxu1 %v3559_v2 }
 0x612   : > { %5273 = vmatpush3.msra.mxu1 %v3559_v2 }
 0x613   : > { %v3665_v21 = vpop.f32.mrf.mxu0  ;;  %v5266_v33 = vpop.f32.mrf.mxu1  ;;  %5275 = vmatmul.mubr.msk.f32.vlgmr.msra.gmra.mxu1 %vm639_vm7, %v5938_v7  ;;  %5284 = vmatprep.subr.mxu1 %v5581_v1 }
 0x614   : > { %v3739_v35 = vadd.f32 %v3738_v30, %v3665_v21  ;;  %5285 = vmatpush3.msk.msra.mxu1 %vm5791_vm1, %v5583_v15  ;;  %5288 = vmatprep.mubr.msk.f32.mxu1 %vm5582_vm0, %v5581_v1 }
 0x615   : > { %v5259_v3 = vpop.f32.mrf.mxu0  ;;  %5286 = vmatprep.subr.mxu1 %v5581_v1 }
 0x616   : > { %5267 = vmatprep.subr.mxu0 %v3739_v35  ;;  %5287 = vmatpush3.msk.msra.mxu1 %vm5796_vm2, %v5583_v15 }
 0x617   : > { %5268 = vmatpush3.msra.mxu0 %v3739_v35  ;;  %5289 = vmatmul.mubr.msk.f32.vlgmr.msra.gmra.mxu1 %vm312_vm5, %v3913_v5 }
 0x618   : > { %5270 = vmatmul.mubr.msk.f32.vlgmr.msra.gmra.mxu0 %vm639_vm7, %v5959_v32  ;;  %5277 = vmatprep.subr.mxu0 %v5581_v1 }
 0x619   : > { %5278 = vmatpush3.msk.msra.mxu0 %vm5815_vm3, %v5583_v15  ;;  %5298 = vmatprep.subr.mxu1 %v5581_v1 }
 0x61a   : > { %5279 = vmatprep.subr.mxu0 %v5581_v1  ;;  %5281 = vmatprep.mubr.msk.f32.mxu0 %vm5582_vm0, %v5581_v1 }
 0x61b   : > { %5280 = vmatpush3.msk.msra.mxu0 %vm5821_vm4, %v5583_v15  ;;  %5299 = vmatpush3.msk.msra.mxu1 %vm5791_vm1, %v5583_v15 }
 0x61c   : > { %5282 = vmatmul.mubr.msk.f32.vlgmr.msra.gmra.mxu0 %vm312_vm5, %v3930_v39  ;;  %5291 = vmatprep.subr.mxu0 %v5581_v1 }
 0x61d   : > { %5300 = vmatprep.subr.mxu1 %v5581_v1  ;;  %5292 = vmatpush3.msk.msra.mxu0 %vm5815_vm3, %v5583_v15 }
 0x61e   : > { %5301 = vmatpush3.msk.msra.mxu1 %vm5796_vm2, %v5583_v15  ;;  %5302 = vmatprep.mubr.msk.f32.mxu1 %vm5582_vm0, %v5581_v1 }
 0x61f   : > { %5293 = vmatprep.subr.mxu0 %v5581_v1  ;;  %5303 = vmatmul.mubr.msk.f32.vlgmr.msra.gmra.mxu1 %vm312_vm5, %v4093_v41 }
 0x620   : > { %5294 = vmatpush3.msk.msra.mxu0 %vm5821_vm4, %v5583_v15  ;;  %5295 = vmatprep.mubr.msk.f32.mxu0 %vm5582_vm0, %v5581_v1 }
 0x621   : > { %5296 = vmatmul.mubr.msk.f32.vlgmr.msra.gmra.mxu0 %vm312_vm5, %v4110_v43  ;;  %5312 = vmatprep.mubr.msk.f32.mxu1 %vm639_vm7, %v5889_v22 }
 0x622   : > { %5307 = vmatprep.mubr.msk.f32.mxu0 %vm639_vm7, %v5896_v23 }
 0x6d3   : > { %v5276_v11 = vpop.f32.mrf.mxu1 }
 0x6d5   : > { %v3883_v12 = vpop.f32.mrf.mxu1 }
 0x6d7   : > { %v4073_v19 = vpop.f32.mrf.mxu1 }
 0x6d8   : > { %v5271_v45 = vpop.f32.mrf.mxu0 }
 0x6d9   : > { %v3889_v46 = vadd.f32 %v5276_v11, %v5271_v45  ;;  %v5290_v47 = vpop.f32.mrf.mxu1 }
 0x6da   : > { %v3808_v20 = vpop.f32.mrf.mxu0 }
 0x6db   : > { %4825 = vst.msk [vmem:[%s6044_s23 + $0x68] sm:$0xff] %vm802_vm11, %v3889_v46  ;;  %v3884_v15 = vadd.f32 %v3883_v12, %v3808_v20 }
 0x6dc   : > { %v4000_v48 = vpop.f32.mrf.mxu0 }
 0x6dd   : > { %4824 = vst.msk [vmem:[%s6044_s23 + $0x60] sm:$0xff] %vm802_vm11, %v3884_v15  ;;  %v4074_v1 = vadd.f32 %v4073_v19, %v4000_v48 }
 0x6de   : > { %v5283_v49 = vpop.f32.mrf.mxu0 }
 0x6df   : > { %v4253_v50 = vpop.f32.mrf.mxu1  ;;  %5310 = vmatprep.subr.mxu1 %v4074_v1 }
 0x6e0   : > { %5311 = vmatpush3.msra.mxu1 %v4074_v1 }
 0x6e1   : > { %v4180_v22 = vpop.f32.mrf.mxu0  ;;  %v5304_v23 = vpop.f32.mrf.mxu1  ;;  %5313 = vmatmul.mubr.msk.f32.vlgmr.msra.gmra.mxu1 %vm639_vm7, %v5938_v7 }
 0x6e2   : > { %v4254_v51 = vadd.f32 %v4253_v50, %v4180_v22 }
 0x6e3   : > { %v5297_v52 = vpop.f32.mrf.mxu0 }
 0x6e4   : > { %5305 = vmatprep.subr.mxu0 %v4254_v51 }
 0x6e5   : > { %5306 = vmatpush3.msra.mxu0 %v4254_v51 }
 0x6e6   : > { %5308 = vmatmul.mubr.msk.f32.vlgmr.msra.gmra.mxu0 %vm639_vm7, %v5959_v32 }
 0x7a1   : > { %v5314_v53 = vpop.f32.mrf.mxu1 }
 0x7a3   : > { %v4398_v57 = vpop.f32.mrf.mxu1 }
 0x7a6   : > { %v5309_v54 = vpop.f32.mrf.mxu0 }
 0x7a7   : > { %v4404_v55 = vadd.f32 %v5314_v53, %v5309_v54 }
 0x7a8   : > { %v4323_v56 = vpop.f32.mrf.mxu0 }
 0x7a9   : > { %4860 = vst.msk [vmem:[%s6044_s23 + $0x78] sm:$0xff] %vm802_vm11, %v4404_v55  ;;  %v4399_v58 = vadd.f32 %v4398_v57, %v4323_v56 }
 0x7ab   : > { %4859 = vst.msk [vmem:[%s6044_s23 + $0x70] sm:$0xff] %vm802_vm11, %v4399_v58 }
 0x7ac   : > { %s4862_s24 = sshll.u32 %s5557_s15, 1  ;;  %s4863_s11 = sshll.u32 %s5561_s16, 5 }
 0x7ad   : > { %s4423_s21 = sadd.s32 %s4863_s11, %s4862_s24  ;;  %s4436_s30 = sshll.u32 %s6044_s23, 4  ;;  %s4437_s30 = int_to_ptr.vmem [resolvable:$true] %s4436_s30 }
 0x7ae   : > { %s4864_s6 = sshll.u32 %s4423_s21, 7  ;;  %s5584_s2 = smov 256  }
 0x7af   : > { %s4425_s29 = scalar_lea.hbm %s6702_s3, %s4864_s6  ;;  %p6740_p3 = scmp.ne.s32.totalorder %s6718_s26, 0 }
 0x7b0   : > { %s5585_s22 = smov 512   ;;  %s5586_s27 = smov 2  }
 0x7b1   : > { %5325 = sst [smem:[#allocation11]] (%p6740_p3), %s5584_s2  ;;  %s5587_s15 = smov 128  }
 0x7b2   : > { %5326 = sst [smem:[#allocation11 + $0x1]] (%p6740_p3), %s5585_s22  ;;  %s5588_s16 = smov 8  }
 0x7b3   : > { %5327 = sst [smem:[#allocation11 + $0x2]] (%p6740_p3), %s5586_s27  ;;  %s5589_s23 = smov 131072  }
 0x7b4   : > { %5328 = sst [smem:[#allocation11 + $0x3]] (%p6740_p3), %s5587_s15  ;;  %s5590_s5 = smov 0  }
 0x7b5   : > { %5329 = sst [smem:[#allocation11 + $0x4]] (%p6740_p3), %s5587_s15 }
 0x7b6   : > { %5330 = sst [smem:[#allocation11 + $0x5]] (%p6740_p3), %s5588_s16 }
 0x7b7   : > { %5331 = dma.general (%p6740_p3), %s4437_s30, 2048, %s4425_s29, %s4411_s8, %s5589_s23, [#allocation11], %s5590_s5, 0  }
 0x7b8 PF: > { %s6741_s7 = sld [smem:[#allocation16_spill]]  ;;  %p5353_p8 = scmp.ge.s32.totalorder %s5573_s19, 2 }
 0x7b9   : > { %s6742_s1 = sld [smem:[#allocation17_spill]] }
 0x7be   : > { %s4464_s25 = sand.u32 1, %s6741_s7  }
 0x7bf   : > { %p6743_p9 = scmp.ne.s32.totalorder %s6742_s1, 0  ;;  %s4465_s20 = scalar_lea.sflag [#allocation4], %s4464_s25 }
 0x7c1   : > { %p5345_p12 = pnand %p5353_p8, %p6743_p9 }
 0x7c3   : > { %p5346_p1 = pneg %p5345_p12 }
 0x7c5   : > { %5540 = dma.done.wait (%p5346_p1), %s4465_s20, 2048  }
 0x7c6   : > { %5542 = vsyncadd (%p5346_p1), %s4465_s20, 4294965248  ;;  %s21_s19 = sadd.s32 1, %s5573_s19   ;;  %s6744_s4 = smov %s5734_s12 }
 0x7c7   : > { %p18_p2 = scmp.ge.s32.totalorder %s21_s19, 6   ;;  %s6745_s26 = sld [smem:[#allocation18_spill]] }
 0x7c8   : > { %s6746_s12 = smov %s5549_s13  ;;  %s6747_s13 = smov %s5553_s14 }
 0x7c9   : > { %s6748_s14 = smov %s6744_s4  ;;  %s6749_s15 = smov %s5565_s17 }
 0x7ca   : > { %s6750_s16 = smov %s5569_s18  ;;  %s6752_s18 = smov %s6758_s28 }
 0x7cb   :  { %20 = sbr.rel (!%p18_p2) target bundleno = 12 (0xc), region = 101 }
 0x7cd   : > { %s6751_s17 = smov %s6745_s26 }
 0x7d0   :  { %4470 = vsyncpa [#allocation3], 1 }
 0x7d1   :  { %4472 = vsyncpa [#allocation3 + $0x1], 1 }
 0x7d2   :  { %4473 = vsyncpa [#allocation4], 1 }
 0x7d3   :  { %4475 = vsyncpa [#allocation4 + $0x1], 1 }
 0x7d4   :  { %4476 = vsyncpa [#allocation5], 1 }
 0x7d5   :  { %4478 = vsyncpa [#allocation5 + $0x1], 1 }
 0x7d6   :  { %4479 = vsyncpa [#allocation8], 1 }

</bundles_post_ra>
